<compile_context>
chip_gen: v5e
topology: v5e:2x2
jax: 0.10.0
libtpu: 0.0.40
codegen_flags: <defaults>
</compile_context>

<pallas_src>
import functools

import jax
import jax.numpy as jnp
from jax import lax
from jax.experimental import pallas as pl
from jax.experimental.pallas import tpu as pltpu

# ---- model hyper-parameters (small, TPU-tile friendly) ----------------------
D_MODEL = 128          # original: 256
NUM_HEADS = 8
HEAD_DIM = D_MODEL // NUM_HEADS
NUM_LAYERS = 2         # original: 4
VOCAB_SIZE = 512       # original: 10000
FFN_DIM = 4 * D_MODEL
MAX_POS = 512
LN_EPS = 1e-5

_SQRT_2_OVER_PI = 0.7978845608028654


# ---- helpers used inside the kernel -----------------------------------------
def _layernorm(x, gamma, beta):
    mean = jnp.mean(x, axis=-1, keepdims=True)
    var = jnp.mean(jnp.square(x - mean), axis=-1, keepdims=True)
    return (x - mean) * lax.rsqrt(var + LN_EPS) * gamma + beta


def _gelu_tanh(x):
    # tanh-approximate GELU: the tanh lowers to the EUP slot (frees VALU on
    # v5e); difference vs. exact-erf GELU is well inside the bf16-weight
    # tolerance of this kernel.
    return 0.5 * x * (1.0 + jnp.tanh(_SQRT_2_OVER_PI * (x + 0.044715 * x * x * x)))


def _mm(x_f32, w_bf16):
    # bf16 MXU matmul with f32 accumulation (weights stored in bf16).
    return jnp.dot(x_f32.astype(jnp.bfloat16), w_bf16,
                   preferred_element_type=jnp.float32)


# ---- the fused per-batch-element kernel --------------------------------------
def make_kernel(seq, num_layers, use_ttt):
    S, D, H, Hd = seq, D_MODEL, NUM_HEADS, HEAD_DIM
    scale = 1.0 / (Hd ** 0.5)

    def kernel(*refs):
        if use_ttt:
            x_ref, ttt_w_ref, *rest = refs
        else:
            x_ref, *rest = refs
            ttt_w_ref = None
        (wqkv_ref, bqkv_ref, wo_ref, bo_ref,
         g1_ref, be1_ref, w1_ref, b1_ref,
         w2_ref, b2_ref, g2_ref, be2_ref,
         out_w_ref, out_b_ref,
         logits_ref, hidden_ref, ctx_scratch) = rest

        x = x_ref[...].reshape(S, D).astype(jnp.float32)          # (S, D)

        if use_ttt:
            x = x + jnp.tanh(_mm(x, ttt_w_ref[...]))

        for l in range(num_layers):                                # static unroll
            # ---- multi-head self-attention ----
            qkv = _mm(x, wqkv_ref[l]) + bqkv_ref[l]                # (S, 3D) f32
            # bf16 operands for the attention matmuls (f32 accumulation)
            q = qkv[:, :D].astype(jnp.bfloat16)
            k = qkv[:, D:2 * D].astype(jnp.bfloat16)
            v = qkv[:, 2 * D:3 * D].astype(jnp.bfloat16)

            for h in range(H):                                     # static unroll
                lo = h * Hd
                qh = q[:, lo:lo + Hd]
                kh = k[:, lo:lo + Hd]
                vh = v[:, lo:lo + Hd]
                s = lax.dot_general(qh, kh, (((1,), (1,)), ((), ())),
                                    preferred_element_type=jnp.float32) * scale
                s = s - jnp.max(s, axis=-1, keepdims=True)
                p = jnp.exp(s)
                inv_den = pl.reciprocal(jnp.sum(p, axis=-1, keepdims=True),
                                        approx=True)
                attn = (p * inv_den).astype(jnp.bfloat16)
                # write this head's context into the VMEM scratch at a static
                # column offset (replaces the old 8-way lane concat)
                ctx_scratch[:, lo:lo + Hd] = jnp.dot(
                    attn, vh, preferred_element_type=jnp.float32)

            attn_out = _mm(ctx_scratch[...], wo_ref[l]) + bo_ref[l]

            # ---- residual + layernorm 1 ----
            h1 = _layernorm(x + attn_out, g1_ref[l], be1_ref[l])

            # ---- feed-forward (gelu) + residual + layernorm 2 ----
            ff = _mm(_gelu_tanh(_mm(h1, w1_ref[l]) + b1_ref[l]), w2_ref[l]) + b2_ref[l]
            x = _layernorm(h1 + ff, g2_ref[l], be2_ref[l])

        hidden_ref[...] = x.reshape(1, S, D).astype(hidden_ref.dtype)
        logits = _mm(x, out_w_ref[...]) + out_b_ref[...]
        logits_ref[...] = logits.reshape(1, S, -1).astype(logits_ref.dtype)

    return kernel


# ---- forward pass --------------------------------------------------------------
@functools.partial(jax.jit, static_argnames=("use_ttt", "logits_dtype"))
def forward(params, input_ids, use_ttt=False, logits_dtype=jnp.float32):
    B, S = input_ids.shape
    D, F, V, L, H = D_MODEL, FFN_DIM, VOCAB_SIZE, NUM_LAYERS, NUM_HEADS
    M = B * S

    # embedding gathers are glue (plain JAX)
    tok = jnp.take(params["token_embedding"], input_ids, axis=0)       # (B, S, D)
    pos = params["position_embedding"][:S][None, :, :]                 # (1, S, D)
    x = tok + pos                                                      # (B, S, D)

    weight_names = ("wqkv", "bqkv", "wo", "bo", "g1", "be1", "w1", "b1",
                    "w2", "b2", "g2", "be2", "out_w", "out_b")

    inputs = [x]
    in_specs = [pl.BlockSpec((1, S, D), lambda b: (b, 0, 0))]
    if use_ttt:
        # only DMA the TTT fast weights when they are actually read
        inputs.append(params["ttt_fast_weights"])
        in_specs.append(pl.BlockSpec((D, D), lambda b: (0, 0)))
    for name in weight_names:
        w = params[name]
        inputs.append(w)
        in_specs.append(pl.BlockSpec(w.shape, lambda b, _nd=w.ndim: (0,) * _nd))

    # advisory cost estimate for the XLA scheduler
    flops = (L * M * (2 * D * 3 * D + 2 * D * D + 4 * D * F)   # qkv/out-proj/ffn
             + L * 4 * B * S * S * D                           # 2 SxHd matmuls/head, all heads
             + 2 * M * D * V                                   # output projection
             + (2 * M * D * D if use_ttt else 0))
    transcendentals = L * (M * F + B * H * S * S) + (M * D if use_ttt else 0)
    weight_bytes = 2 * (L * (D * 3 * D + D * D + 2 * D * F) + D * V
                        + (D * D if use_ttt else 0))           # bf16
    bias_bytes = 4 * (L * (3 * D + 6 * D + F) + V)
    act_bytes = (4 * M * D                                      # x in
                 + 4 * M * D                                    # hidden out
                 + M * V * jnp.dtype(logits_dtype).itemsize)    # logits out
    cost = pl.CostEstimate(flops=flops, transcendentals=transcendentals,
                           bytes_accessed=weight_bytes + bias_bytes + act_bytes)

    kernel = make_kernel(seq=S, num_layers=L, use_ttt=use_ttt)

    logits, hidden = pl.pallas_call(
        kernel,
        grid=(B,),
        in_specs=in_specs,
        out_specs=(pl.BlockSpec((1, S, V), lambda b: (b, 0, 0)),
                   pl.BlockSpec((1, S, D), lambda b: (b, 0, 0))),
        out_shape=(jax.ShapeDtypeStruct((B, S, V), logits_dtype),
                   jax.ShapeDtypeStruct((B, S, D), jnp.float32)),
        scratch_shapes=[pltpu.VMEM((S, D), jnp.float32)],
        compiler_params=pltpu.CompilerParams(dimension_semantics=("parallel",)),
        cost_estimate=cost,
    )(*inputs)

    return {"logits": logits, "hidden_states": hidden}


# ---- parameter init (deterministic, synthetic) ---------------------------------
def init_params(key):
    L, D, F, V = NUM_LAYERS, D_MODEL, FFN_DIM, VOCAB_SIZE
    ks = jax.random.split(key, 5)
    lk = jax.random.split(ks[4], 4)

    def nrm(kk, shape, scale=0.02, dtype=jnp.float32):
        return (jax.random.normal(kk, shape, dtype=jnp.float32) * scale).astype(dtype)

    return {
        "token_embedding": nrm(ks[0], (V, D)),
        "position_embedding": nrm(ks[1], (MAX_POS, D)),
        # matmul weights stored pre-transposed (x @ W) and in bf16
        "out_w": nrm(ks[2], (D, V), dtype=jnp.bfloat16),          # Linear.weight.T
        "out_b": jnp.zeros((1, V), jnp.float32),
        "ttt_fast_weights": nrm(ks[3], (D, D), 0.01, dtype=jnp.bfloat16),
        # per-layer weights stacked with a leading layer axis
        "wqkv": nrm(lk[0], (L, D, 3 * D), dtype=jnp.bfloat16),    # in_proj_weight.T
        "bqkv": jnp.zeros((L, 1, 3 * D), jnp.float32),
        "wo": nrm(lk[1], (L, D, D), dtype=jnp.bfloat16),          # out_proj.weight.T
        "bo": jnp.zeros((L, 1, D), jnp.float32),
        "g1": jnp.ones((L, 1, D), jnp.float32),
        "be1": jnp.zeros((L, 1, D), jnp.float32),
        "w1": nrm(lk[2], (L, D, F), dtype=jnp.bfloat16),          # linear1.weight.T
        "b1": jnp.zeros((L, 1, F), jnp.float32),
        "w2": nrm(lk[3], (L, F, D), dtype=jnp.bfloat16),          # linear2.weight.T
        "b2": jnp.zeros((L, 1, D), jnp.float32),
        "g2": jnp.ones((L, 1, D), jnp.float32),
        "be2": jnp.zeros((L, 1, D), jnp.float32),
    }


if __name__ == "__main__":
    key = jax.random.PRNGKey(0)
    pkey, dkey = jax.random.split(key)
    params = init_params(pkey)

    B, S = 2, 8
    input_ids = jax.random.randint(dkey, (B, S), 0, VOCAB_SIZE, dtype=jnp.int32)

    out = forward(params, input_ids)
    jax.block_until_ready(out)
    assert out["logits"].shape == (B, S, VOCAB_SIZE)
    assert out["hidden_states"].shape == (B, S, D_MODEL)
    assert bool(jnp.all(jnp.isfinite(out["logits"])))
    assert bool(jnp.all(jnp.isfinite(out["hidden_states"])))

    out_ttt = forward(params, input_ids, use_ttt=True)   # exercise the TTT path too
    jax.block_until_ready(out_ttt)
    assert out_ttt["logits"].shape == (B, S, VOCAB_SIZE)
    assert bool(jnp.all(jnp.isfinite(out_ttt["logits"])))

    print("KERNEL_OK")
</pallas_src>

<mosaic_0001>
module attributes {stable_mosaic.version = 11 : i64} {
  func.func @kernel(%arg0: i32, %arg1: memref<1x8x128xf32, #tpu.memory_space<vmem>>, %arg2: memref<2x128x384xbf16, #tpu.memory_space<vmem>>, %arg3: memref<2x1x384xf32, #tpu.memory_space<vmem>>, %arg4: memref<2x128x128xbf16, #tpu.memory_space<vmem>>, %arg5: memref<2x1x128xf32, #tpu.memory_space<vmem>>, %arg6: memref<2x1x128xf32, #tpu.memory_space<vmem>>, %arg7: memref<2x1x128xf32, #tpu.memory_space<vmem>>, %arg8: memref<2x128x512xbf16, #tpu.memory_space<vmem>>, %arg9: memref<2x1x512xf32, #tpu.memory_space<vmem>>, %arg10: memref<2x512x128xbf16, #tpu.memory_space<vmem>>, %arg11: memref<2x1x128xf32, #tpu.memory_space<vmem>>, %arg12: memref<2x1x128xf32, #tpu.memory_space<vmem>>, %arg13: memref<2x1x128xf32, #tpu.memory_space<vmem>>, %arg14: memref<128x512xbf16, #tpu.memory_space<vmem>>, %arg15: memref<1x512xf32, #tpu.memory_space<vmem>>, %arg16: memref<1x8x512xf32, #tpu.memory_space<vmem>>, %arg17: memref<1x8x128xf32, #tpu.memory_space<vmem>>, %arg18: memref<8x128xf32, #tpu.memory_space<vmem>>) attributes {dimension_semantics = [#tpu.dimension_semantics<parallel>], iteration_bounds = array<i64: 2>, scalar_prefetch = 0 : i64, scratch_operands = 1 : i64, tpu.core_type = #tpu.core_type<tc>, window_params = [{transform_indices = @transform_0, window_bounds = array<i64: 1, 8, 128>}, {pipeline_mode = #tpu.pipeline_mode<synchronous>, transform_indices = @transform_1, window_bounds = array<i64: 2, 128, 384>}, {pipeline_mode = #tpu.pipeline_mode<synchronous>, transform_indices = @transform_2, window_bounds = array<i64: 2, 1, 384>}, {pipeline_mode = #tpu.pipeline_mode<synchronous>, transform_indices = @transform_3, window_bounds = array<i64: 2, 128, 128>}, {pipeline_mode = #tpu.pipeline_mode<synchronous>, transform_indices = @transform_4, window_bounds = array<i64: 2, 1, 128>}, {pipeline_mode = #tpu.pipeline_mode<synchronous>, transform_indices = @transform_5, window_bounds = array<i64: 2, 1, 128>}, {pipeline_mode = #tpu.pipeline_mode<synchronous>, transform_indices = @transform_6, window_bounds = array<i64: 2, 1, 128>}, {pipeline_mode = #tpu.pipeline_mode<synchronous>, transform_indices = @transform_7, window_bounds = array<i64: 2, 128, 512>}, {pipeline_mode = #tpu.pipeline_mode<synchronous>, transform_indices = @transform_8, window_bounds = array<i64: 2, 1, 512>}, {pipeline_mode = #tpu.pipeline_mode<synchronous>, transform_indices = @transform_9, window_bounds = array<i64: 2, 512, 128>}, {pipeline_mode = #tpu.pipeline_mode<synchronous>, transform_indices = @transform_10, window_bounds = array<i64: 2, 1, 128>}, {pipeline_mode = #tpu.pipeline_mode<synchronous>, transform_indices = @transform_11, window_bounds = array<i64: 2, 1, 128>}, {pipeline_mode = #tpu.pipeline_mode<synchronous>, transform_indices = @transform_12, window_bounds = array<i64: 2, 1, 128>}, {pipeline_mode = #tpu.pipeline_mode<synchronous>, transform_indices = @transform_13, window_bounds = array<i64: 128, 512>}, {pipeline_mode = #tpu.pipeline_mode<synchronous>, transform_indices = @transform_14, window_bounds = array<i64: 1, 512>}, {transform_indices = @transform_15, window_bounds = array<i64: 1, 8, 512>}, {transform_indices = @transform_16, window_bounds = array<i64: 1, 8, 128>}]} {
    %c0 = arith.constant 0 : index
    %c0_0 = arith.constant 0 : index
    %c0_1 = arith.constant 0 : index
    %0 = vector.load %arg1[%c0, %c0_0, %c0_1] : memref<1x8x128xf32, #tpu.memory_space<vmem>>, vector<1x8x128xf32>
    %1 = vector.shape_cast %0 : vector<1x8x128xf32> to vector<8x128xf32>
    %c0_2 = arith.constant 0 : index
    %c0_3 = arith.constant 0 : index
    %c0_4 = arith.constant 0 : index
    %2 = vector.load %arg2[%c0_2, %c0_3, %c0_4] : memref<2x128x384xbf16, #tpu.memory_space<vmem>>, vector<1x128x384xbf16>
    %3 = vector.shape_cast %2 : vector<1x128x384xbf16> to vector<128x384xbf16>
    %4 = arith.truncf %1 : vector<8x128xf32> to vector<8x128xbf16>
    %cst = arith.constant dense<0.000000e+00> : vector<8x384xf32>
    %5 = tpu.matmul %4, %3, %cst {dimension_numbers = #tpu.dot_dimension_numbers<[1], [0], [0], [1], [0, 0, 1, 1], [], []>} : vector<8x128xbf16>, vector<128x384xbf16>, vector<8x384xf32> -> vector<8x384xf32>
    %c0_5 = arith.constant 0 : index
    %c0_6 = arith.constant 0 : index
    %c0_7 = arith.constant 0 : index
    %6 = vector.load %arg3[%c0_5, %c0_6, %c0_7] : memref<2x1x384xf32, #tpu.memory_space<vmem>>, vector<1x1x384xf32>
    %7 = vector.shape_cast %6 : vector<1x1x384xf32> to vector<1x384xf32>
    %8 = vector.broadcast %7 : vector<1x384xf32> to vector<8x384xf32>
    %9 = arith.addf %5, %8 : vector<8x384xf32>
    %10 = vector.extract_strided_slice %9 {offsets = [0, 0], sizes = [8, 128], strides = [1, 1]} : vector<8x384xf32> to vector<8x128xf32>
    %11 = arith.truncf %10 : vector<8x128xf32> to vector<8x128xbf16>
    %12 = vector.extract_strided_slice %9 {offsets = [0, 128], sizes = [8, 128], strides = [1, 1]} : vector<8x384xf32> to vector<8x128xf32>
    %13 = arith.truncf %12 : vector<8x128xf32> to vector<8x128xbf16>
    %14 = vector.extract_strided_slice %9 {offsets = [0, 256], sizes = [8, 128], strides = [1, 1]} : vector<8x384xf32> to vector<8x128xf32>
    %15 = arith.truncf %14 : vector<8x128xf32> to vector<8x128xbf16>
    %16 = vector.extract_strided_slice %11 {offsets = [0, 0], sizes = [8, 16], strides = [1, 1]} : vector<8x128xbf16> to vector<8x16xbf16>
    %17 = vector.extract_strided_slice %13 {offsets = [0, 0], sizes = [8, 16], strides = [1, 1]} : vector<8x128xbf16> to vector<8x16xbf16>
    %18 = vector.extract_strided_slice %15 {offsets = [0, 0], sizes = [8, 16], strides = [1, 1]} : vector<8x128xbf16> to vector<8x16xbf16>
    %cst_8 = arith.constant dense<0.000000e+00> : vector<8x8xf32>
    %19 = tpu.matmul %16, %17, %cst_8 {dimension_numbers = #tpu.dot_dimension_numbers<[1], [1], [0], [0], [0, 0, 1, 0], [], []>} : vector<8x16xbf16>, vector<8x16xbf16>, vector<8x8xf32> -> vector<8x8xf32>
    %cst_9 = arith.constant 2.500000e-01 : f32
    %20 = vector.broadcast %cst_9 : f32 to vector<8x8xf32>
    %21 = arith.mulf %19, %20 : vector<8x8xf32>
    %cst_10 = arith.constant dense<0xFF800000> : vector<8xf32>
    %22 = vector.multi_reduction <maximumf>, %21, %cst_10 [1] : vector<8x8xf32> to vector<8xf32>
    %23 = vector.shape_cast %22 : vector<8xf32> to vector<8x1xf32>
    %24 = vector.broadcast %23 : vector<8x1xf32> to vector<8x8xf32>
    %25 = arith.subf %21, %24 : vector<8x8xf32>
    %26 = math.exp %25 : vector<8x8xf32>
    %cst_11 = arith.constant dense<0.000000e+00> : vector<8xf32>
    %27 = vector.multi_reduction <add>, %26, %cst_11 [1] : vector<8x8xf32> to vector<8xf32>
    %28 = vector.shape_cast %27 : vector<8xf32> to vector<8x1xf32>
    %29 = tpu.reciprocal %28 {approx = true} : vector<8x1xf32> -> vector<8x1xf32>
    %30 = vector.broadcast %29 : vector<8x1xf32> to vector<8x8xf32>
    %31 = arith.mulf %26, %30 : vector<8x8xf32>
    %32 = arith.truncf %31 : vector<8x8xf32> to vector<8x8xbf16>
    %cst_12 = arith.constant dense<0.000000e+00> : vector<8x16xf32>
    %33 = tpu.matmul %32, %18, %cst_12 {dimension_numbers = #tpu.dot_dimension_numbers<[1], [0], [0], [1], [0, 0, 1, 1], [], []>} : vector<8x8xbf16>, vector<8x16xbf16>, vector<8x16xf32> -> vector<8x16xf32>
    %c0_13 = arith.constant 0 : index
    %c0_14 = arith.constant 0 : index
    %34 = vector.load %arg18[%c0_13, %c0_14] : memref<8x128xf32, #tpu.memory_space<vmem>>, vector<8x16xf32>
    tpu.vector_store %arg18[%c0_13, %c0_14], %33 {strides = array<i32>} : memref<8x128xf32, #tpu.memory_space<vmem>>, vector<8x16xf32>,
    %35 = vector.extract_strided_slice %11 {offsets = [0, 16], sizes = [8, 16], strides = [1, 1]} : vector<8x128xbf16> to vector<8x16xbf16>
    %36 = vector.extract_strided_slice %13 {offsets = [0, 16], sizes = [8, 16], strides = [1, 1]} : vector<8x128xbf16> to vector<8x16xbf16>
    %37 = vector.extract_strided_slice %15 {offsets = [0, 16], sizes = [8, 16], strides = [1, 1]} : vector<8x128xbf16> to vector<8x16xbf16>
    %cst_15 = arith.constant dense<0.000000e+00> : vector<8x8xf32>
    %38 = tpu.matmul %35, %36, %cst_15 {dimension_numbers = #tpu.dot_dimension_numbers<[1], [1], [0], [0], [0, 0, 1, 0], [], []>} : vector<8x16xbf16>, vector<8x16xbf16>, vector<8x8xf32> -> vector<8x8xf32>
    %cst_16 = arith.constant 2.500000e-01 : f32
    %39 = vector.broadcast %cst_16 : f32 to vector<8x8xf32>
    %40 = arith.mulf %38, %39 : vector<8x8xf32>
    %cst_17 = arith.constant dense<0xFF800000> : vector<8xf32>
    %41 = vector.multi_reduction <maximumf>, %40, %cst_17 [1] : vector<8x8xf32> to vector<8xf32>
    %42 = vector.shape_cast %41 : vector<8xf32> to vector<8x1xf32>
    %43 = vector.broadcast %42 : vector<8x1xf32> to vector<8x8xf32>
    %44 = arith.subf %40, %43 : vector<8x8xf32>
    %45 = math.exp %44 : vector<8x8xf32>
    %cst_18 = arith.constant dense<0.000000e+00> : vector<8xf32>
    %46 = vector.multi_reduction <add>, %45, %cst_18 [1] : vector<8x8xf32> to vector<8xf32>
    %47 = vector.shape_cast %46 : vector<8xf32> to vector<8x1xf32>
    %48 = tpu.reciprocal %47 {approx = true} : vector<8x1xf32> -> vector<8x1xf32>
    %49 = vector.broadcast %48 : vector<8x1xf32> to vector<8x8xf32>
    %50 = arith.mulf %45, %49 : vector<8x8xf32>
    %51 = arith.truncf %50 : vector<8x8xf32> to vector<8x8xbf16>
    %cst_19 = arith.constant dense<0.000000e+00> : vector<8x16xf32>
    %52 = tpu.matmul %51, %37, %cst_19 {dimension_numbers = #tpu.dot_dimension_numbers<[1], [0], [0], [1], [0, 0, 1, 1], [], []>} : vector<8x8xbf16>, vector<8x16xbf16>, vector<8x16xf32> -> vector<8x16xf32>
    %c0_20 = arith.constant 0 : index
    %c16 = arith.constant 16 : index
    %53 = vector.load %arg18[%c0_20, %c16] : memref<8x128xf32, #tpu.memory_space<vmem>>, vector<8x16xf32>
    tpu.vector_store %arg18[%c0_20, %c16], %52 {strides = array<i32>} : memref<8x128xf32, #tpu.memory_space<vmem>>, vector<8x16xf32>,
    %54 = vector.extract_strided_slice %11 {offsets = [0, 32], sizes = [8, 16], strides = [1, 1]} : vector<8x128xbf16> to vector<8x16xbf16>
    %55 = vector.extract_strided_slice %13 {offsets = [0, 32], sizes = [8, 16], strides = [1, 1]} : vector<8x128xbf16> to vector<8x16xbf16>
    %56 = vector.extract_strided_slice %15 {offsets = [0, 32], sizes = [8, 16], strides = [1, 1]} : vector<8x128xbf16> to vector<8x16xbf16>
    %cst_21 = arith.constant dense<0.000000e+00> : vector<8x8xf32>
    %57 = tpu.matmul %54, %55, %cst_21 {dimension_numbers = #tpu.dot_dimension_numbers<[1], [1], [0], [0], [0, 0, 1, 0], [], []>} : vector<8x16xbf16>, vector<8x16xbf16>, vector<8x8xf32> -> vector<8x8xf32>
    %cst_22 = arith.constant 2.500000e-01 : f32
    %58 = vector.broadcast %cst_22 : f32 to vector<8x8xf32>
    %59 = arith.mulf %57, %58 : vector<8x8xf32>
    %cst_23 = arith.constant dense<0xFF800000> : vector<8xf32>
    %60 = vector.multi_reduction <maximumf>, %59, %cst_23 [1] : vector<8x8xf32> to vector<8xf32>
    %61 = vector.shape_cast %60 : vector<8xf32> to vector<8x1xf32>
    %62 = vector.broadcast %61 : vector<8x1xf32> to vector<8x8xf32>
    %63 = arith.subf %59, %62 : vector<8x8xf32>
    %64 = math.exp %63 : vector<8x8xf32>
    %cst_24 = arith.constant dense<0.000000e+00> : vector<8xf32>
    %65 = vector.multi_reduction <add>, %64, %cst_24 [1] : vector<8x8xf32> to vector<8xf32>
    %66 = vector.shape_cast %65 : vector<8xf32> to vector<8x1xf32>
    %67 = tpu.reciprocal %66 {approx = true} : vector<8x1xf32> -> vector<8x1xf32>
    %68 = vector.broadcast %67 : vector<8x1xf32> to vector<8x8xf32>
    %69 = arith.mulf %64, %68 : vector<8x8xf32>
    %70 = arith.truncf %69 : vector<8x8xf32> to vector<8x8xbf16>
    %cst_25 = arith.constant dense<0.000000e+00> : vector<8x16xf32>
    %71 = tpu.matmul %70, %56, %cst_25 {dimension_numbers = #tpu.dot_dimension_numbers<[1], [0], [0], [1], [0, 0, 1, 1], [], []>} : vector<8x8xbf16>, vector<8x16xbf16>, vector<8x16xf32> -> vector<8x16xf32>
    %c0_26 = arith.constant 0 : index
    %c32 = arith.constant 32 : index
    %72 = vector.load %arg18[%c0_26, %c32] : memref<8x128xf32, #tpu.memory_space<vmem>>, vector<8x16xf32>
    tpu.vector_store %arg18[%c0_26, %c32], %71 {strides = array<i32>} : memref<8x128xf32, #tpu.memory_space<vmem>>, vector<8x16xf32>,
    %73 = vector.extract_strided_slice %11 {offsets = [0, 48], sizes = [8, 16], strides = [1, 1]} : vector<8x128xbf16> to vector<8x16xbf16>
    %74 = vector.extract_strided_slice %13 {offsets = [0, 48], sizes = [8, 16], strides = [1, 1]} : vector<8x128xbf16> to vector<8x16xbf16>
    %75 = vector.extract_strided_slice %15 {offsets = [0, 48], sizes = [8, 16], strides = [1, 1]} : vector<8x128xbf16> to vector<8x16xbf16>
    %cst_27 = arith.constant dense<0.000000e+00> : vector<8x8xf32>
    %76 = tpu.matmul %73, %74, %cst_27 {dimension_numbers = #tpu.dot_dimension_numbers<[1], [1], [0], [0], [0, 0, 1, 0], [], []>} : vector<8x16xbf16>, vector<8x16xbf16>, vector<8x8xf32> -> vector<8x8xf32>
    %cst_28 = arith.constant 2.500000e-01 : f32
    %77 = vector.broadcast %cst_28 : f32 to vector<8x8xf32>
    %78 = arith.mulf %76, %77 : vector<8x8xf32>
    %cst_29 = arith.constant dense<0xFF800000> : vector<8xf32>
    %79 = vector.multi_reduction <maximumf>, %78, %cst_29 [1] : vector<8x8xf32> to vector<8xf32>
    %80 = vector.shape_cast %79 : vector<8xf32> to vector<8x1xf32>
    %81 = vector.broadcast %80 : vector<8x1xf32> to vector<8x8xf32>
    %82 = arith.subf %78, %81 : vector<8x8xf32>
    %83 = math.exp %82 : vector<8x8xf32>
    %cst_30 = arith.constant dense<0.000000e+00> : vector<8xf32>
    %84 = vector.multi_reduction <add>, %83, %cst_30 [1] : vector<8x8xf32> to vector<8xf32>
    %85 = vector.shape_cast %84 : vector<8xf32> to vector<8x1xf32>
    %86 = tpu.reciprocal %85 {approx = true} : vector<8x1xf32> -> vector<8x1xf32>
    %87 = vector.broadcast %86 : vector<8x1xf32> to vector<8x8xf32>
    %88 = arith.mulf %83, %87 : vector<8x8xf32>
    %89 = arith.truncf %88 : vector<8x8xf32> to vector<8x8xbf16>
    %cst_31 = arith.constant dense<0.000000e+00> : vector<8x16xf32>
    %90 = tpu.matmul %89, %75, %cst_31 {dimension_numbers = #tpu.dot_dimension_numbers<[1], [0], [0], [1], [0, 0, 1, 1], [], []>} : vector<8x8xbf16>, vector<8x16xbf16>, vector<8x16xf32> -> vector<8x16xf32>
    %c0_32 = arith.constant 0 : index
    %c48 = arith.constant 48 : index
    %91 = vector.load %arg18[%c0_32, %c48] : memref<8x128xf32, #tpu.memory_space<vmem>>, vector<8x16xf32>
    tpu.vector_store %arg18[%c0_32, %c48], %90 {strides = array<i32>} : memref<8x128xf32, #tpu.memory_space<vmem>>, vector<8x16xf32>,
    %92 = vector.extract_strided_slice %11 {offsets = [0, 64], sizes = [8, 16], strides = [1, 1]} : vector<8x128xbf16> to vector<8x16xbf16>
    %93 = vector.extract_strided_slice %13 {offsets = [0, 64], sizes = [8, 16], strides = [1, 1]} : vector<8x128xbf16> to vector<8x16xbf16>
    %94 = vector.extract_strided_slice %15 {offsets = [0, 64], sizes = [8, 16], strides = [1, 1]} : vector<8x128xbf16> to vector<8x16xbf16>
    %cst_33 = arith.constant dense<0.000000e+00> : vector<8x8xf32>
    %95 = tpu.matmul %92, %93, %cst_33 {dimension_numbers = #tpu.dot_dimension_numbers<[1], [1], [0], [0], [0, 0, 1, 0], [], []>} : vector<8x16xbf16>, vector<8x16xbf16>, vector<8x8xf32> -> vector<8x8xf32>
    %cst_34 = arith.constant 2.500000e-01 : f32
    %96 = vector.broadcast %cst_34 : f32 to vector<8x8xf32>
    %97 = arith.mulf %95, %96 : vector<8x8xf32>
    %cst_35 = arith.constant dense<0xFF800000> : vector<8xf32>
    %98 = vector.multi_reduction <maximumf>, %97, %cst_35 [1] : vector<8x8xf32> to vector<8xf32>
    %99 = vector.shape_cast %98 : vector<8xf32> to vector<8x1xf32>
    %100 = vector.broadcast %99 : vector<8x1xf32> to vector<8x8xf32>
    %101 = arith.subf %97, %100 : vector<8x8xf32>
    %102 = math.exp %101 : vector<8x8xf32>
    %cst_36 = arith.constant dense<0.000000e+00> : vector<8xf32>
    %103 = vector.multi_reduction <add>, %102, %cst_36 [1] : vector<8x8xf32> to vector<8xf32>
    %104 = vector.shape_cast %103 : vector<8xf32> to vector<8x1xf32>
    %105 = tpu.reciprocal %104 {approx = true} : vector<8x1xf32> -> vector<8x1xf32>
    %106 = vector.broadcast %105 : vector<8x1xf32> to vector<8x8xf32>
    %107 = arith.mulf %102, %106 : vector<8x8xf32>
    %108 = arith.truncf %107 : vector<8x8xf32> to vector<8x8xbf16>
    %cst_37 = arith.constant dense<0.000000e+00> : vector<8x16xf32>
    %109 = tpu.matmul %108, %94, %cst_37 {dimension_numbers = #tpu.dot_dimension_numbers<[1], [0], [0], [1], [0, 0, 1, 1], [], []>} : vector<8x8xbf16>, vector<8x16xbf16>, vector<8x16xf32> -> vector<8x16xf32>
    %c0_38 = arith.constant 0 : index
    %c64 = arith.constant 64 : index
    %110 = vector.load %arg18[%c0_38, %c64] : memref<8x128xf32, #tpu.memory_space<vmem>>, vector<8x16xf32>
    tpu.vector_store %arg18[%c0_38, %c64], %109 {strides = array<i32>} : memref<8x128xf32, #tpu.memory_space<vmem>>, vector<8x16xf32>,
    %111 = vector.extract_strided_slice %11 {offsets = [0, 80], sizes = [8, 16], strides = [1, 1]} : vector<8x128xbf16> to vector<8x16xbf16>
    %112 = vector.extract_strided_slice %13 {offsets = [0, 80], sizes = [8, 16], strides = [1, 1]} : vector<8x128xbf16> to vector<8x16xbf16>
    %113 = vector.extract_strided_slice %15 {offsets = [0, 80], sizes = [8, 16], strides = [1, 1]} : vector<8x128xbf16> to vector<8x16xbf16>
    %cst_39 = arith.constant dense<0.000000e+00> : vector<8x8xf32>
    %114 = tpu.matmul %111, %112, %cst_39 {dimension_numbers = #tpu.dot_dimension_numbers<[1], [1], [0], [0], [0, 0, 1, 0], [], []>} : vector<8x16xbf16>, vector<8x16xbf16>, vector<8x8xf32> -> vector<8x8xf32>
    %cst_40 = arith.constant 2.500000e-01 : f32
    %115 = vector.broadcast %cst_40 : f32 to vector<8x8xf32>
    %116 = arith.mulf %114, %115 : vector<8x8xf32>
    %cst_41 = arith.constant dense<0xFF800000> : vector<8xf32>
    %117 = vector.multi_reduction <maximumf>, %116, %cst_41 [1] : vector<8x8xf32> to vector<8xf32>
    %118 = vector.shape_cast %117 : vector<8xf32> to vector<8x1xf32>
    %119 = vector.broadcast %118 : vector<8x1xf32> to vector<8x8xf32>
    %120 = arith.subf %116, %119 : vector<8x8xf32>
    %121 = math.exp %120 : vector<8x8xf32>
    %cst_42 = arith.constant dense<0.000000e+00> : vector<8xf32>
    %122 = vector.multi_reduction <add>, %121, %cst_42 [1] : vector<8x8xf32> to vector<8xf32>
    %123 = vector.shape_cast %122 : vector<8xf32> to vector<8x1xf32>
    %124 = tpu.reciprocal %123 {approx = true} : vector<8x1xf32> -> vector<8x1xf32>
    %125 = vector.broadcast %124 : vector<8x1xf32> to vector<8x8xf32>
    %126 = arith.mulf %121, %125 : vector<8x8xf32>
    %127 = arith.truncf %126 : vector<8x8xf32> to vector<8x8xbf16>
    %cst_43 = arith.constant dense<0.000000e+00> : vector<8x16xf32>
    %128 = tpu.matmul %127, %113, %cst_43 {dimension_numbers = #tpu.dot_dimension_numbers<[1], [0], [0], [1], [0, 0, 1, 1], [], []>} : vector<8x8xbf16>, vector<8x16xbf16>, vector<8x16xf32> -> vector<8x16xf32>
    %c0_44 = arith.constant 0 : index
    %c80 = arith.constant 80 : index
    %129 = vector.load %arg18[%c0_44, %c80] : memref<8x128xf32, #tpu.memory_space<vmem>>, vector<8x16xf32>
    tpu.vector_store %arg18[%c0_44, %c80], %128 {strides = array<i32>} : memref<8x128xf32, #tpu.memory_space<vmem>>, vector<8x16xf32>,
    %130 = vector.extract_strided_slice %11 {offsets = [0, 96], sizes = [8, 16], strides = [1, 1]} : vector<8x128xbf16> to vector<8x16xbf16>
    %131 = vector.extract_strided_slice %13 {offsets = [0, 96], sizes = [8, 16], strides = [1, 1]} : vector<8x128xbf16> to vector<8x16xbf16>
    %132 = vector.extract_strided_slice %15 {offsets = [0, 96], sizes = [8, 16], strides = [1, 1]} : vector<8x128xbf16> to vector<8x16xbf16>
    %cst_45 = arith.constant dense<0.000000e+00> : vector<8x8xf32>
    %133 = tpu.matmul %130, %131, %cst_45 {dimension_numbers = #tpu.dot_dimension_numbers<[1], [1], [0], [0], [0, 0, 1, 0], [], []>} : vector<8x16xbf16>, vector<8x16xbf16>, vector<8x8xf32> -> vector<8x8xf32>
    %cst_46 = arith.constant 2.500000e-01 : f32
    %134 = vector.broadcast %cst_46 : f32 to vector<8x8xf32>
    %135 = arith.mulf %133, %134 : vector<8x8xf32>
    %cst_47 = arith.constant dense<0xFF800000> : vector<8xf32>
    %136 = vector.multi_reduction <maximumf>, %135, %cst_47 [1] : vector<8x8xf32> to vector<8xf32>
    %137 = vector.shape_cast %136 : vector<8xf32> to vector<8x1xf32>
    %138 = vector.broadcast %137 : vector<8x1xf32> to vector<8x8xf32>
    %139 = arith.subf %135, %138 : vector<8x8xf32>
    %140 = math.exp %139 : vector<8x8xf32>
    %cst_48 = arith.constant dense<0.000000e+00> : vector<8xf32>
    %141 = vector.multi_reduction <add>, %140, %cst_48 [1] : vector<8x8xf32> to vector<8xf32>
    %142 = vector.shape_cast %141 : vector<8xf32> to vector<8x1xf32>
    %143 = tpu.reciprocal %142 {approx = true} : vector<8x1xf32> -> vector<8x1xf32>
    %144 = vector.broadcast %143 : vector<8x1xf32> to vector<8x8xf32>
    %145 = arith.mulf %140, %144 : vector<8x8xf32>
    %146 = arith.truncf %145 : vector<8x8xf32> to vector<8x8xbf16>
    %cst_49 = arith.constant dense<0.000000e+00> : vector<8x16xf32>
    %147 = tpu.matmul %146, %132, %cst_49 {dimension_numbers = #tpu.dot_dimension_numbers<[1], [0], [0], [1], [0, 0, 1, 1], [], []>} : vector<8x8xbf16>, vector<8x16xbf16>, vector<8x16xf32> -> vector<8x16xf32>
    %c0_50 = arith.constant 0 : index
    %c96 = arith.constant 96 : index
    %148 = vector.load %arg18[%c0_50, %c96] : memref<8x128xf32, #tpu.memory_space<vmem>>, vector<8x16xf32>
    tpu.vector_store %arg18[%c0_50, %c96], %147 {strides = array<i32>} : memref<8x128xf32, #tpu.memory_space<vmem>>, vector<8x16xf32>,
    %149 = vector.extract_strided_slice %11 {offsets = [0, 112], sizes = [8, 16], strides = [1, 1]} : vector<8x128xbf16> to vector<8x16xbf16>
    %150 = vector.extract_strided_slice %13 {offsets = [0, 112], sizes = [8, 16], strides = [1, 1]} : vector<8x128xbf16> to vector<8x16xbf16>
    %151 = vector.extract_strided_slice %15 {offsets = [0, 112], sizes = [8, 16], strides = [1, 1]} : vector<8x128xbf16> to vector<8x16xbf16>
    %cst_51 = arith.constant dense<0.000000e+00> : vector<8x8xf32>
    %152 = tpu.matmul %149, %150, %cst_51 {dimension_numbers = #tpu.dot_dimension_numbers<[1], [1], [0], [0], [0, 0, 1, 0], [], []>} : vector<8x16xbf16>, vector<8x16xbf16>, vector<8x8xf32> -> vector<8x8xf32>
    %cst_52 = arith.constant 2.500000e-01 : f32
    %153 = vector.broadcast %cst_52 : f32 to vector<8x8xf32>
    %154 = arith.mulf %152, %153 : vector<8x8xf32>
    %cst_53 = arith.constant dense<0xFF800000> : vector<8xf32>
    %155 = vector.multi_reduction <maximumf>, %154, %cst_53 [1] : vector<8x8xf32> to vector<8xf32>
    %156 = vector.shape_cast %155 : vector<8xf32> to vector<8x1xf32>
    %157 = vector.broadcast %156 : vector<8x1xf32> to vector<8x8xf32>
    %158 = arith.subf %154, %157 : vector<8x8xf32>
    %159 = math.exp %158 : vector<8x8xf32>
    %cst_54 = arith.constant dense<0.000000e+00> : vector<8xf32>
    %160 = vector.multi_reduction <add>, %159, %cst_54 [1] : vector<8x8xf32> to vector<8xf32>
    %161 = vector.shape_cast %160 : vector<8xf32> to vector<8x1xf32>
    %162 = tpu.reciprocal %161 {approx = true} : vector<8x1xf32> -> vector<8x1xf32>
    %163 = vector.broadcast %162 : vector<8x1xf32> to vector<8x8xf32>
    %164 = arith.mulf %159, %163 : vector<8x8xf32>
    %165 = arith.truncf %164 : vector<8x8xf32> to vector<8x8xbf16>
    %cst_55 = arith.constant dense<0.000000e+00> : vector<8x16xf32>
    %166 = tpu.matmul %165, %151, %cst_55 {dimension_numbers = #tpu.dot_dimension_numbers<[1], [0], [0], [1], [0, 0, 1, 1], [], []>} : vector<8x8xbf16>, vector<8x16xbf16>, vector<8x16xf32> -> vector<8x16xf32>
    %c0_56 = arith.constant 0 : index
    %c112 = arith.constant 112 : index
    %167 = vector.load %arg18[%c0_56, %c112] : memref<8x128xf32, #tpu.memory_space<vmem>>, vector<8x16xf32>
    tpu.vector_store %arg18[%c0_56, %c112], %166 {strides = array<i32>} : memref<8x128xf32, #tpu.memory_space<vmem>>, vector<8x16xf32>,
    %c0_57 = arith.constant 0 : index
    %c0_58 = arith.constant 0 : index
    %168 = vector.load %arg18[%c0_57, %c0_58] : memref<8x128xf32, #tpu.memory_space<vmem>>, vector<8x128xf32>
    %c0_59 = arith.constant 0 : index
    %c0_60 = arith.constant 0 : index
    %c0_61 = arith.constant 0 : index
    %169 = vector.load %arg4[%c0_59, %c0_60, %c0_61] : memref<2x128x128xbf16, #tpu.memory_space<vmem>>, vector<1x128x128xbf16>
    %170 = vector.shape_cast %169 : vector<1x128x128xbf16> to vector<128x128xbf16>
    %171 = arith.truncf %168 : vector<8x128xf32> to vector<8x128xbf16>
    %cst_62 = arith.constant dense<0.000000e+00> : vector<8x128xf32>
    %172 = tpu.matmul %171, %170, %cst_62 {dimension_numbers = #tpu.dot_dimension_numbers<[1], [0], [0], [1], [0, 0, 1, 1], [], []>} : vector<8x128xbf16>, vector<128x128xbf16>, vector<8x128xf32> -> vector<8x128xf32>
    %c0_63 = arith.constant 0 : index
    %c0_64 = arith.constant 0 : index
    %c0_65 = arith.constant 0 : index
    %173 = vector.load %arg5[%c0_63, %c0_64, %c0_65] : memref<2x1x128xf32, #tpu.memory_space<vmem>>, vector<1x1x128xf32>
    %174 = vector.shape_cast %173 : vector<1x1x128xf32> to vector<1x128xf32>
    %175 = vector.broadcast %174 : vector<1x128xf32> to vector<8x128xf32>
    %176 = arith.addf %172, %175 : vector<8x128xf32>
    %177 = arith.addf %1, %176 : vector<8x128xf32>
    %c0_66 = arith.constant 0 : index
    %c0_67 = arith.constant 0 : index
    %c0_68 = arith.constant 0 : index
    %178 = vector.load %arg6[%c0_66, %c0_67, %c0_68] : memref<2x1x128xf32, #tpu.memory_space<vmem>>, vector<1x1x128xf32>
    %179 = vector.shape_cast %178 : vector<1x1x128xf32> to vector<1x128xf32>
    %c0_69 = arith.constant 0 : index
    %c0_70 = arith.constant 0 : index
    %c0_71 = arith.constant 0 : index
    %180 = vector.load %arg7[%c0_69, %c0_70, %c0_71] : memref<2x1x128xf32, #tpu.memory_space<vmem>>, vector<1x1x128xf32>
    %181 = vector.shape_cast %180 : vector<1x1x128xf32> to vector<1x128xf32>
    %cst_72 = arith.constant dense<0.000000e+00> : vector<8xf32>
    %182 = vector.multi_reduction <add>, %177, %cst_72 [1] : vector<8x128xf32> to vector<8xf32>
    %183 = vector.shape_cast %182 : vector<8xf32> to vector<8x1xf32>
    %cst_73 = arith.constant 1.280000e+02 : f32
    %184 = vector.broadcast %cst_73 : f32 to vector<8x1xf32>
    %185 = arith.divf %183, %184 : vector<8x1xf32>
    %186 = vector.broadcast %185 : vector<8x1xf32> to vector<8x128xf32>
    %187 = arith.subf %177, %186 : vector<8x128xf32>
    %188 = arith.mulf %187, %187 : vector<8x128xf32>
    %cst_74 = arith.constant dense<0.000000e+00> : vector<8xf32>
    %189 = vector.multi_reduction <add>, %188, %cst_74 [1] : vector<8x128xf32> to vector<8xf32>
    %190 = vector.shape_cast %189 : vector<8xf32> to vector<8x1xf32>
    %cst_75 = arith.constant 1.280000e+02 : f32
    %191 = vector.broadcast %cst_75 : f32 to vector<8x1xf32>
    %192 = arith.divf %190, %191 : vector<8x1xf32>
    %193 = vector.broadcast %185 : vector<8x1xf32> to vector<8x128xf32>
    %194 = arith.subf %177, %193 : vector<8x128xf32>
    %cst_76 = arith.constant 9.99999974E-6 : f32
    %195 = vector.broadcast %cst_76 : f32 to vector<8x1xf32>
    %196 = arith.addf %192, %195 : vector<8x1xf32>
    %197 = math.rsqrt %196 : vector<8x1xf32>
    %198 = vector.broadcast %197 : vector<8x1xf32> to vector<8x128xf32>
    %199 = arith.mulf %194, %198 : vector<8x128xf32>
    %200 = vector.broadcast %179 : vector<1x128xf32> to vector<8x128xf32>
    %201 = arith.mulf %199, %200 : vector<8x128xf32>
    %202 = vector.broadcast %181 : vector<1x128xf32> to vector<8x128xf32>
    %203 = arith.addf %201, %202 : vector<8x128xf32>
    %c0_77 = arith.constant 0 : index
    %c0_78 = arith.constant 0 : index
    %c0_79 = arith.constant 0 : index
    %204 = vector.load %arg8[%c0_77, %c0_78, %c0_79] : memref<2x128x512xbf16, #tpu.memory_space<vmem>>, vector<1x128x512xbf16>
    %205 = vector.shape_cast %204 : vector<1x128x512xbf16> to vector<128x512xbf16>
    %206 = arith.truncf %203 : vector<8x128xf32> to vector<8x128xbf16>
    %cst_80 = arith.constant dense<0.000000e+00> : vector<8x512xf32>
    %207 = tpu.matmul %206, %205, %cst_80 {dimension_numbers = #tpu.dot_dimension_numbers<[1], [0], [0], [1], [0, 0, 1, 1], [], []>} : vector<8x128xbf16>, vector<128x512xbf16>, vector<8x512xf32> -> vector<8x512xf32>
    %c0_81 = arith.constant 0 : index
    %c0_82 = arith.constant 0 : index
    %c0_83 = arith.constant 0 : index
    %208 = vector.load %arg9[%c0_81, %c0_82, %c0_83] : memref<2x1x512xf32, #tpu.memory_space<vmem>>, vector<1x1x512xf32>
    %209 = vector.shape_cast %208 : vector<1x1x512xf32> to vector<1x512xf32>
    %210 = vector.broadcast %209 : vector<1x512xf32> to vector<8x512xf32>
    %211 = arith.addf %207, %210 : vector<8x512xf32>
    %cst_84 = arith.constant 5.000000e-01 : f32
    %212 = vector.broadcast %cst_84 : f32 to vector<8x512xf32>
    %213 = arith.mulf %212, %211 : vector<8x512xf32>
    %cst_85 = arith.constant 4.471500e-02 : f32
    %214 = vector.broadcast %cst_85 : f32 to vector<8x512xf32>
    %215 = arith.mulf %214, %211 : vector<8x512xf32>
    %216 = arith.mulf %215, %211 : vector<8x512xf32>
    %217 = arith.mulf %216, %211 : vector<8x512xf32>
    %218 = arith.addf %211, %217 : vector<8x512xf32>
    %cst_86 = arith.constant 0.797884583 : f32
    %219 = vector.broadcast %cst_86 : f32 to vector<8x512xf32>
    %220 = arith.mulf %219, %218 : vector<8x512xf32>
    %221 = math.tanh %220 : vector<8x512xf32>
    %cst_87 = arith.constant 1.000000e+00 : f32
    %222 = vector.broadcast %cst_87 : f32 to vector<8x512xf32>
    %223 = arith.addf %222, %221 : vector<8x512xf32>
    %224 = arith.mulf %213, %223 : vector<8x512xf32>
    %c0_88 = arith.constant 0 : index
    %c0_89 = arith.constant 0 : index
    %c0_90 = arith.constant 0 : index
    %225 = vector.load %arg10[%c0_88, %c0_89, %c0_90] : memref<2x512x128xbf16, #tpu.memory_space<vmem>>, vector<1x512x128xbf16>
    %226 = vector.shape_cast %225 : vector<1x512x128xbf16> to vector<512x128xbf16>
    %227 = arith.truncf %224 : vector<8x512xf32> to vector<8x512xbf16>
    %cst_91 = arith.constant dense<0.000000e+00> : vector<8x128xf32>
    %228 = tpu.matmul %227, %226, %cst_91 {dimension_numbers = #tpu.dot_dimension_numbers<[1], [0], [0], [1], [0, 0, 1, 1], [], []>} : vector<8x512xbf16>, vector<512x128xbf16>, vector<8x128xf32> -> vector<8x128xf32>
    %c0_92 = arith.constant 0 : index
    %c0_93 = arith.constant 0 : index
    %c0_94 = arith.constant 0 : index
    %229 = vector.load %arg11[%c0_92, %c0_93, %c0_94] : memref<2x1x128xf32, #tpu.memory_space<vmem>>, vector<1x1x128xf32>
    %230 = vector.shape_cast %229 : vector<1x1x128xf32> to vector<1x128xf32>
    %231 = vector.broadcast %230 : vector<1x128xf32> to vector<8x128xf32>
    %232 = arith.addf %228, %231 : vector<8x128xf32>
    %233 = arith.addf %203, %232 : vector<8x128xf32>
    %c0_95 = arith.constant 0 : index
    %c0_96 = arith.constant 0 : index
    %c0_97 = arith.constant 0 : index
    %234 = vector.load %arg12[%c0_95, %c0_96, %c0_97] : memref<2x1x128xf32, #tpu.memory_space<vmem>>, vector<1x1x128xf32>
    %235 = vector.shape_cast %234 : vector<1x1x128xf32> to vector<1x128xf32>
    %c0_98 = arith.constant 0 : index
    %c0_99 = arith.constant 0 : index
    %c0_100 = arith.constant 0 : index
    %236 = vector.load %arg13[%c0_98, %c0_99, %c0_100] : memref<2x1x128xf32, #tpu.memory_space<vmem>>, vector<1x1x128xf32>
    %237 = vector.shape_cast %236 : vector<1x1x128xf32> to vector<1x128xf32>
    %cst_101 = arith.constant dense<0.000000e+00> : vector<8xf32>
    %238 = vector.multi_reduction <add>, %233, %cst_101 [1] : vector<8x128xf32> to vector<8xf32>
    %239 = vector.shape_cast %238 : vector<8xf32> to vector<8x1xf32>
    %cst_102 = arith.constant 1.280000e+02 : f32
    %240 = vector.broadcast %cst_102 : f32 to vector<8x1xf32>
    %241 = arith.divf %239, %240 : vector<8x1xf32>
    %242 = vector.broadcast %241 : vector<8x1xf32> to vector<8x128xf32>
    %243 = arith.subf %233, %242 : vector<8x128xf32>
    %244 = arith.mulf %243, %243 : vector<8x128xf32>
    %cst_103 = arith.constant dense<0.000000e+00> : vector<8xf32>
    %245 = vector.multi_reduction <add>, %244, %cst_103 [1] : vector<8x128xf32> to vector<8xf32>
    %246 = vector.shape_cast %245 : vector<8xf32> to vector<8x1xf32>
    %cst_104 = arith.constant 1.280000e+02 : f32
    %247 = vector.broadcast %cst_104 : f32 to vector<8x1xf32>
    %248 = arith.divf %246, %247 : vector<8x1xf32>
    %249 = vector.broadcast %241 : vector<8x1xf32> to vector<8x128xf32>
    %250 = arith.subf %233, %249 : vector<8x128xf32>
    %cst_105 = arith.constant 9.99999974E-6 : f32
    %251 = vector.broadcast %cst_105 : f32 to vector<8x1xf32>
    %252 = arith.addf %248, %251 : vector<8x1xf32>
    %253 = math.rsqrt %252 : vector<8x1xf32>
    %254 = vector.broadcast %253 : vector<8x1xf32> to vector<8x128xf32>
    %255 = arith.mulf %250, %254 : vector<8x128xf32>
    %256 = vector.broadcast %235 : vector<1x128xf32> to vector<8x128xf32>
    %257 = arith.mulf %255, %256 : vector<8x128xf32>
    %258 = vector.broadcast %237 : vector<1x128xf32> to vector<8x128xf32>
    %259 = arith.addf %257, %258 : vector<8x128xf32>
    %c1 = arith.constant 1 : index
    %c0_106 = arith.constant 0 : index
    %c0_107 = arith.constant 0 : index
    %260 = vector.load %arg2[%c1, %c0_106, %c0_107] : memref<2x128x384xbf16, #tpu.memory_space<vmem>>, vector<1x128x384xbf16>
    %261 = vector.shape_cast %260 : vector<1x128x384xbf16> to vector<128x384xbf16>
    %262 = arith.truncf %259 : vector<8x128xf32> to vector<8x128xbf16>
    %cst_108 = arith.constant dense<0.000000e+00> : vector<8x384xf32>
    %263 = tpu.matmul %262, %261, %cst_108 {dimension_numbers = #tpu.dot_dimension_numbers<[1], [0], [0], [1], [0, 0, 1, 1], [], []>} : vector<8x128xbf16>, vector<128x384xbf16>, vector<8x384xf32> -> vector<8x384xf32>
    %c1_109 = arith.constant 1 : index
    %c0_110 = arith.constant 0 : index
    %c0_111 = arith.constant 0 : index
    %264 = vector.load %arg3[%c1_109, %c0_110, %c0_111] : memref<2x1x384xf32, #tpu.memory_space<vmem>>, vector<1x1x384xf32>
    %265 = vector.shape_cast %264 : vector<1x1x384xf32> to vector<1x384xf32>
    %266 = vector.broadcast %265 : vector<1x384xf32> to vector<8x384xf32>
    %267 = arith.addf %263, %266 : vector<8x384xf32>
    %268 = vector.extract_strided_slice %267 {offsets = [0, 0], sizes = [8, 128], strides = [1, 1]} : vector<8x384xf32> to vector<8x128xf32>
    %269 = arith.truncf %268 : vector<8x128xf32> to vector<8x128xbf16>
    %270 = vector.extract_strided_slice %267 {offsets = [0, 128], sizes = [8, 128], strides = [1, 1]} : vector<8x384xf32> to vector<8x128xf32>
    %271 = arith.truncf %270 : vector<8x128xf32> to vector<8x128xbf16>
    %272 = vector.extract_strided_slice %267 {offsets = [0, 256], sizes = [8, 128], strides = [1, 1]} : vector<8x384xf32> to vector<8x128xf32>
    %273 = arith.truncf %272 : vector<8x128xf32> to vector<8x128xbf16>
    %274 = vector.extract_strided_slice %269 {offsets = [0, 0], sizes = [8, 16], strides = [1, 1]} : vector<8x128xbf16> to vector<8x16xbf16>
    %275 = vector.extract_strided_slice %271 {offsets = [0, 0], sizes = [8, 16], strides = [1, 1]} : vector<8x128xbf16> to vector<8x16xbf16>
    %276 = vector.extract_strided_slice %273 {offsets = [0, 0], sizes = [8, 16], strides = [1, 1]} : vector<8x128xbf16> to vector<8x16xbf16>
    %cst_112 = arith.constant dense<0.000000e+00> : vector<8x8xf32>
    %277 = tpu.matmul %274, %275, %cst_112 {dimension_numbers = #tpu.dot_dimension_numbers<[1], [1], [0], [0], [0, 0, 1, 0], [], []>} : vector<8x16xbf16>, vector<8x16xbf16>, vector<8x8xf32> -> vector<8x8xf32>
    %cst_113 = arith.constant 2.500000e-01 : f32
    %278 = vector.broadcast %cst_113 : f32 to vector<8x8xf32>
    %279 = arith.mulf %277, %278 : vector<8x8xf32>
    %cst_114 = arith.constant dense<0xFF800000> : vector<8xf32>
    %280 = vector.multi_reduction <maximumf>, %279, %cst_114 [1] : vector<8x8xf32> to vector<8xf32>
    %281 = vector.shape_cast %280 : vector<8xf32> to vector<8x1xf32>
    %282 = vector.broadcast %281 : vector<8x1xf32> to vector<8x8xf32>
    %283 = arith.subf %279, %282 : vector<8x8xf32>
    %284 = math.exp %283 : vector<8x8xf32>
    %cst_115 = arith.constant dense<0.000000e+00> : vector<8xf32>
    %285 = vector.multi_reduction <add>, %284, %cst_115 [1] : vector<8x8xf32> to vector<8xf32>
    %286 = vector.shape_cast %285 : vector<8xf32> to vector<8x1xf32>
    %287 = tpu.reciprocal %286 {approx = true} : vector<8x1xf32> -> vector<8x1xf32>
    %288 = vector.broadcast %287 : vector<8x1xf32> to vector<8x8xf32>
    %289 = arith.mulf %284, %288 : vector<8x8xf32>
    %290 = arith.truncf %289 : vector<8x8xf32> to vector<8x8xbf16>
    %cst_116 = arith.constant dense<0.000000e+00> : vector<8x16xf32>
    %291 = tpu.matmul %290, %276, %cst_116 {dimension_numbers = #tpu.dot_dimension_numbers<[1], [0], [0], [1], [0, 0, 1, 1], [], []>} : vector<8x8xbf16>, vector<8x16xbf16>, vector<8x16xf32> -> vector<8x16xf32>
    %c0_117 = arith.constant 0 : index
    %c0_118 = arith.constant 0 : index
    %292 = vector.load %arg18[%c0_117, %c0_118] : memref<8x128xf32, #tpu.memory_space<vmem>>, vector<8x16xf32>
    tpu.vector_store %arg18[%c0_117, %c0_118], %291 {strides = array<i32>} : memref<8x128xf32, #tpu.memory_space<vmem>>, vector<8x16xf32>,
    %293 = vector.extract_strided_slice %269 {offsets = [0, 16], sizes = [8, 16], strides = [1, 1]} : vector<8x128xbf16> to vector<8x16xbf16>
    %294 = vector.extract_strided_slice %271 {offsets = [0, 16], sizes = [8, 16], strides = [1, 1]} : vector<8x128xbf16> to vector<8x16xbf16>
    %295 = vector.extract_strided_slice %273 {offsets = [0, 16], sizes = [8, 16], strides = [1, 1]} : vector<8x128xbf16> to vector<8x16xbf16>
    %cst_119 = arith.constant dense<0.000000e+00> : vector<8x8xf32>
    %296 = tpu.matmul %293, %294, %cst_119 {dimension_numbers = #tpu.dot_dimension_numbers<[1], [1], [0], [0], [0, 0, 1, 0], [], []>} : vector<8x16xbf16>, vector<8x16xbf16>, vector<8x8xf32> -> vector<8x8xf32>
    %cst_120 = arith.constant 2.500000e-01 : f32
    %297 = vector.broadcast %cst_120 : f32 to vector<8x8xf32>
    %298 = arith.mulf %296, %297 : vector<8x8xf32>
    %cst_121 = arith.constant dense<0xFF800000> : vector<8xf32>
    %299 = vector.multi_reduction <maximumf>, %298, %cst_121 [1] : vector<8x8xf32> to vector<8xf32>
    %300 = vector.shape_cast %299 : vector<8xf32> to vector<8x1xf32>
    %301 = vector.broadcast %300 : vector<8x1xf32> to vector<8x8xf32>
    %302 = arith.subf %298, %301 : vector<8x8xf32>
    %303 = math.exp %302 : vector<8x8xf32>
    %cst_122 = arith.constant dense<0.000000e+00> : vector<8xf32>
    %304 = vector.multi_reduction <add>, %303, %cst_122 [1] : vector<8x8xf32> to vector<8xf32>
    %305 = vector.shape_cast %304 : vector<8xf32> to vector<8x1xf32>
    %306 = tpu.reciprocal %305 {approx = true} : vector<8x1xf32> -> vector<8x1xf32>
    %307 = vector.broadcast %306 : vector<8x1xf32> to vector<8x8xf32>
    %308 = arith.mulf %303, %307 : vector<8x8xf32>
    %309 = arith.truncf %308 : vector<8x8xf32> to vector<8x8xbf16>
    %cst_123 = arith.constant dense<0.000000e+00> : vector<8x16xf32>
    %310 = tpu.matmul %309, %295, %cst_123 {dimension_numbers = #tpu.dot_dimension_numbers<[1], [0], [0], [1], [0, 0, 1, 1], [], []>} : vector<8x8xbf16>, vector<8x16xbf16>, vector<8x16xf32> -> vector<8x16xf32>
    %c0_124 = arith.constant 0 : index
    %c16_125 = arith.constant 16 : index
    %311 = vector.load %arg18[%c0_124, %c16_125] : memref<8x128xf32, #tpu.memory_space<vmem>>, vector<8x16xf32>
    tpu.vector_store %arg18[%c0_124, %c16_125], %310 {strides = array<i32>} : memref<8x128xf32, #tpu.memory_space<vmem>>, vector<8x16xf32>,
    %312 = vector.extract_strided_slice %269 {offsets = [0, 32], sizes = [8, 16], strides = [1, 1]} : vector<8x128xbf16> to vector<8x16xbf16>
    %313 = vector.extract_strided_slice %271 {offsets = [0, 32], sizes = [8, 16], strides = [1, 1]} : vector<8x128xbf16> to vector<8x16xbf16>
    %314 = vector.extract_strided_slice %273 {offsets = [0, 32], sizes = [8, 16], strides = [1, 1]} : vector<8x128xbf16> to vector<8x16xbf16>
    %cst_126 = arith.constant dense<0.000000e+00> : vector<8x8xf32>
    %315 = tpu.matmul %312, %313, %cst_126 {dimension_numbers = #tpu.dot_dimension_numbers<[1], [1], [0], [0], [0, 0, 1, 0], [], []>} : vector<8x16xbf16>, vector<8x16xbf16>, vector<8x8xf32> -> vector<8x8xf32>
    %cst_127 = arith.constant 2.500000e-01 : f32
    %316 = vector.broadcast %cst_127 : f32 to vector<8x8xf32>
    %317 = arith.mulf %315, %316 : vector<8x8xf32>
    %cst_128 = arith.constant dense<0xFF800000> : vector<8xf32>
    %318 = vector.multi_reduction <maximumf>, %317, %cst_128 [1] : vector<8x8xf32> to vector<8xf32>
    %319 = vector.shape_cast %318 : vector<8xf32> to vector<8x1xf32>
    %320 = vector.broadcast %319 : vector<8x1xf32> to vector<8x8xf32>
    %321 = arith.subf %317, %320 : vector<8x8xf32>
    %322 = math.exp %321 : vector<8x8xf32>
    %cst_129 = arith.constant dense<0.000000e+00> : vector<8xf32>
    %323 = vector.multi_reduction <add>, %322, %cst_129 [1] : vector<8x8xf32> to vector<8xf32>
    %324 = vector.shape_cast %323 : vector<8xf32> to vector<8x1xf32>
    %325 = tpu.reciprocal %324 {approx = true} : vector<8x1xf32> -> vector<8x1xf32>
    %326 = vector.broadcast %325 : vector<8x1xf32> to vector<8x8xf32>
    %327 = arith.mulf %322, %326 : vector<8x8xf32>
    %328 = arith.truncf %327 : vector<8x8xf32> to vector<8x8xbf16>
    %cst_130 = arith.constant dense<0.000000e+00> : vector<8x16xf32>
    %329 = tpu.matmul %328, %314, %cst_130 {dimension_numbers = #tpu.dot_dimension_numbers<[1], [0], [0], [1], [0, 0, 1, 1], [], []>} : vector<8x8xbf16>, vector<8x16xbf16>, vector<8x16xf32> -> vector<8x16xf32>
    %c0_131 = arith.constant 0 : index
    %c32_132 = arith.constant 32 : index
    %330 = vector.load %arg18[%c0_131, %c32_132] : memref<8x128xf32, #tpu.memory_space<vmem>>, vector<8x16xf32>
    tpu.vector_store %arg18[%c0_131, %c32_132], %329 {strides = array<i32>} : memref<8x128xf32, #tpu.memory_space<vmem>>, vector<8x16xf32>,
    %331 = vector.extract_strided_slice %269 {offsets = [0, 48], sizes = [8, 16], strides = [1, 1]} : vector<8x128xbf16> to vector<8x16xbf16>
    %332 = vector.extract_strided_slice %271 {offsets = [0, 48], sizes = [8, 16], strides = [1, 1]} : vector<8x128xbf16> to vector<8x16xbf16>
    %333 = vector.extract_strided_slice %273 {offsets = [0, 48], sizes = [8, 16], strides = [1, 1]} : vector<8x128xbf16> to vector<8x16xbf16>
    %cst_133 = arith.constant dense<0.000000e+00> : vector<8x8xf32>
    %334 = tpu.matmul %331, %332, %cst_133 {dimension_numbers = #tpu.dot_dimension_numbers<[1], [1], [0], [0], [0, 0, 1, 0], [], []>} : vector<8x16xbf16>, vector<8x16xbf16>, vector<8x8xf32> -> vector<8x8xf32>
    %cst_134 = arith.constant 2.500000e-01 : f32
    %335 = vector.broadcast %cst_134 : f32 to vector<8x8xf32>
    %336 = arith.mulf %334, %335 : vector<8x8xf32>
    %cst_135 = arith.constant dense<0xFF800000> : vector<8xf32>
    %337 = vector.multi_reduction <maximumf>, %336, %cst_135 [1] : vector<8x8xf32> to vector<8xf32>
    %338 = vector.shape_cast %337 : vector<8xf32> to vector<8x1xf32>
    %339 = vector.broadcast %338 : vector<8x1xf32> to vector<8x8xf32>
    %340 = arith.subf %336, %339 : vector<8x8xf32>
    %341 = math.exp %340 : vector<8x8xf32>
    %cst_136 = arith.constant dense<0.000000e+00> : vector<8xf32>
    %342 = vector.multi_reduction <add>, %341, %cst_136 [1] : vector<8x8xf32> to vector<8xf32>
    %343 = vector.shape_cast %342 : vector<8xf32> to vector<8x1xf32>
    %344 = tpu.reciprocal %343 {approx = true} : vector<8x1xf32> -> vector<8x1xf32>
    %345 = vector.broadcast %344 : vector<8x1xf32> to vector<8x8xf32>
    %346 = arith.mulf %341, %345 : vector<8x8xf32>
    %347 = arith.truncf %346 : vector<8x8xf32> to vector<8x8xbf16>
    %cst_137 = arith.constant dense<0.000000e+00> : vector<8x16xf32>
    %348 = tpu.matmul %347, %333, %cst_137 {dimension_numbers = #tpu.dot_dimension_numbers<[1], [0], [0], [1], [0, 0, 1, 1], [], []>} : vector<8x8xbf16>, vector<8x16xbf16>, vector<8x16xf32> -> vector<8x16xf32>
    %c0_138 = arith.constant 0 : index
    %c48_139 = arith.constant 48 : index
    %349 = vector.load %arg18[%c0_138, %c48_139] : memref<8x128xf32, #tpu.memory_space<vmem>>, vector<8x16xf32>
    tpu.vector_store %arg18[%c0_138, %c48_139], %348 {strides = array<i32>} : memref<8x128xf32, #tpu.memory_space<vmem>>, vector<8x16xf32>,
    %350 = vector.extract_strided_slice %269 {offsets = [0, 64], sizes = [8, 16], strides = [1, 1]} : vector<8x128xbf16> to vector<8x16xbf16>
    %351 = vector.extract_strided_slice %271 {offsets = [0, 64], sizes = [8, 16], strides = [1, 1]} : vector<8x128xbf16> to vector<8x16xbf16>
    %352 = vector.extract_strided_slice %273 {offsets = [0, 64], sizes = [8, 16], strides = [1, 1]} : vector<8x128xbf16> to vector<8x16xbf16>
    %cst_140 = arith.constant dense<0.000000e+00> : vector<8x8xf32>
    %353 = tpu.matmul %350, %351, %cst_140 {dimension_numbers = #tpu.dot_dimension_numbers<[1], [1], [0], [0], [0, 0, 1, 0], [], []>} : vector<8x16xbf16>, vector<8x16xbf16>, vector<8x8xf32> -> vector<8x8xf32>
    %cst_141 = arith.constant 2.500000e-01 : f32
    %354 = vector.broadcast %cst_141 : f32 to vector<8x8xf32>
    %355 = arith.mulf %353, %354 : vector<8x8xf32>
    %cst_142 = arith.constant dense<0xFF800000> : vector<8xf32>
    %356 = vector.multi_reduction <maximumf>, %355, %cst_142 [1] : vector<8x8xf32> to vector<8xf32>
    %357 = vector.shape_cast %356 : vector<8xf32> to vector<8x1xf32>
    %358 = vector.broadcast %357 : vector<8x1xf32> to vector<8x8xf32>
    %359 = arith.subf %355, %358 : vector<8x8xf32>
    %360 = math.exp %359 : vector<8x8xf32>
    %cst_143 = arith.constant dense<0.000000e+00> : vector<8xf32>
    %361 = vector.multi_reduction <add>, %360, %cst_143 [1] : vector<8x8xf32> to vector<8xf32>
    %362 = vector.shape_cast %361 : vector<8xf32> to vector<8x1xf32>
    %363 = tpu.reciprocal %362 {approx = true} : vector<8x1xf32> -> vector<8x1xf32>
    %364 = vector.broadcast %363 : vector<8x1xf32> to vector<8x8xf32>
    %365 = arith.mulf %360, %364 : vector<8x8xf32>
    %366 = arith.truncf %365 : vector<8x8xf32> to vector<8x8xbf16>
    %cst_144 = arith.constant dense<0.000000e+00> : vector<8x16xf32>
    %367 = tpu.matmul %366, %352, %cst_144 {dimension_numbers = #tpu.dot_dimension_numbers<[1], [0], [0], [1], [0, 0, 1, 1], [], []>} : vector<8x8xbf16>, vector<8x16xbf16>, vector<8x16xf32> -> vector<8x16xf32>
    %c0_145 = arith.constant 0 : index
    %c64_146 = arith.constant 64 : index
    %368 = vector.load %arg18[%c0_145, %c64_146] : memref<8x128xf32, #tpu.memory_space<vmem>>, vector<8x16xf32>
    tpu.vector_store %arg18[%c0_145, %c64_146], %367 {strides = array<i32>} : memref<8x128xf32, #tpu.memory_space<vmem>>, vector<8x16xf32>,
    %369 = vector.extract_strided_slice %269 {offsets = [0, 80], sizes = [8, 16], strides = [1, 1]} : vector<8x128xbf16> to vector<8x16xbf16>
    %370 = vector.extract_strided_slice %271 {offsets = [0, 80], sizes = [8, 16], strides = [1, 1]} : vector<8x128xbf16> to vector<8x16xbf16>
    %371 = vector.extract_strided_slice %273 {offsets = [0, 80], sizes = [8, 16], strides = [1, 1]} : vector<8x128xbf16> to vector<8x16xbf16>
    %cst_147 = arith.constant dense<0.000000e+00> : vector<8x8xf32>
    %372 = tpu.matmul %369, %370, %cst_147 {dimension_numbers = #tpu.dot_dimension_numbers<[1], [1], [0], [0], [0, 0, 1, 0], [], []>} : vector<8x16xbf16>, vector<8x16xbf16>, vector<8x8xf32> -> vector<8x8xf32>
    %cst_148 = arith.constant 2.500000e-01 : f32
    %373 = vector.broadcast %cst_148 : f32 to vector<8x8xf32>
    %374 = arith.mulf %372, %373 : vector<8x8xf32>
    %cst_149 = arith.constant dense<0xFF800000> : vector<8xf32>
    %375 = vector.multi_reduction <maximumf>, %374, %cst_149 [1] : vector<8x8xf32> to vector<8xf32>
    %376 = vector.shape_cast %375 : vector<8xf32> to vector<8x1xf32>
    %377 = vector.broadcast %376 : vector<8x1xf32> to vector<8x8xf32>
    %378 = arith.subf %374, %377 : vector<8x8xf32>
    %379 = math.exp %378 : vector<8x8xf32>
    %cst_150 = arith.constant dense<0.000000e+00> : vector<8xf32>
    %380 = vector.multi_reduction <add>, %379, %cst_150 [1] : vector<8x8xf32> to vector<8xf32>
    %381 = vector.shape_cast %380 : vector<8xf32> to vector<8x1xf32>
    %382 = tpu.reciprocal %381 {approx = true} : vector<8x1xf32> -> vector<8x1xf32>
    %383 = vector.broadcast %382 : vector<8x1xf32> to vector<8x8xf32>
    %384 = arith.mulf %379, %383 : vector<8x8xf32>
    %385 = arith.truncf %384 : vector<8x8xf32> to vector<8x8xbf16>
    %cst_151 = arith.constant dense<0.000000e+00> : vector<8x16xf32>
    %386 = tpu.matmul %385, %371, %cst_151 {dimension_numbers = #tpu.dot_dimension_numbers<[1], [0], [0], [1], [0, 0, 1, 1], [], []>} : vector<8x8xbf16>, vector<8x16xbf16>, vector<8x16xf32> -> vector<8x16xf32>
    %c0_152 = arith.constant 0 : index
    %c80_153 = arith.constant 80 : index
    %387 = vector.load %arg18[%c0_152, %c80_153] : memref<8x128xf32, #tpu.memory_space<vmem>>, vector<8x16xf32>
    tpu.vector_store %arg18[%c0_152, %c80_153], %386 {strides = array<i32>} : memref<8x128xf32, #tpu.memory_space<vmem>>, vector<8x16xf32>,
    %388 = vector.extract_strided_slice %269 {offsets = [0, 96], sizes = [8, 16], strides = [1, 1]} : vector<8x128xbf16> to vector<8x16xbf16>
    %389 = vector.extract_strided_slice %271 {offsets = [0, 96], sizes = [8, 16], strides = [1, 1]} : vector<8x128xbf16> to vector<8x16xbf16>
    %390 = vector.extract_strided_slice %273 {offsets = [0, 96], sizes = [8, 16], strides = [1, 1]} : vector<8x128xbf16> to vector<8x16xbf16>
    %cst_154 = arith.constant dense<0.000000e+00> : vector<8x8xf32>
    %391 = tpu.matmul %388, %389, %cst_154 {dimension_numbers = #tpu.dot_dimension_numbers<[1], [1], [0], [0], [0, 0, 1, 0], [], []>} : vector<8x16xbf16>, vector<8x16xbf16>, vector<8x8xf32> -> vector<8x8xf32>
    %cst_155 = arith.constant 2.500000e-01 : f32
    %392 = vector.broadcast %cst_155 : f32 to vector<8x8xf32>
    %393 = arith.mulf %391, %392 : vector<8x8xf32>
    %cst_156 = arith.constant dense<0xFF800000> : vector<8xf32>
    %394 = vector.multi_reduction <maximumf>, %393, %cst_156 [1] : vector<8x8xf32> to vector<8xf32>
    %395 = vector.shape_cast %394 : vector<8xf32> to vector<8x1xf32>
    %396 = vector.broadcast %395 : vector<8x1xf32> to vector<8x8xf32>
    %397 = arith.subf %393, %396 : vector<8x8xf32>
    %398 = math.exp %397 : vector<8x8xf32>
    %cst_157 = arith.constant dense<0.000000e+00> : vector<8xf32>
    %399 = vector.multi_reduction <add>, %398, %cst_157 [1] : vector<8x8xf32> to vector<8xf32>
    %400 = vector.shape_cast %399 : vector<8xf32> to vector<8x1xf32>
    %401 = tpu.reciprocal %400 {approx = true} : vector<8x1xf32> -> vector<8x1xf32>
    %402 = vector.broadcast %401 : vector<8x1xf32> to vector<8x8xf32>
    %403 = arith.mulf %398, %402 : vector<8x8xf32>
    %404 = arith.truncf %403 : vector<8x8xf32> to vector<8x8xbf16>
    %cst_158 = arith.constant dense<0.000000e+00> : vector<8x16xf32>
    %405 = tpu.matmul %404, %390, %cst_158 {dimension_numbers = #tpu.dot_dimension_numbers<[1], [0], [0], [1], [0, 0, 1, 1], [], []>} : vector<8x8xbf16>, vector<8x16xbf16>, vector<8x16xf32> -> vector<8x16xf32>
    %c0_159 = arith.constant 0 : index
    %c96_160 = arith.constant 96 : index
    %406 = vector.load %arg18[%c0_159, %c96_160] : memref<8x128xf32, #tpu.memory_space<vmem>>, vector<8x16xf32>
    tpu.vector_store %arg18[%c0_159, %c96_160], %405 {strides = array<i32>} : memref<8x128xf32, #tpu.memory_space<vmem>>, vector<8x16xf32>,
    %407 = vector.extract_strided_slice %269 {offsets = [0, 112], sizes = [8, 16], strides = [1, 1]} : vector<8x128xbf16> to vector<8x16xbf16>
    %408 = vector.extract_strided_slice %271 {offsets = [0, 112], sizes = [8, 16], strides = [1, 1]} : vector<8x128xbf16> to vector<8x16xbf16>
    %409 = vector.extract_strided_slice %273 {offsets = [0, 112], sizes = [8, 16], strides = [1, 1]} : vector<8x128xbf16> to vector<8x16xbf16>
    %cst_161 = arith.constant dense<0.000000e+00> : vector<8x8xf32>
    %410 = tpu.matmul %407, %408, %cst_161 {dimension_numbers = #tpu.dot_dimension_numbers<[1], [1], [0], [0], [0, 0, 1, 0], [], []>} : vector<8x16xbf16>, vector<8x16xbf16>, vector<8x8xf32> -> vector<8x8xf32>
    %cst_162 = arith.constant 2.500000e-01 : f32
    %411 = vector.broadcast %cst_162 : f32 to vector<8x8xf32>
    %412 = arith.mulf %410, %411 : vector<8x8xf32>
    %cst_163 = arith.constant dense<0xFF800000> : vector<8xf32>
    %413 = vector.multi_reduction <maximumf>, %412, %cst_163 [1] : vector<8x8xf32> to vector<8xf32>
    %414 = vector.shape_cast %413 : vector<8xf32> to vector<8x1xf32>
    %415 = vector.broadcast %414 : vector<8x1xf32> to vector<8x8xf32>
    %416 = arith.subf %412, %415 : vector<8x8xf32>
    %417 = math.exp %416 : vector<8x8xf32>
    %cst_164 = arith.constant dense<0.000000e+00> : vector<8xf32>
    %418 = vector.multi_reduction <add>, %417, %cst_164 [1] : vector<8x8xf32> to vector<8xf32>
    %419 = vector.shape_cast %418 : vector<8xf32> to vector<8x1xf32>
    %420 = tpu.reciprocal %419 {approx = true} : vector<8x1xf32> -> vector<8x1xf32>
    %421 = vector.broadcast %420 : vector<8x1xf32> to vector<8x8xf32>
    %422 = arith.mulf %417, %421 : vector<8x8xf32>
    %423 = arith.truncf %422 : vector<8x8xf32> to vector<8x8xbf16>
    %cst_165 = arith.constant dense<0.000000e+00> : vector<8x16xf32>
    %424 = tpu.matmul %423, %409, %cst_165 {dimension_numbers = #tpu.dot_dimension_numbers<[1], [0], [0], [1], [0, 0, 1, 1], [], []>} : vector<8x8xbf16>, vector<8x16xbf16>, vector<8x16xf32> -> vector<8x16xf32>
    %c0_166 = arith.constant 0 : index
    %c112_167 = arith.constant 112 : index
    %425 = vector.load %arg18[%c0_166, %c112_167] : memref<8x128xf32, #tpu.memory_space<vmem>>, vector<8x16xf32>
    tpu.vector_store %arg18[%c0_166, %c112_167], %424 {strides = array<i32>} : memref<8x128xf32, #tpu.memory_space<vmem>>, vector<8x16xf32>,
    %c0_168 = arith.constant 0 : index
    %c0_169 = arith.constant 0 : index
    %426 = vector.load %arg18[%c0_168, %c0_169] : memref<8x128xf32, #tpu.memory_space<vmem>>, vector<8x128xf32>
    %c1_170 = arith.constant 1 : index
    %c0_171 = arith.constant 0 : index
    %c0_172 = arith.constant 0 : index
    %427 = vector.load %arg4[%c1_170, %c0_171, %c0_172] : memref<2x128x128xbf16, #tpu.memory_space<vmem>>, vector<1x128x128xbf16>
    %428 = vector.shape_cast %427 : vector<1x128x128xbf16> to vector<128x128xbf16>
    %429 = arith.truncf %426 : vector<8x128xf32> to vector<8x128xbf16>
    %cst_173 = arith.constant dense<0.000000e+00> : vector<8x128xf32>
    %430 = tpu.matmul %429, %428, %cst_173 {dimension_numbers = #tpu.dot_dimension_numbers<[1], [0], [0], [1], [0, 0, 1, 1], [], []>} : vector<8x128xbf16>, vector<128x128xbf16>, vector<8x128xf32> -> vector<8x128xf32>
    %c1_174 = arith.constant 1 : index
    %c0_175 = arith.constant 0 : index
    %c0_176 = arith.constant 0 : index
    %431 = vector.load %arg5[%c1_174, %c0_175, %c0_176] : memref<2x1x128xf32, #tpu.memory_space<vmem>>, vector<1x1x128xf32>
    %432 = vector.shape_cast %431 : vector<1x1x128xf32> to vector<1x128xf32>
    %433 = vector.broadcast %432 : vector<1x128xf32> to vector<8x128xf32>
    %434 = arith.addf %430, %433 : vector<8x128xf32>
    %435 = arith.addf %259, %434 : vector<8x128xf32>
    %c1_177 = arith.constant 1 : index
    %c0_178 = arith.constant 0 : index
    %c0_179 = arith.constant 0 : index
    %436 = vector.load %arg6[%c1_177, %c0_178, %c0_179] : memref<2x1x128xf32, #tpu.memory_space<vmem>>, vector<1x1x128xf32>
    %437 = vector.shape_cast %436 : vector<1x1x128xf32> to vector<1x128xf32>
    %c1_180 = arith.constant 1 : index
    %c0_181 = arith.constant 0 : index
    %c0_182 = arith.constant 0 : index
    %438 = vector.load %arg7[%c1_180, %c0_181, %c0_182] : memref<2x1x128xf32, #tpu.memory_space<vmem>>, vector<1x1x128xf32>
    %439 = vector.shape_cast %438 : vector<1x1x128xf32> to vector<1x128xf32>
    %cst_183 = arith.constant dense<0.000000e+00> : vector<8xf32>
    %440 = vector.multi_reduction <add>, %435, %cst_183 [1] : vector<8x128xf32> to vector<8xf32>
    %441 = vector.shape_cast %440 : vector<8xf32> to vector<8x1xf32>
    %cst_184 = arith.constant 1.280000e+02 : f32
    %442 = vector.broadcast %cst_184 : f32 to vector<8x1xf32>
    %443 = arith.divf %441, %442 : vector<8x1xf32>
    %444 = vector.broadcast %443 : vector<8x1xf32> to vector<8x128xf32>
    %445 = arith.subf %435, %444 : vector<8x128xf32>
    %446 = arith.mulf %445, %445 : vector<8x128xf32>
    %cst_185 = arith.constant dense<0.000000e+00> : vector<8xf32>
    %447 = vector.multi_reduction <add>, %446, %cst_185 [1] : vector<8x128xf32> to vector<8xf32>
    %448 = vector.shape_cast %447 : vector<8xf32> to vector<8x1xf32>
    %cst_186 = arith.constant 1.280000e+02 : f32
    %449 = vector.broadcast %cst_186 : f32 to vector<8x1xf32>
    %450 = arith.divf %448, %449 : vector<8x1xf32>
    %451 = vector.broadcast %443 : vector<8x1xf32> to vector<8x128xf32>
    %452 = arith.subf %435, %451 : vector<8x128xf32>
    %cst_187 = arith.constant 9.99999974E-6 : f32
    %453 = vector.broadcast %cst_187 : f32 to vector<8x1xf32>
    %454 = arith.addf %450, %453 : vector<8x1xf32>
    %455 = math.rsqrt %454 : vector<8x1xf32>
    %456 = vector.broadcast %455 : vector<8x1xf32> to vector<8x128xf32>
    %457 = arith.mulf %452, %456 : vector<8x128xf32>
    %458 = vector.broadcast %437 : vector<1x128xf32> to vector<8x128xf32>
    %459 = arith.mulf %457, %458 : vector<8x128xf32>
    %460 = vector.broadcast %439 : vector<1x128xf32> to vector<8x128xf32>
    %461 = arith.addf %459, %460 : vector<8x128xf32>
    %c1_188 = arith.constant 1 : index
    %c0_189 = arith.constant 0 : index
    %c0_190 = arith.constant 0 : index
    %462 = vector.load %arg8[%c1_188, %c0_189, %c0_190] : memref<2x128x512xbf16, #tpu.memory_space<vmem>>, vector<1x128x512xbf16>
    %463 = vector.shape_cast %462 : vector<1x128x512xbf16> to vector<128x512xbf16>
    %464 = arith.truncf %461 : vector<8x128xf32> to vector<8x128xbf16>
    %cst_191 = arith.constant dense<0.000000e+00> : vector<8x512xf32>
    %465 = tpu.matmul %464, %463, %cst_191 {dimension_numbers = #tpu.dot_dimension_numbers<[1], [0], [0], [1], [0, 0, 1, 1], [], []>} : vector<8x128xbf16>, vector<128x512xbf16>, vector<8x512xf32> -> vector<8x512xf32>
    %c1_192 = arith.constant 1 : index
    %c0_193 = arith.constant 0 : index
    %c0_194 = arith.constant 0 : index
    %466 = vector.load %arg9[%c1_192, %c0_193, %c0_194] : memref<2x1x512xf32, #tpu.memory_space<vmem>>, vector<1x1x512xf32>
    %467 = vector.shape_cast %466 : vector<1x1x512xf32> to vector<1x512xf32>
    %468 = vector.broadcast %467 : vector<1x512xf32> to vector<8x512xf32>
    %469 = arith.addf %465, %468 : vector<8x512xf32>
    %cst_195 = arith.constant 5.000000e-01 : f32
    %470 = vector.broadcast %cst_195 : f32 to vector<8x512xf32>
    %471 = arith.mulf %470, %469 : vector<8x512xf32>
    %cst_196 = arith.constant 4.471500e-02 : f32
    %472 = vector.broadcast %cst_196 : f32 to vector<8x512xf32>
    %473 = arith.mulf %472, %469 : vector<8x512xf32>
    %474 = arith.mulf %473, %469 : vector<8x512xf32>
    %475 = arith.mulf %474, %469 : vector<8x512xf32>
    %476 = arith.addf %469, %475 : vector<8x512xf32>
    %cst_197 = arith.constant 0.797884583 : f32
    %477 = vector.broadcast %cst_197 : f32 to vector<8x512xf32>
    %478 = arith.mulf %477, %476 : vector<8x512xf32>
    %479 = math.tanh %478 : vector<8x512xf32>
    %cst_198 = arith.constant 1.000000e+00 : f32
    %480 = vector.broadcast %cst_198 : f32 to vector<8x512xf32>
    %481 = arith.addf %480, %479 : vector<8x512xf32>
    %482 = arith.mulf %471, %481 : vector<8x512xf32>
    %c1_199 = arith.constant 1 : index
    %c0_200 = arith.constant 0 : index
    %c0_201 = arith.constant 0 : index
    %483 = vector.load %arg10[%c1_199, %c0_200, %c0_201] : memref<2x512x128xbf16, #tpu.memory_space<vmem>>, vector<1x512x128xbf16>
    %484 = vector.shape_cast %483 : vector<1x512x128xbf16> to vector<512x128xbf16>
    %485 = arith.truncf %482 : vector<8x512xf32> to vector<8x512xbf16>
    %cst_202 = arith.constant dense<0.000000e+00> : vector<8x128xf32>
    %486 = tpu.matmul %485, %484, %cst_202 {dimension_numbers = #tpu.dot_dimension_numbers<[1], [0], [0], [1], [0, 0, 1, 1], [], []>} : vector<8x512xbf16>, vector<512x128xbf16>, vector<8x128xf32> -> vector<8x128xf32>
    %c1_203 = arith.constant 1 : index
    %c0_204 = arith.constant 0 : index
    %c0_205 = arith.constant 0 : index
    %487 = vector.load %arg11[%c1_203, %c0_204, %c0_205] : memref<2x1x128xf32, #tpu.memory_space<vmem>>, vector<1x1x128xf32>
    %488 = vector.shape_cast %487 : vector<1x1x128xf32> to vector<1x128xf32>
    %489 = vector.broadcast %488 : vector<1x128xf32> to vector<8x128xf32>
    %490 = arith.addf %486, %489 : vector<8x128xf32>
    %491 = arith.addf %461, %490 : vector<8x128xf32>
    %c1_206 = arith.constant 1 : index
    %c0_207 = arith.constant 0 : index
    %c0_208 = arith.constant 0 : index
    %492 = vector.load %arg12[%c1_206, %c0_207, %c0_208] : memref<2x1x128xf32, #tpu.memory_space<vmem>>, vector<1x1x128xf32>
    %493 = vector.shape_cast %492 : vector<1x1x128xf32> to vector<1x128xf32>
    %c1_209 = arith.constant 1 : index
    %c0_210 = arith.constant 0 : index
    %c0_211 = arith.constant 0 : index
    %494 = vector.load %arg13[%c1_209, %c0_210, %c0_211] : memref<2x1x128xf32, #tpu.memory_space<vmem>>, vector<1x1x128xf32>
    %495 = vector.shape_cast %494 : vector<1x1x128xf32> to vector<1x128xf32>
    %cst_212 = arith.constant dense<0.000000e+00> : vector<8xf32>
    %496 = vector.multi_reduction <add>, %491, %cst_212 [1] : vector<8x128xf32> to vector<8xf32>
    %497 = vector.shape_cast %496 : vector<8xf32> to vector<8x1xf32>
    %cst_213 = arith.constant 1.280000e+02 : f32
    %498 = vector.broadcast %cst_213 : f32 to vector<8x1xf32>
    %499 = arith.divf %497, %498 : vector<8x1xf32>
    %500 = vector.broadcast %499 : vector<8x1xf32> to vector<8x128xf32>
    %501 = arith.subf %491, %500 : vector<8x128xf32>
    %502 = arith.mulf %501, %501 : vector<8x128xf32>
    %cst_214 = arith.constant dense<0.000000e+00> : vector<8xf32>
    %503 = vector.multi_reduction <add>, %502, %cst_214 [1] : vector<8x128xf32> to vector<8xf32>
    %504 = vector.shape_cast %503 : vector<8xf32> to vector<8x1xf32>
    %cst_215 = arith.constant 1.280000e+02 : f32
    %505 = vector.broadcast %cst_215 : f32 to vector<8x1xf32>
    %506 = arith.divf %504, %505 : vector<8x1xf32>
    %507 = vector.broadcast %499 : vector<8x1xf32> to vector<8x128xf32>
    %508 = arith.subf %491, %507 : vector<8x128xf32>
    %cst_216 = arith.constant 9.99999974E-6 : f32
    %509 = vector.broadcast %cst_216 : f32 to vector<8x1xf32>
    %510 = arith.addf %506, %509 : vector<8x1xf32>
    %511 = math.rsqrt %510 : vector<8x1xf32>
    %512 = vector.broadcast %511 : vector<8x1xf32> to vector<8x128xf32>
    %513 = arith.mulf %508, %512 : vector<8x128xf32>
    %514 = vector.broadcast %493 : vector<1x128xf32> to vector<8x128xf32>
    %515 = arith.mulf %513, %514 : vector<8x128xf32>
    %516 = vector.broadcast %495 : vector<1x128xf32> to vector<8x128xf32>
    %517 = arith.addf %515, %516 : vector<8x128xf32>
    %518 = vector.shape_cast %517 : vector<8x128xf32> to vector<1x8x128xf32>
    %c0_217 = arith.constant 0 : index
    %c0_218 = arith.constant 0 : index
    %c0_219 = arith.constant 0 : index
    %519 = vector.load %arg17[%c0_217, %c0_218, %c0_219] : memref<1x8x128xf32, #tpu.memory_space<vmem>>, vector<1x8x128xf32>
    tpu.vector_store %arg17[%c0_217, %c0_218, %c0_219], %518 {strides = array<i32>} : memref<1x8x128xf32, #tpu.memory_space<vmem>>, vector<1x8x128xf32>,
    %c0_220 = arith.constant 0 : index
    %c0_221 = arith.constant 0 : index
    %520 = vector.load %arg14[%c0_220, %c0_221] : memref<128x512xbf16, #tpu.memory_space<vmem>>, vector<128x512xbf16>
    %521 = arith.truncf %517 : vector<8x128xf32> to vector<8x128xbf16>
    %cst_222 = arith.constant dense<0.000000e+00> : vector<8x512xf32>
    %522 = tpu.matmul %521, %520, %cst_222 {dimension_numbers = #tpu.dot_dimension_numbers<[1], [0], [0], [1], [0, 0, 1, 1], [], []>} : vector<8x128xbf16>, vector<128x512xbf16>, vector<8x512xf32> -> vector<8x512xf32>
    %c0_223 = arith.constant 0 : index
    %c0_224 = arith.constant 0 : index
    %523 = vector.load %arg15[%c0_223, %c0_224] : memref<1x512xf32, #tpu.memory_space<vmem>>, vector<1x512xf32>
    %524 = vector.broadcast %523 : vector<1x512xf32> to vector<8x512xf32>
    %525 = arith.addf %522, %524 : vector<8x512xf32>
    %526 = vector.shape_cast %525 : vector<8x512xf32> to vector<1x8x512xf32>
    %c0_225 = arith.constant 0 : index
    %c0_226 = arith.constant 0 : index
    %c0_227 = arith.constant 0 : index
    %527 = vector.load %arg16[%c0_225, %c0_226, %c0_227] : memref<1x8x512xf32, #tpu.memory_space<vmem>>, vector<1x8x512xf32>
    tpu.vector_store %arg16[%c0_225, %c0_226, %c0_227], %526 {strides = array<i32>} : memref<1x8x512xf32, #tpu.memory_space<vmem>>, vector<1x8x512xf32>,
    return
  }
  func.func @transform_0(%arg0: i32) -> (i32, i32, i32) {
    %c0_i32 = arith.constant 0 : i32
    %c0_i32_0 = arith.constant 0 : i32
    %c0_i32_1 = arith.constant 0 : i32
    return %arg0, %c0_i32, %c0_i32_0 : i32, i32, i32
  }
  func.func @transform_1(%arg0: i32) -> (i32, i32, i32) {
    %c0_i32 = arith.constant 0 : i32
    %c0_i32_0 = arith.constant 0 : i32
    %c0_i32_1 = arith.constant 0 : i32
    %c0_i32_2 = arith.constant 0 : i32
    return %c0_i32, %c0_i32_0, %c0_i32_1 : i32, i32, i32
  }
  func.func @transform_2(%arg0: i32) -> (i32, i32, i32) {
    %c0_i32 = arith.constant 0 : i32
    %c0_i32_0 = arith.constant 0 : i32
    %c0_i32_1 = arith.constant 0 : i32
    %c0_i32_2 = arith.constant 0 : i32
    return %c0_i32, %c0_i32_0, %c0_i32_1 : i32, i32, i32
  }
  func.func @transform_3(%arg0: i32) -> (i32, i32, i32) {
    %c0_i32 = arith.constant 0 : i32
    %c0_i32_0 = arith.constant 0 : i32
    %c0_i32_1 = arith.constant 0 : i32
    %c0_i32_2 = arith.constant 0 : i32
    return %c0_i32, %c0_i32_0, %c0_i32_1 : i32, i32, i32
  }
  func.func @transform_4(%arg0: i32) -> (i32, i32, i32) {
    %c0_i32 = arith.constant 0 : i32
    %c0_i32_0 = arith.constant 0 : i32
    %c0_i32_1 = arith.constant 0 : i32
    %c0_i32_2 = arith.constant 0 : i32
    return %c0_i32, %c0_i32_0, %c0_i32_1 : i32, i32, i32
  }
  func.func @transform_5(%arg0: i32) -> (i32, i32, i32) {
    %c0_i32 = arith.constant 0 : i32
    %c0_i32_0 = arith.constant 0 : i32
    %c0_i32_1 = arith.constant 0 : i32
    %c0_i32_2 = arith.constant 0 : i32
    return %c0_i32, %c0_i32_0, %c0_i32_1 : i32, i32, i32
  }
  func.func @transform_6(%arg0: i32) -> (i32, i32, i32) {
    %c0_i32 = arith.constant 0 : i32
    %c0_i32_0 = arith.constant 0 : i32
    %c0_i32_1 = arith.constant 0 : i32
    %c0_i32_2 = arith.constant 0 : i32
    return %c0_i32, %c0_i32_0, %c0_i32_1 : i32, i32, i32
  }
  func.func @transform_7(%arg0: i32) -> (i32, i32, i32) {
    %c0_i32 = arith.constant 0 : i32
    %c0_i32_0 = arith.constant 0 : i32
    %c0_i32_1 = arith.constant 0 : i32
    %c0_i32_2 = arith.constant 0 : i32
    return %c0_i32, %c0_i32_0, %c0_i32_1 : i32, i32, i32
  }
  func.func @transform_8(%arg0: i32) -> (i32, i32, i32) {
    %c0_i32 = arith.constant 0 : i32
    %c0_i32_0 = arith.constant 0 : i32
    %c0_i32_1 = arith.constant 0 : i32
    %c0_i32_2 = arith.constant 0 : i32
    return %c0_i32, %c0_i32_0, %c0_i32_1 : i32, i32, i32
  }
  func.func @transform_9(%arg0: i32) -> (i32, i32, i32) {
    %c0_i32 = arith.constant 0 : i32
    %c0_i32_0 = arith.constant 0 : i32
    %c0_i32_1 = arith.constant 0 : i32
    %c0_i32_2 = arith.constant 0 : i32
    return %c0_i32, %c0_i32_0, %c0_i32_1 : i32, i32, i32
  }
  func.func @transform_10(%arg0: i32) -> (i32, i32, i32) {
    %c0_i32 = arith.constant 0 : i32
    %c0_i32_0 = arith.constant 0 : i32
    %c0_i32_1 = arith.constant 0 : i32
    %c0_i32_2 = arith.constant 0 : i32
    return %c0_i32, %c0_i32_0, %c0_i32_1 : i32, i32, i32
  }
  func.func @transform_11(%arg0: i32) -> (i32, i32, i32) {
    %c0_i32 = arith.constant 0 : i32
    %c0_i32_0 = arith.constant 0 : i32
    %c0_i32_1 = arith.constant 0 : i32
    %c0_i32_2 = arith.constant 0 : i32
    return %c0_i32, %c0_i32_0, %c0_i32_1 : i32, i32, i32
  }
  func.func @transform_12(%arg0: i32) -> (i32, i32, i32) {
    %c0_i32 = arith.constant 0 : i32
    %c0_i32_0 = arith.constant 0 : i32
    %c0_i32_1 = arith.constant 0 : i32
    %c0_i32_2 = arith.constant 0 : i32
    return %c0_i32, %c0_i32_0, %c0_i32_1 : i32, i32, i32
  }
  func.func @transform_13(%arg0: i32) -> (i32, i32) {
    %c0_i32 = arith.constant 0 : i32
    %c0_i32_0 = arith.constant 0 : i32
    %c0_i32_1 = arith.constant 0 : i32
    return %c0_i32, %c0_i32_0 : i32, i32
  }
  func.func @transform_14(%arg0: i32) -> (i32, i32) {
    %c0_i32 = arith.constant 0 : i32
    %c0_i32_0 = arith.constant 0 : i32
    %c0_i32_1 = arith.constant 0 : i32
    return %c0_i32, %c0_i32_0 : i32, i32
  }
  func.func @transform_15(%arg0: i32) -> (i32, i32, i32) {
    %c0_i32 = arith.constant 0 : i32
    %c0_i32_0 = arith.constant 0 : i32
    %c0_i32_1 = arith.constant 0 : i32
    return %arg0, %c0_i32, %c0_i32_0 : i32, i32, i32
  }
  func.func @transform_16(%arg0: i32) -> (i32, i32, i32) {
    %c0_i32 = arith.constant 0 : i32
    %c0_i32_0 = arith.constant 0 : i32
    %c0_i32_1 = arith.constant 0 : i32
    return %arg0, %c0_i32, %c0_i32_0 : i32, i32, i32
  }
}

</mosaic_0001>

<bundles_post_ra>
// kernel: forward.1
= control target key start
LH: loop header
LB: loop body
LE: loop exit
PB: predicated region body
PF: predicated region fallthrough
CT: control target
= control target key end

     0   :  { %s6239_s0 = inlined_call_operand.vmem [shape: f32[2,8,128], index: 0, kind: input, shape index: {}]   ;;  %s6240_s1 = inlined_call_operand.hbm [shape: bf16[2,128,384], index: 1, kind: input, shape index: {}]   ;;  %s6241_s2 = inlined_call_operand.vmem [shape: f32[2,1,384], index: 2, kind: input, shape index: {}]   ;;  %s6242_s3 = inlined_call_operand.vmem [shape: bf16[2,128,128], index: 3, kind: input, shape index: {}]   ;;  %s6243_s4 = inlined_call_operand.vmem [shape: f32[2,1,128], index: 4, kind: input, shape index: {}]   ;;  %s6244_s5 = inlined_call_operand.vmem [shape: f32[2,1,128], index: 5, kind: input, shape index: {}]   ;;  %s6245_s6 = inlined_call_operand.vmem [shape: f32[2,1,128], index: 6, kind: input, shape index: {}]   ;;  %s6246_s7 = inlined_call_operand.hbm [shape: bf16[2,128,512], index: 7, kind: input, shape index: {}]   ;;  %s6247_s8 = inlined_call_operand.vmem [shape: f32[2,1,512], index: 8, kind: input, shape index: {}]   ;;  %s6248_s9 = inlined_call_operand.hbm [shape: bf16[2,512,128], index: 9, kind: input, shape index: {}]   ;;  %s6249_s10 = inlined_call_operand.vmem [shape: f32[2,1,128], index: 10, kind: input, shape index: {}]   ;;  %s6250_s11 = inlined_call_operand.vmem [shape: f32[2,1,128], index: 11, kind: input, shape index: {}]   ;;  %s6251_s12 = inlined_call_operand.vmem [shape: f32[2,1,128], index: 12, kind: input, shape index: {}]   ;;  %s6252_s13 = inlined_call_operand.hbm [shape: bf16[128,512], index: 13, kind: input, shape index: {}]   ;;  %s6253_s14 = inlined_call_operand.vmem [shape: f32[1,512], index: 14, kind: input, shape index: {}]   ;;  %s6254_s15 = inlined_call_operand.hbm [shape: f32[2,8,512], index: 15, kind: output, shape index: {0}]   ;;  %s6255_s16 = inlined_call_operand.hbm [shape: f32[2,8,128], index: 16, kind: output, shape index: {1}]  }
   0x1   :  { %6268 = sst [smem:[#allocation27_spill]] %s6239_s0 }
   0x2   :  { %6269 = sst [smem:[#allocation28_spill]] %s6240_s1 }
   0x3   :  { %6270 = sst [smem:[#allocation29_spill]] %s6246_s7 }
   0x4   :  { %6271 = sst [smem:[#allocation30_spill]] %s6251_s12 }
   0x5   :  { %6272 = sst [smem:[#allocation31_spill]] %s6253_s14 }
   0x6   :  { %6273 = sst [smem:[#allocation32_spill]] %s6254_s15 }
   0x7   :  { %6274 = sst [smem:[#allocation33_spill]] %s6255_s16 }
   0x8   :  { %22 = vsyncpa [#allocation4], 0 }
   0x9   :  { %23 = vsyncpa [#allocation7], 0 }
   0xa   :  { %24 = vsyncpa [#allocation10], 0 }
   0xb   :  { %25 = vsyncpa [#allocation5], 0 }
   0xc   :  { %27 = vsyncpa [#allocation5 + $0x1], 0 }
   0xd   :  { %28 = vsyncpa [#allocation13], 0 }
   0xe   :  { %30 = vsyncpa [#allocation13 + $0x1], 0  ;;  %s5702_s21 = smov 0   ;;  %s5704_s22 = smov 0  }
   0xf   :  { %s5706_s23 = smov 0   ;;  %s5708_s24 = smov 0  }
  0x10 LB: > { %6275 = sst [smem:[#allocation19_spill]] %s5585_s21  ;;  %s5723_s25 = sadd.s32 4294967295, %s5597_s24   ;;  %s5597_s24 = sphi %s5708_s24, %s6299_s24   ;;  %s5593_s23 = sphi %s5706_s23, %s6302_s23   ;;  %s5589_s22 = sphi %s5704_s22, %s6301_s22   ;;  %s5585_s21 = sphi %s5702_s21, %s6300_s21  }
  0x11   : > { %6276 = sst [smem:[#allocation20_spill]] %s5589_s22  ;;  %s3971_s26 = sadd.s32 4294967294, %s5597_s24  }
  0x12   : > { %6277 = sst [smem:[#allocation21_spill]] %s5593_s23  ;;  %s5727_s27 = sadd.s32 1, %s5597_s24  }
  0x13   : > { %6278 = sst [smem:[#allocation22_spill]] %s5597_s24  ;;  %s363_s28 = sadd.s32 1, %s5593_s23 }
  0x14   : > { %6279 = sst [smem:[#allocation23_spill]] %s5727_s27  ;;  %s360_s29 = ssub.s32 %s5597_s24, %s5727_s27 }
  0x15   : > { %p373_p0 = scmp.ne.s32.totalorder %s5593_s23, %s5589_s22  ;;  %p361_p1 = scmp.eq.s32.totalorder %s360_s29, 0 }
  0x16   : > { %p374_p2 = scmp.eq.s32.totalorder %s5723_s25, 1  ;;  %p379_p3 = scmp.ne.s32.totalorder %s5589_s22, %s5585_s21 }
  0x17   : > { %p380_p4 = scmp.eq.s32.totalorder %s3971_s26, 1  ;;  %p3972_p7 = scmp.ge.s32.totalorder %s5597_s24, 1 }
  0x18   : > { %s5738_s30 = scalar_select %p361_p1, %s5593_s23, %s363_s28  }
  0x19   : > { %p5740_p5 = por %p374_p2, %p373_p0  ;;  %p5744_p6 = por %p380_p4, %p379_p3 }
  0x1a   : > { %6280 = sst [smem:[#allocation24_spill]] %s5738_s30  ;;  %p413_p8 = scmp.lt.s32.totalorder %s5597_s24, 3 }
  0x1b   : > { %s6281_s0 = scalar_select %p5740_p5, 1, 0 }
  0x1c   : > { %s6283_s17 = scalar_select %p5744_p6, 1, 0 }
  0x1d   : > { %6282 = sst [smem:[#allocation25_spill]] %s6281_s0  ;;  %p5210_p9 = scmp.eq.s32.totalorder %s5723_s25, 0 }
  0x1e   : > { %6284 = sst [smem:[#allocation26_spill]] %s6283_s17  ;;  %p5751_p10 = pnand %p3972_p7, %p413_p8 }
  0x1f   : > { %s6286_s7 = sld [smem:[#allocation29_spill]]  ;;  %s5599_s28 = smov [#allocation6]  }
  0x20   : > { %p5190_p11 = pneg %p5751_p10  ;;  %s455_s29 = sshll.u32 %s5599_s28, 4  ;;  %s456_s29 = int_to_ptr.vmem [resolvable:$true] %s455_s29 }
  0x21   : > { %s6288_s1 = sld [smem:[#allocation28_spill]]  ;;  %s5600_s19 = smov 256  }
  0x22   : > { %p5762_p12 = pnand %p5210_p9, %p5190_p11  ;;  %s5601_s20 = smov 16  }
  0x23   : > { %s5603_s21 = smov 192   ;;  %s5604_s24 = smov 12  }
  0x24   : > { %s470_s23 = sshll.u32 %s6248_s9, 4  ;;  %s5605_s27 = smov [#allocation8]   ;;  %s471_s23 = int_to_ptr.hbm [resolvable:$true] %s470_s23 }
  0x25   : > { %s453_s26 = sshll.u32 %s6286_s7, 4  ;;  %s5602_s7 = smov [#allocation3]   ;;  %s454_s26 = int_to_ptr.hbm [resolvable:$true] %s453_s26 }
  0x26   : > { %5196 = dma.hbm_to_vmem [thread:$0]  (!%p5762_p12), %s454_s26, 8192, %s456_s29, [#allocation7], %s5600_s19, %s5600_s19, %s5601_s20  }
  0x27   : > { %s424_s17 = sshll.u32 %s6288_s1, 4  ;;  %s426_s28 = sshll.u32 %s5602_s7, 4  ;;  %s425_s17 = int_to_ptr.hbm [resolvable:$true] %s424_s17  ;;  %s427_s28 = int_to_ptr.vmem [resolvable:$true] %s426_s28 }
  0x28   : > { %5193 = dma.hbm_to_vmem [thread:$0]  (!%p5762_p12), %s425_s17, 6144, %s427_s28, [#allocation4], %s5603_s21, %s5603_s21, %s5604_s24  }
  0x29   : > { %s472_s1 = sshll.u32 %s5605_s27, 4  ;;  %s493_s26 = sshll.u32 %s6252_s13, 4  ;;  %s473_s1 = int_to_ptr.vmem [resolvable:$true] %s472_s1  ;;  %s494_s26 = int_to_ptr.hbm [resolvable:$true] %s493_s26 }
  0x2a   : > { %s5606_s29 = smov 64   ;;  %s5607_s7 = smov 4  }
  0x2b   : > { %5199 = dma.hbm_to_vmem [thread:$0]  (!%p5762_p12), %s471_s23, 8192, %s473_s1, [#allocation7], %s5606_s29, %s5606_s29, %s5607_s7  }
  0x2c   : > { %s5608_s22 = smov [#allocation9]   ;;  %521 = sbr.rel (%p5751_p10) target bundleno = 4539 (0x11bb), region = 80 }
  0x2d   : > { %s495_s12 = sshll.u32 %s5608_s22, 4  ;;  %s496_s12 = int_to_ptr.vmem [resolvable:$true] %s495_s12 }
  0x2e   : > { %5202 = dma.hbm_to_vmem [thread:$0]  (!%p5762_p12), %s494_s26, 4096, %s496_s12, [#allocation10], %s5600_s19, %s5600_s19, %s5601_s20  }
  0x31   : > { %5564 = dma.done.wait (%p5210_p9), [#allocation4], 6144  }
  0x32   : > { %5566 = vsyncadd (%p5210_p9), [#allocation4], 4294961152 }
  0x33   : > { %5568 = dma.done.wait (%p5210_p9), [#allocation7], 16384  }
  0x34   : > { %5570 = vsyncadd (%p5210_p9), [#allocation7], 4294950912 }
  0x35   : > { %5572 = dma.done.wait (%p5210_p9), [#allocation10], 4096  }
  0x36   : > { %5574 = vsyncadd (%p5210_p9), [#allocation10], 4294963200  ;;  %v4072_v0 = vld [vmem:[#allocation3 + $0xa8] sm:$0xf]  ;;  %v4967_v1 = vld [vmem:[#allocation3 + $0xb0] sm:$0xf0] }
  0x37   : > { %v4966_v2 = vld [vmem:[#allocation3 + $0xac] sm:$0xf]  ;;  %v4073_v3 = vor.u32 %v4967_v1, %v4072_v0  ;;  %v4074_v4 = vld [vmem:[#allocation3 + $0xb4] sm:$0xf0]  ;;  %v4060_v5 = vld [vmem:[#allocation3 + $0x90] sm:$0xf] }
  0x38   : > { %v4964_v6 = vld [vmem:[#allocation3 + $0x98] sm:$0xf0]  ;;  %v4077_v7 = vor.u32 %v4966_v2, %v4074_v4  ;;  %v4963_v8 = vld [vmem:[#allocation3 + $0x94] sm:$0xf]  ;;  %v4062_v9 = vld [vmem:[#allocation3 + $0x9c] sm:$0xf0] }
  0x39   : > { %766 = vmatpush.bf16.msra.mxu0 %v4073_v3  ;;  %v4061_v10 = vor.u32 %v4964_v6, %v4060_v5  ;;  %v4065_v11 = vor.u32 %v4963_v8, %v4062_v9  ;;  %v4048_v12 = vld [vmem:[#allocation3 + $0x78] sm:$0xf]  ;;  %v4961_v13 = vld [vmem:[#allocation3 + $0x80] sm:$0xf0]  ;;  %v4960_v14 = vld [vmem:[#allocation3 + $0x7c] sm:$0xf] }
  0x3a   : > { %779 = vmatpush.bf16.msra.mxu1 %v4077_v7  ;;  %v4050_v15 = vld [vmem:[#allocation3 + $0x84] sm:$0xf0]  ;;  %v4049_v16 = vor.u32 %v4961_v13, %v4048_v12  ;;  %v4036_v18 = vld [vmem:[#allocation3 + $0x60] sm:$0xf]  ;;  %v4958_v19 = vld [vmem:[#allocation3 + $0x68] sm:$0xf0] }
  0x3b   : > { %v4053_v17 = vor.u32 %v4960_v14, %v4050_v15  ;;  %v4957_v20 = vld [vmem:[#allocation3 + $0x64] sm:$0xf]  ;;  %v4038_v21 = vld [vmem:[#allocation3 + $0x6c] sm:$0xf0]  ;;  %p591_p13 = scmp.lt.s32.totalorder %s5723_s25, 1  ;;  %v4037_v22 = vor.u32 %v4958_v19, %v4036_v18  ;;  %s6289_s16 = sld [smem:[#allocation27_spill]] }
  0x3c   : > { %v4080_v23 = vld [vmem:[#allocation3 + $0xb0] sm:$0xf]  ;;  %v4968_v24 = vld [vmem:[#allocation3 + $0xb8] sm:$0xf0]  ;;  %v4068_v25 = vld [vmem:[#allocation3 + $0x98] sm:$0xf]  ;;  %v4041_v26 = vor.u32 %v4957_v20, %v4038_v21 }
  0x3d   : > { %767 = vmatpush.bf16.msra.mxu0 %v4061_v10  ;;  %v4024_v27 = vld [vmem:[#allocation3 + $0x48] sm:$0xf]  ;;  %v4955_v28 = vld [vmem:[#allocation3 + $0x50] sm:$0xf0]  ;;  %v4081_v29 = vor.u32 %v4968_v24, %v4080_v23  ;;  %v4965_v30 = vld [vmem:[#allocation3 + $0xa0] sm:$0xf0] }
  0x3e   : > { %780 = vmatpush.bf16.msra.mxu1 %v4065_v11  ;;  %v4954_v31 = vld [vmem:[#allocation3 + $0x4c] sm:$0xf]  ;;  %v4026_v32 = vld [vmem:[#allocation3 + $0x54] sm:$0xf0]  ;;  %v4012_v33 = vld [vmem:[#allocation3 + $0x30] sm:$0xf]  ;;  %v4069_v34 = vor.u32 %v4965_v30, %v4068_v25  ;;  %v4025_v35 = vor.u32 %v4955_v28, %v4024_v27 }
  0x3f   : > { %s5801_s1 = scalar_select %p591_p13, %s5723_s25, 1  ;;  %792 = vmatpush.bf16.msra.mxu2 %v4081_v29  ;;  %v4952_v36 = vld [vmem:[#allocation3 + $0x38] sm:$0xf0]  ;;  %v4056_v37 = vld [vmem:[#allocation3 + $0x80] sm:$0xf]  ;;  %v4029_v39 = vor.u32 %v4954_v31, %v4026_v32  ;;  %vm808_vm0 = vcmask 130048  }
  0x40   : > { %v4962_v38 = vld [vmem:[#allocation3 + $0x88] sm:$0xf0]  ;;  %v4951_v40 = vld [vmem:[#allocation3 + $0x34] sm:$0xf]  ;;  %v4014_v41 = vld [vmem:[#allocation3 + $0x3c] sm:$0xf0]  ;;  %v4013_v47 = vor.u32 %v4952_v36, %v4012_v33 }
  0x41   : > { %768 = vmatpush.bf16.msra.mxu0 %v4049_v16  ;;  %v4044_v42 = vld [vmem:[#allocation3 + $0x68] sm:$0xf]  ;;  %v4959_v43 = vld [vmem:[#allocation3 + $0x70] sm:$0xf0]  ;;  %v4000_v44 = vld [vmem:[#allocation3 + $0x18] sm:$0xf]  ;;  %v4057_v46 = vor.u32 %v4962_v38, %v4056_v37  ;;  %v4017_v48 = vor.u32 %v4951_v40, %v4014_v41 }
  0x42   : > { %781 = vmatpush.bf16.msra.mxu1 %v4053_v17  ;;  %v4949_v45 = vld [vmem:[#allocation3 + $0x20] sm:$0xf0]  ;;  %v4948_v49 = vld [vmem:[#allocation3 + $0x1c] sm:$0xf]  ;;  %v4002_v50 = vld [vmem:[#allocation3 + $0x24] sm:$0xf0]  ;;  %v4045_v51 = vor.u32 %v4959_v43, %v4044_v42 }
  0x43   : > { %793 = vmatpush.bf16.msra.mxu2 %v4069_v34  ;;  %s3985_s12 = sshll.u32 %s5801_s1, 3  ;;  %v4001_v52 = vor.u32 %v4949_v45, %v4000_v44  ;;  %v4032_v53 = vld [vmem:[#allocation3 + $0x50] sm:$0xf]  ;;  %v4956_v54 = vld [vmem:[#allocation3 + $0x58] sm:$0xf0]  ;;  %v4005_v55 = vor.u32 %v4948_v49, %v4002_v50  ;;  %s5609_s30 = smov 96  }
  0x44   : > { %v3988_v56 = vld [vmem:[#allocation3] sm:$0xf]  ;;  %v4946_v57 = vld [vmem:[#allocation3 + $0x8] sm:$0xf0]  ;;  %s594_s21 = scalar_lea.vmem %s6289_s16, %s3985_s12  ;;  %v4945_v58 = vld [vmem:[#allocation3 + $0x4] sm:$0xf]  ;;  %v4033_v60 = vor.u32 %v4956_v54, %v4032_v53 }
  0x45   : > { %769 = vmatpush.bf16.msra.mxu0 %v4037_v22  ;;  %v3990_v59 = vld [vmem:[#allocation3 + $0xc] sm:$0xf0]  ;;  %v3989_v61 = vor.u32 %v4946_v57, %v3988_v56  ;;  %v5807_v62 = vld [vmem:[%s594_s21] sm:$0xff]  ;;  %v4953_v0 = vld [vmem:[#allocation3 + $0x40] sm:$0xf0]  ;;  %s5610_s0 = smov 112  }
  0x46   : > { %782 = vmatpush.bf16.msra.mxu1 %v4041_v26  ;;  %v4020_v63 = vld [vmem:[#allocation3 + $0x38] sm:$0xf]  ;;  %v3993_v1 = vor.u32 %v4945_v58, %v3990_v59  ;;  %v629_v2 = vpack.c.bf16 %v5807_v62, %v5807_v62  ;;  %v4008_v4 = vld [vmem:[#allocation3 + $0x20] sm:$0xf]  ;;  %v4950_v5 = vld [vmem:[#allocation3 + $0x28] sm:$0xf0] }
  0x47   : > { %794 = vmatpush.bf16.msra.mxu2 %v4057_v46  ;;  %v4021_v3 = vor.u32 %v4953_v0, %v4020_v63  ;;  %v4009_v6 = vor.u32 %v4950_v5, %v4008_v4  ;;  %v3996_v7 = vld [vmem:[#allocation3 + $0x8] sm:$0xf]  ;;  %v4947_v8 = vld [vmem:[#allocation3 + $0x10] sm:$0xf0]  ;;  %v630_v10 = vld [vmem:[%s6241_s2] sm:$0x7] }
  0x48   : > { %v3997_v9 = vor.u32 %v4947_v8, %v3996_v7  ;;  %v632_v11 = vperm.slane %v630_v10, 0  ;;  %v633_v12 = vperm.slane %v630_v10, 1  ;;  %s5611_s17 = smov 80   ;;  %s5612_s18 = smov 64   ;;  %v634_v26 = vperm.slane %v630_v10, 2 }
  0x49   : > { %770 = vmatpush.bf16.msra.mxu0 %v4025_v35  ;;  %s5613_s19 = smov 48   ;;  %s5614_s20 = smov 32   ;;  %vm845_vm1 = vcmask 1043456   ;;  %vm829_vm2 = vcmask 64512   ;;  %vm933_vm3 = vcmask 261248   ;;  %vm996_vm4 = vcmask 392448  }
  0x4a   : > { %783 = vmatpush.bf16.msra.mxu1 %v4029_v39  ;;  %s5615_s28 = smov 16   ;;  %vm1059_vm5 = vcmask 523648   ;;  %vm1122_vm6 = vcmask 654848   ;;  %vm1185_vm7 = vcmask 786048   ;;  %vm1248_vm8 = vcmask 917248   ;;  %s6290_s7 = sld [smem:[#allocation30_spill]] }
  0x4b   : > { %795 = vmatpush.bf16.msra.mxu2 %v4045_v51  ;;  %vm1311_vm9 = vcmask 1048448   ;;  %s4942_s29 = sshll.u32 %s5723_s25, 3 }
  0x4d   : > { %771 = vmatpush.bf16.msra.mxu0 %v4013_v47 }
  0x4e   : > { %784 = vmatpush.bf16.msra.mxu1 %v4017_v48 }
  0x4f   : > { %796 = vmatpush.bf16.msra.mxu2 %v4033_v60 }
  0x51   : > { %772 = vmatpush.bf16.msra.mxu0 %v4001_v52 }
  0x52   : > { %785 = vmatpush.bf16.msra.mxu1 %v4005_v55 }
  0x53   : > { %797 = vmatpush.bf16.msra.mxu2 %v4021_v3 }
  0x55   : > { %773 = vmatpush.bf16.msra.mxu0 %v3989_v61 }
  0x56   : > { %786 = vmatpush.bf16.msra.mxu1 %v3993_v1 }
  0x57   : > { %798 = vmatpush.bf16.msra.mxu2 %v4009_v6 }
  0x58   : > { %774 = vmatmul.bf16.vlgmr.msra.gmra.mxu0 %v629_v2 }
  0x59   : > { %787 = vmatmul.bf16.vlgmr.msra.gmra.mxu1 %v629_v2 }
  0x5b   : > { %799 = vmatpush.bf16.msra.mxu2 %v3997_v9 }
  0x5e   : > { %800 = vmatmul.bf16.vlgmr.msra.gmra.mxu2 %v629_v2 }
  0xd5   : > { %v775_v13 = vpop.f32.mrf.mxu0 }
  0xd6   : > { %v788_v14 = vpop.f32.mrf.mxu1  ;;  %v776_v15 = vadd.f32 %v775_v13, %v632_v11 }
  0xd7   : > { %v789_v16 = vadd.f32 %v788_v14, %v633_v12 }
  0xd8   : > { %v805_v18 = vpack.c.bf16 %v776_v15, %v776_v15 }
  0xd9   : > { %v806_v17 = vpack.c.bf16 %v789_v16, %v789_v16 }
  0xda   : > { %v864_v24 = vunpack.c.l.b16 %v805_v18 }
  0xdb   : > { %v869_v19 = vunpack.c.l.b16 %v806_v17  ;;  %v813_v20 = vsel %vm808_vm0, %v806_v17, 0 }
  0xdc   : > { %822 = vmatpush.bf16.xpose.msra.mxu3 %v813_v20  ;;  %v865_v25 = vpack.c.b16 %v864_v24, %v864_v24 }
  0xdd   : > { %v5815_v21 = vpack.c.b16 %v869_v19, %v869_v19  ;;  %v777_v22 = vpop.f32.mrf.mxu0 }
  0xde   : > { %v790_v23 = vpop.f32.mrf.mxu1 }
  0xdf   : > { %937 = vrot.lane.b32.xlu2 %v5815_v21, %s5609_s30  ;;  %871 = vrot.lane.b32.xlu1 %v5815_v21, %s5610_s0 }
  0xe1   : > { %v801_v27 = vpop.f32.mrf.mxu2 }
  0xe2   : > { %v802_v28 = vadd.f32 %v801_v27, %v634_v26 }
  0xe3   : > { %4082 = vmatmul.msk.bf16.vlgmr.msra.gmra.mxu3 %vm808_vm0, %v805_v18 }
  0xe4   : > { %v5836_v29 = vpack.c.bf16 %v802_v28, %v802_v28 }
  0xe6   : > { %v847_v30 = vsel %vm845_vm1, %v5836_v29, 0  ;;  %v906_v22 = vunpack.c.l.b16 %v5836_v29 }
  0xe7   : > { %1000 = vrot.lane.b32.xlu2 %v5815_v21, %s5611_s17  ;;  %866 = vrot.lane.b32.xlu1 %v865_v25, %s5610_s0 }
  0xe8   : > { %856 = vmatpush.bf16.msrb.mxu3 %v847_v30  ;;  %v5869_v24 = vpack.c.b16 %v906_v22, %v906_v22 }
  0xe9   : > { %v803_v31 = vpop.f32.mrf.mxu2 }
  0xef   : > { %1063 = vrot.lane.b32.xlu2 %v5815_v21, %s5612_s18  ;;  %998 = vrot.lane.b32.xlu1 %v865_v25, %s5611_s17 }
  0xf7   : > { %1061 = vrot.lane.b32.xlu2 %v865_v25, %s5612_s18  ;;  %1126 = vrot.lane.b32.xlu1 %v5815_v21, %s5613_s19 }
  0xff   : > { %1189 = vrot.lane.b32.xlu2 %v5815_v21, %s5614_s20  ;;  %1124 = vrot.lane.b32.xlu1 %v865_v25, %s5613_s19 }
 0x107   : > { %1250 = vrot.lane.b32.xlu2 %v865_v25, %s5615_s28  ;;  %1187 = vrot.lane.b32.xlu1 %v865_v25, %s5614_s20 }
 0x139   : > { %v938_v32 = vpop.permute.xlu2 %937 }
 0x13a   : > { %v943_v33 = vsel %vm808_vm0, %v938_v32, 0 }
 0x13b   : > { %952 = vmatpush.bf16.xpose.msrb.mxu2 %v943_v33 }
 0x141   : > { %v1001_v34 = vpop.permute.xlu2 %1000 }
 0x142   : > { %v1006_v3 = vsel %vm808_vm0, %v1001_v34, 0 }
 0x149   : > { %v1064_v35 = vpop.permute.xlu2 %1063 }
 0x14a   : > { %v1069_v36 = vsel %vm808_vm0, %v1064_v35, 0 }
 0x14b   : > { %1078 = vmatpush.bf16.xpose.msrb.mxu1 %v1069_v36 }
 0x151   : > { %v872_v37 = vpop.permute.xlu1 %871  ;;  %v1062_v38 = vpop.permute.xlu2 %1061 }
 0x152   : > { %v877_v39 = vsel %vm808_vm0, %v872_v37, 0  ;;  %4090 = vmatmul.msk.bf16.vlgmr.msrb.gmra.mxu1 %vm808_vm0, %v1062_v38 }
 0x153   : > { %886 = vmatpush.bf16.xpose.msra.mxu3 %v877_v39 }
 0x159   : > { %v1190_v40 = vpop.permute.xlu2 %1189  ;;  %v867_v41 = vpop.permute.xlu1 %866 }
 0x15a   : > { %v1195_v42 = vsel %vm808_vm0, %v1190_v40, 0 }
 0x15b   : > { %1204 = vmatpush.bf16.xpose.msra.mxu1 %v1195_v42 }
 0x161   : > { %v999_v43 = vpop.permute.xlu1 %998  ;;  %v1251_v8 = vpop.permute.xlu2 %1250 }
 0x166   : > { %v824_v44 = vpop.f32.mrf.mxu3 }
 0x167   : > { %v828_v45 = vmul.f32 0.25, %v824_v44 }
 0x169   : > { %v1127_v46 = vpop.permute.xlu1 %1126  ;;  %v830_v47 = vsel %vm829_vm2, %v828_v45, -inf }
 0x16a   : > { %831 = vmax.xlane.f32.xlu0 %v830_v47  ;;  %v1132_v5 = vsel %vm808_vm0, %v1127_v46, 0 }
 0x16e   : > { %v826_v48 = vpop.f32.mrf.mxu3 }
 0x171   : > { %v1125_v49 = vpop.permute.xlu1 %1124 }
 0x179   : > { %v1188_v50 = vpop.permute.xlu1 %1187 }
 0x17a   : > { %4094 = vmatmul.msk.bf16.vlgmr.msra.gmra.mxu1 %vm808_vm0, %v1188_v50 }
 0x1cf   : > { %v1080_v51 = vpop.f32.mrf.mxu1 }
 0x1d0   : > { %v1084_v60 = vmul.f32 0.25, %v1080_v51 }
 0x1d2   : > { %v1085_v61 = vsel %vm829_vm2, %v1084_v60, -inf }
 0x1d7   : > { %v1082_v52 = vpop.f32.mrf.mxu1 }
 0x1dd   : > { %v832_v53 = vpop.xlane.xlu0 %831 }
 0x1de   : > { %v833_v54 = vsub.f32 %v828_v45, %v832_v53 }
 0x1e0   : > { %v834_v55 = vmul.f32 1.442695, %v833_v54 }
 0x1e2   : > { %5281 = vpow2.f32 %v834_v55 }
 0x1e8   : > { %v5282_v56 = vpop.eup %5281 }
 0x1e9   : > { %v836_v57 = vsel %vm829_vm2, %v5282_v56, 0.0 }
 0x1ea   : > { %837 = vadd.xlane.f32.xlu0 %v836_v57 }
 0x1f7   : > { %v1206_v58 = vpop.f32.mrf.mxu1 }
 0x1f8   : > { %v5863_v14 = vmul.f32 0.25, %v1206_v58 }
 0x1fa   : > { %v1211_v17 = vsel %vm829_vm2, %v5863_v14, -inf }
 0x1fe   : > { %935 = vrot.lane.b32.xlu0 %v865_v25, %s5609_s30 }
 0x1ff   : > { %v1208_v59 = vpop.f32.mrf.mxu1 }
 0x206   : > { %1252 = vrot.lane.b32.xlu0 %v5815_v21, %s5615_s28 }
 0x230   : > { %1086 = vmax.xlane.f32.xlu0 %v1085_v61 }
 0x25d   : > { %v838_v63 = vpop.xlane.xlu0 %837 }
 0x25e   : > { %5283 = vrcp.f32 %v838_v63 }
 0x264   : > { %v5284_v0 = vpop.eup %5283 }
 0x265   : > { %v840_v1 = vmul.f32 %v5284_v0, %v5282_v56 }
 0x267   : > { %v841_v2 = vpack.c.bf16 %v840_v1, %v840_v1 }
 0x269   : > { %4083 = vmatmul.msk.bf16.vlgmr.msrb.gmra.mxu3 %vm829_vm2, %v841_v2 }
 0x26a   : > { %1015 = vmatpush.bf16.xpose.msrb.mxu3 %v1006_v3 }
 0x270   : > { %v936_v4 = vpop.permute.xlu0 %935 }
 0x271   : > { %4086 = vmatmul.msk.bf16.vlgmr.msrb.gmra.mxu2 %vm808_vm0, %v936_v4 }
 0x278   : > { %v1253_v6 = vpop.permute.xlu0 %1252 }
 0x279   : > { %4084 = vmatmul.msk.bf16.vlgmr.msra.gmra.mxu3 %vm808_vm0, %v867_v41  ;;  %v1258_v7 = vsel %vm808_vm0, %v1253_v6, 0 }
 0x27a   : > { %1141 = vmatpush.bf16.xpose.msra.mxu3 %v1132_v5 }
 0x289   : > { %4088 = vmatmul.msk.bf16.vlgmr.msrb.gmra.mxu3 %vm808_vm0, %v999_v43 }
 0x28a   : > { %1267 = vmatpush.bf16.xpose.msrb.mxu3 %v1258_v7 }
 0x299   : > { %4092 = vmatmul.msk.bf16.vlgmr.msra.gmra.mxu3 %vm808_vm0, %v1125_v49 }
 0x2a3   : > { %v1087_v31 = vpop.xlane.xlu0 %1086 }
 0x2a4   : > { %v1088_v32 = vsub.f32 %v1084_v60, %v1087_v31 }
 0x2a6   : > { %v1089_v34 = vmul.f32 1.442695, %v1088_v32 }
 0x2a8   : > { %5285 = vpow2.f32 %v1089_v34 }
 0x2a9   : > { %4096 = vmatmul.msk.bf16.vlgmr.msrb.gmra.mxu3 %vm808_vm0, %v1251_v8 }
 0x2ae   : > { %v5876_v29 = vpop.eup %5285 }
 0x2af   : > { %v1091_v35 = vsel %vm829_vm2, %v5876_v29, 0.0 }
 0x2ec   : > { %v858_v9 = vpop.f32.mrf.mxu3 }
 0x2ed   : > { %862 = vst.msk [vmem:[#allocation2] sm:$0xff] %vm808_vm0, %v858_v9 }
 0x2f4   : > { %v860_v10 = vpop.f32.mrf.mxu3  ;;  %v954_v11 = vpop.f32.mrf.mxu2 }
 0x2f5   : > { %v958_v12 = vmul.f32 0.25, %v954_v11 }
 0x2f7   : > { %v959_v13 = vsel %vm829_vm2, %v958_v12, -inf }
 0x2f8   : > { %960 = vmax.xlane.f32.xlu1 %v959_v13 }
 0x2fc   : > { %v888_v15 = vpop.f32.mrf.mxu3  ;;  %v956_v16 = vpop.f32.mrf.mxu2 }
 0x2fd   : > { %v892_v41 = vmul.f32 0.25, %v888_v15 }
 0x2ff   : > { %v893_v42 = vsel %vm829_vm2, %v892_v41, -inf }
 0x300   : > { %1212 = vmax.xlane.f32.xlu1 %v1211_v17 }
 0x304   : > { %v890_v18 = vpop.f32.mrf.mxu3 }
 0x30c   : > { %v1017_v19 = vpop.f32.mrf.mxu3 }
 0x30d   : > { %v1021_v20 = vmul.f32 0.25, %v1017_v19 }
 0x30f   : > { %v1022_v21 = vsel %vm829_vm2, %v1021_v20, -inf }
 0x310   : > { %1023 = vmax.xlane.f32.xlu2 %v1022_v21 }
 0x314   : > { %v1019_v23 = vpop.f32.mrf.mxu3 }
 0x319   : > { %908 = vrot.lane.b32.xlu1 %v5869_v24, %s5610_s0 }
 0x31c   : > { %v1143_v25 = vpop.f32.mrf.mxu3 }
 0x31d   : > { %v1147_v26 = vmul.f32 0.25, %v1143_v25 }
 0x31f   : > { %v1148_v27 = vsel %vm829_vm2, %v1147_v26, -inf }
 0x320   : > { %1149 = vmax.xlane.f32.xlu2 %v1148_v27 }
 0x324   : > { %v1145_v28 = vpop.f32.mrf.mxu3 }
 0x32c   : > { %v1269_v30 = vpop.f32.mrf.mxu3 }
 0x32d   : > { %v1273_v43 = vmul.f32 0.25, %v1269_v30 }
 0x32f   : > { %v1274_v45 = vsel %vm829_vm2, %v1273_v43, -inf }
 0x334   : > { %v1271_v33 = vpop.f32.mrf.mxu3 }
 0x338   : > { %1034 = vrot.lane.b32.xlu2 %v5869_v24, %s5611_s17 }
 0x340   : > { %1097 = vrot.lane.b32.xlu2 %v5869_v24, %s5612_s18 }
 0x343   : > { %1092 = vadd.xlane.f32.xlu1 %v1091_v35 }
 0x36b   : > { %v961_v36 = vpop.xlane.xlu1 %960 }
 0x36c   : > { %v962_v37 = vsub.f32 %v958_v12, %v961_v36 }
 0x36e   : > { %v963_v38 = vmul.f32 1.442695, %v962_v37 }
 0x370   : > { %5287 = vpow2.f32 %v963_v38 }
 0x373   : > { %v1213_v44 = vpop.xlane.xlu1 %1212 }
 0x376   : > { %v5288_v39 = vpop.eup %5287 }
 0x377   : > { %v965_v40 = vsel %vm829_vm2, %v5288_v39, 0.0 }
 0x378   : > { %966 = vadd.xlane.f32.xlu0 %v965_v40 }
 0x380   : > { %894 = vmax.xlane.f32.xlu0 %v893_v42 }
 0x383   : > { %v1024_v46 = vpop.xlane.xlu2 %1023 }
 0x384   : > { %v1025_v59 = vsub.f32 %v1021_v20, %v1024_v46  ;;  %v1214_v20 = vsub.f32 %v5863_v14, %v1213_v44 }
 0x386   : > { %v1026_v61 = vmul.f32 1.442695, %v1025_v59  ;;  %v1215_v21 = vmul.f32 1.442695, %v1214_v20 }
 0x388   : > { %1275 = vmax.xlane.f32.xlu0 %v1274_v45 }
 0x38b   : > { %v909_v47 = vpop.permute.xlu1 %908 }
 0x38c   : > { %v914_v48 = vsel %vm845_vm1, %v909_v47, 0 }
 0x38d   : > { %923 = vmatpush.bf16.msrb.mxu0 %v914_v48 }
 0x393   : > { %v1150_v49 = vpop.xlane.xlu2 %1149 }
 0x394   : > { %v1151_v52 = vsub.f32 %v1147_v26, %v1150_v49 }
 0x396   : > { %v1152_v53 = vmul.f32 1.442695, %v1151_v52 }
 0x398   : > { %5289 = vpow2.f32 %v1152_v53 }
 0x39b   : > { %v1035_v50 = vpop.permute.xlu2 %1034 }
 0x39c   : > { %v1040_v51 = vsel %vm845_vm1, %v1035_v50, 0  ;;  %971 = vrot.lane.b32.xlu0 %v5869_v24, %s5609_s30 }
 0x39d   : > { %1049 = vmatpush.bf16.msra.mxu0 %v1040_v51 }
 0x39e   : > { %v5889_v54 = vpop.eup %5289 }
 0x39f   : > { %v1154_v55 = vsel %vm829_vm2, %v5889_v54, 0.0 }
 0x3a3   : > { %v1098_v9 = vpop.permute.xlu2 %1097 }
 0x3a4   : > { %v1103_v13 = vsel %vm845_vm1, %v1098_v9, 0 }
 0x3b6   : > { %v1093_v15 = vpop.xlane.xlu1 %1092 }
 0x3c6   : > { %1155 = vadd.xlane.f32.xlu0 %v1154_v55 }
 0x3da   : > { %1223 = vrot.lane.b32.xlu0 %v5869_v24, %s5614_s20 }
 0x3eb   : > { %v967_v56 = vpop.xlane.xlu0 %966 }
 0x3f3   : > { %v895_v57 = vpop.xlane.xlu0 %894 }
 0x3f4   : > { %v896_v58 = vsub.f32 %v892_v41, %v895_v57 }
 0x3f6   : > { %v897_v60 = vmul.f32 1.442695, %v896_v58 }
 0x3f8   : > { %5291 = vpow2.f32 %v897_v60 }
 0x3f9   : > { %5293 = vpow2.f32 %v1026_v61 }
 0x3fb   : > { %v1276_v63 = vpop.xlane.xlu0 %1275 }
 0x3fc   : > { %v1277_v0 = vsub.f32 %v1273_v43, %v1276_v63 }
 0x3fe   : > { %v5292_v1 = vpop.eup %5291  ;;  %v1278_v2 = vmul.f32 1.442695, %v1277_v0 }
 0x3ff   : > { %v899_v3 = vsel %vm829_vm2, %v5292_v1, 0.0  ;;  %v5294_v4 = vpop.eup %5293 }
 0x400   : > { %5295 = vpow2.f32 %v1278_v2  ;;  %900 = vadd.xlane.f32.xlu2 %v899_v3  ;;  %v1028_v6 = vsel %vm829_vm2, %v5294_v4, 0.0 }
 0x401   : > { %5297 = vrcp.f32 %v967_v56 }
 0x402   : > { %5299 = vrcp.f32 %v1093_v15 }
 0x403   : > { %5301 = vpow2.f32 %v1215_v21 }
 0x406   : > { %v5896_v5 = vpop.eup %5295 }
 0x407   : > { %v1280_v7 = vsel %vm829_vm2, %v5896_v5, 0.0  ;;  %v5298_v8 = vpop.eup %5297 }
 0x408   : > { %1029 = vadd.xlane.f32.xlu2 %v1028_v6  ;;  %1281 = vadd.xlane.f32.xlu1 %v1280_v7  ;;  %v969_v10 = vmul.f32 %v5298_v8, %v5288_v39  ;;  %v5300_v17 = vpop.eup %5299  ;;  %v4974_v6 = vld [vmem:[%s6242_s3 + $0x28] sm:$0xff]  ;;  %v4973_v7 = vld [vmem:[%s6242_s3 + $0x20] sm:$0xff]  ;;  %v4972_v8 = vld [vmem:[%s6242_s3 + $0x18] sm:$0xff] }
 0x409   : > { %v1095_v18 = vmul.f32 %v5300_v17, %v5876_v29  ;;  %v5302_v23 = vpop.eup %5301 }
 0x40a   : > { %v970_v16 = vpack.c.bf16 %v969_v10, %v969_v10  ;;  %v1217_v25 = vsel %vm829_vm2, %v5302_v23, 0.0  ;;  %v4971_v10 = vld [vmem:[%s6242_s3 + $0x10] sm:$0xff] }
 0x40b   : > { %v1096_v19 = vpack.c.bf16 %v1095_v18, %v1095_v18  ;;  %v5269_v18 = vld [vmem:[%s6243_s4] ss:$0 sm:$0xff] }
 0x40e   : > { %v972_v11 = vpop.permute.xlu0 %971 }
 0x40f   : > { %v977_v12 = vsel %vm845_vm1, %v972_v11, 0  ;;  %v4970_v11 = vld [vmem:[%s6242_s3 + $0x8] sm:$0xff] }
 0x410   : > { %986 = vmatpush.bf16.msra.mxu2 %v977_v12  ;;  %v4969_v12 = vld [vmem:[%s6242_s3] sm:$0xff] }
 0x413   : > { %4087 = vmatmul.msk.bf16.vlgmr.msra.gmra.mxu2 %vm829_vm2, %v970_v16 }
 0x414   : > { %1112 = vmatpush.bf16.msrb.mxu2 %v1103_v13 }
 0x420   : > { %1160 = vrot.lane.b32.xlu2 %v5869_v24, %s5613_s19 }
 0x421   : > { %1286 = vrot.lane.b32.xlu1 %v5869_v24, %s5615_s28 }
 0x423   : > { %4091 = vmatmul.msk.bf16.vlgmr.msrb.gmra.mxu2 %vm829_vm2, %v1096_v19 }
 0x439   : > { %v1156_v22 = vpop.xlane.xlu0 %1155 }
 0x449   : > { %1218 = vadd.xlane.f32.xlu2 %v1217_v25  ;;  %v4244_v25 = vld [vmem:[#allocation6 + $0xe0] sm:$0xf] }
 0x44c   : > { %v1224_v26 = vpop.permute.xlu0 %1223 }
 0x44d   : > { %v1229_v27 = vsel %vm845_vm1, %v1224_v26, 0  ;;  %v5007_v26 = vld [vmem:[#allocation6 + $0xec] sm:$0xf0] }
 0x44e   : > { %1238 = vmatpush.bf16.msra.mxu2 %v1229_v27  ;;  %v5005_v27 = vld [vmem:[#allocation6 + $0xe4] sm:$0xf] }
 0x473   : > { %v901_v28 = vpop.xlane.xlu2 %900 }
 0x474   : > { %5303 = vrcp.f32 %v901_v28  ;;  %v4245_v28 = vor.u32 %v5007_v26, %v4244_v25  ;;  %v4992_v25 = vld [vmem:[#allocation6 + $0x74] sm:$0xf0] }
 0x476   : > { %1637 = vmatpush.bf16.msrb.mxu2 %v4245_v28  ;;  %v4990_v28 = vld [vmem:[#allocation6 + $0x6c] sm:$0xf] }
 0x47a   : > { %v5304_v30 = vpop.eup %5303 }
 0x47b   : > { %v903_v31 = vmul.f32 %v5304_v30, %v5292_v1  ;;  %v1030_v24 = vpop.xlane.xlu2 %1029  ;;  %v1282_v35 = vpop.xlane.xlu1 %1281  ;;  %v4246_v30 = vld [vmem:[#allocation6 + $0xf0] sm:$0xf0] }
 0x47c   : > { %5305 = vrcp.f32 %v1030_v24  ;;  %v5008_v24 = vld [vmem:[#allocation6 + $0xf4] sm:$0xf0] }
 0x47d   : > { %v904_v32 = vpack.c.bf16 %v903_v31, %v903_v31  ;;  %5307 = vrcp.f32 %v1156_v22  ;;  %v4252_v31 = vld [vmem:[#allocation6 + $0xe8] sm:$0xf] }
 0x47e   : > { %5309 = vrcp.f32 %v1282_v35 }
 0x47f   : > { %4085 = vmatmul.msk.bf16.vlgmr.msrb.gmra.mxu0 %vm829_vm2, %v904_v32  ;;  %v4249_v32 = vor.u32 %v5005_v27, %v4246_v30  ;;  %v4190_v30 = vld [vmem:[#allocation6 + $0x78] sm:$0xf0] }
 0x481   : > { %1650 = vmatpush.bf16.msra.mxu3 %v4249_v32  ;;  %v4987_v32 = vld [vmem:[#allocation6 + $0x4c] sm:$0xf0] }
 0x482   : > { %v5306_v34 = vpop.eup %5305 }
 0x483   : > { %v1161_v14 = vpop.permute.xlu2 %1160  ;;  %v1032_v29 = vmul.f32 %v5306_v34, %v5294_v4  ;;  %v5308_v39 = vpop.eup %5307  ;;  %v4976_v4 = vld [vmem:[%s6242_s3 + $0x38] sm:$0xff]  ;;  %v4254_v34 = vld [vmem:[#allocation6 + $0xf8] sm:$0xf0] }
 0x484   : > { %v1166_v33 = vsel %vm845_vm1, %v1161_v14, 0  ;;  %v1158_v41 = vmul.f32 %v5308_v39, %v5889_v54  ;;  %v5310_v44 = vpop.eup %5309  ;;  %1383 = vmatpush.bf16.msrb.mxu1 %v4976_v4  ;;  %v4253_v14 = vor.u32 %v5008_v24, %v4252_v31  ;;  %v4193_v31 = vor.u32 %v4990_v28, %v4190_v30  ;;  %v4164_v24 = vld [vmem:[#allocation6 + $0x40] sm:$0xf]  ;;  %v5015_v28 = vld [vmem:[#allocation8 + $0x30] sm:$0xff] }
 0x485   : > { %1175 = vmatpush.bf16.msrb.mxu0 %v1166_v33  ;;  %v1033_v36 = vpack.c.bf16 %v1032_v29, %v1032_v29  ;;  %v1284_v46 = vmul.f32 %v5310_v44, %v5896_v5  ;;  %v4975_v5 = vld [vmem:[%s6242_s3 + $0x30] sm:$0xff]  ;;  %v4228_v44 = vld [vmem:[#allocation6 + $0xc0] sm:$0xf]  ;;  %v5023_v30 = vld [vmem:[#allocation8 + $0x70] sm:$0xff] }
 0x486   : > { %v1159_v42 = vpack.c.bf16 %v1158_v41, %v1158_v41  ;;  %v5006_v33 = vld [vmem:[#allocation6 + $0xec] sm:$0xf] }
 0x487   : > { %v1285_v47 = vpack.c.bf16 %v1284_v46, %v1284_v46  ;;  %v4257_v29 = vor.u32 %v5006_v33, %v4254_v34  ;;  %v5001_v46 = vld [vmem:[#allocation6 + $0xc4] sm:$0xf]  ;;  %v4165_v33 = vor.u32 %v4987_v32, %v4164_v24  ;;  %v4166_v34 = vld [vmem:[#allocation6 + $0x50] sm:$0xf0]  ;;  %v5014_v32 = vld [vmem:[#allocation8 + $0x28] sm:$0xff] }
 0x488   : > { %1384 = vmatpush.bf16.msrb.mxu1 %v4975_v5  ;;  %v4196_v5 = vld [vmem:[#allocation6 + $0x80] sm:$0xf] }
 0x489   : > { %v5037_v24 = vld [vmem:[#allocation8 + $0xe0] sm:$0xff] }
 0x48c   : > { %1385 = vmatpush.bf16.msrb.mxu1 %v4974_v6  ;;  %v4995_v6 = vld [vmem:[#allocation6 + $0x8c] sm:$0xf0] }
 0x48f   : > { %4089 = vmatmul.msk.bf16.vlgmr.msra.gmra.mxu0 %vm829_vm2, %v1033_v36 }
 0x490   : > { %1386 = vmatpush.bf16.msrb.mxu1 %v4973_v7  ;;  %v4993_v7 = vld [vmem:[#allocation6 + $0x84] sm:$0xf] }
 0x493   : > { %v1287_v37 = vpop.permute.xlu1 %1286 }
 0x494   : > { %v1292_v38 = vsel %vm845_vm1, %v1287_v37, 0  ;;  %1387 = vmatpush.bf16.msrb.mxu1 %v4972_v8  ;;  %v4197_v8 = vor.u32 %v4995_v6, %v4196_v5  ;;  %v5040_v5 = vld [vmem:[#allocation8 + $0xf8] sm:$0xff] }
 0x495   : > { %1301 = vmatpush.bf16.msra.mxu0 %v1292_v38 }
 0x496   : > { %v988_v40 = vpop.f32.mrf.mxu2 }
 0x497   : > { %993 = vrot.lane.b32.xlu2 %v988_v40, %s5614_s20 }
 0x498   : > { %1388 = vmatpush.bf16.msrb.mxu1 %v4971_v10  ;;  %v4204_v10 = vld [vmem:[#allocation6 + $0x88] sm:$0xf] }
 0x49c   : > { %1389 = vmatpush.bf16.msrb.mxu1 %v4970_v11  ;;  %v4996_v11 = vld [vmem:[#allocation6 + $0x94] sm:$0xf0] }
 0x49e   : > { %v990_v43 = vpop.f32.mrf.mxu2 }
 0x49f   : > { %4093 = vmatmul.msk.bf16.vlgmr.msrb.gmra.mxu0 %vm829_vm2, %v1159_v42 }
 0x4a0   : > { %1390 = vmatpush.bf16.msrb.mxu1 %v4969_v12  ;;  %1663 = vmatpush.bf16.msrb.mxu0 %v4253_v14  ;;  %v4985_v14 = vld [vmem:[#allocation6 + $0x44] sm:$0xf] }
 0x4a4   : > { %1676 = vmatpush.bf16.msra.mxu1 %v4257_v29  ;;  %v4172_v29 = vld [vmem:[#allocation6 + $0x48] sm:$0xf] }
 0x4a6   : > { %v1114_v45 = vpop.f32.mrf.mxu2 }
 0x4a7   : > { %1119 = vrot.lane.b32.xlu0 %v1114_v45, %s5612_s18  ;;  %v5003_v45 = vld [vmem:[#allocation6 + $0xcc] sm:$0xf0] }
 0x4ae   : > { %v1116_v48 = vpop.f32.mrf.mxu2 }
 0x4af   : > { %4097 = vmatmul.msk.bf16.vlgmr.msra.gmra.mxu0 %vm829_vm2, %v1285_v47  ;;  %v4229_v47 = vor.u32 %v5003_v45, %v4228_v44  ;;  %v4230_v48 = vld [vmem:[#allocation6 + $0xd0] sm:$0xf0]  ;;  %v4981_v44 = vld [vmem:[#allocation6 + $0x24] sm:$0xf] }
 0x4b1   : > { %1638 = vmatpush.bf16.msrb.mxu2 %v4229_v47  ;;  %v4156_v47 = vld [vmem:[#allocation6 + $0x28] sm:$0xf] }
 0x4bc   : > { %v1219_v49 = vpop.xlane.xlu2 %1218 }
 0x4bd   : > { %5311 = vrcp.f32 %v1219_v49  ;;  %v4236_v49 = vld [vmem:[#allocation6 + $0xc8] sm:$0xf] }
 0x4c3   : > { %v5312_v50 = vpop.eup %5311 }
 0x4c4   : > { %v1221_v51 = vmul.f32 %v5312_v50, %v5302_v23  ;;  %v5616_v23 = vmov 128.0   ;;  %v5004_v50 = vld [vmem:[#allocation6 + $0xd4] sm:$0xf0] }
 0x4c5   : > { %5313 = vrcp.f32 %v5616_v23  ;;  %v4188_v23 = vld [vmem:[#allocation6 + $0x68] sm:$0xf] }
 0x4c6   : > { %v1222_v52 = vpack.c.bf16 %v1221_v51, %v1221_v51  ;;  %v4233_v51 = vor.u32 %v5001_v46, %v4230_v48  ;;  %v4189_v27 = vor.u32 %v4992_v25, %v4188_v23  ;;  %v4150_v46 = vld [vmem:[#allocation6 + $0x30] sm:$0xf0]  ;;  %v4984_v48 = vld [vmem:[#allocation6 + $0x34] sm:$0xf0] }
 0x4c7   : > { %v5016_v25 = vld [vmem:[#allocation8 + $0x38] sm:$0xff] }
 0x4c8   : > { %4095 = vmatmul.msk.bf16.vlgmr.msra.gmra.mxu2 %vm829_vm2, %v1222_v52  ;;  %v4237_v52 = vor.u32 %v5004_v50, %v4236_v49  ;;  %1651 = vmatpush.bf16.msra.mxu3 %v4233_v51  ;;  %v4153_v49 = vor.u32 %v4981_v44, %v4150_v46  ;;  %v4157_v50 = vor.u32 %v4984_v48, %v4156_v47  ;;  %v4982_v51 = vld [vmem:[#allocation6 + $0x2c] sm:$0xf]  ;;  %v5019_v44 = vld [vmem:[#allocation8 + $0x50] sm:$0xff]  ;;  %v5033_v46 = vld [vmem:[#allocation8 + $0xc0] sm:$0xff] }
 0x4c9   : > { %v5010_v47 = vld [vmem:[#allocation8 + $0x8] sm:$0xff] }
 0x4ca   : > { %1664 = vmatpush.bf16.msrb.mxu0 %v4237_v52  ;;  %v4158_v52 = vld [vmem:[#allocation6 + $0x38] sm:$0xf0]  ;;  %v5018_v48 = vld [vmem:[#allocation8 + $0x48] sm:$0xff] }
 0x4cb   : > { %v5314_v35 = vpop.eup %5313 }
 0x4cc   : > { %vm1406_vm10 = vweird.f32 %v5314_v35 }
 0x4f1   : > { %v994_v2 = vpop.permute.xlu2 %993 }
 0x4fc   : > { %v925_v53 = vpop.f32.mrf.mxu0 }
 0x4fd   : > { %930 = vrot.lane.b32.xlu0 %v925_v53, %s5615_s28  ;;  %v5002_v53 = vld [vmem:[#allocation6 + $0xcc] sm:$0xf] }
 0x504   : > { %v927_v54 = vpop.f32.mrf.mxu0 }
 0x505   : > { %v4238_v54 = vld [vmem:[#allocation6 + $0xd8] sm:$0xf0] }
 0x50c   : > { %v1051_v55 = vpop.f32.mrf.mxu0 }
 0x50d   : > { %1056 = vrot.lane.b32.xlu1 %v1051_v55, %s5613_s19  ;;  %v4241_v55 = vor.u32 %v5002_v53, %v4238_v54  ;;  %v4132_v53 = vld [vmem:[#allocation6] sm:$0xf]  ;;  %v4161_v54 = vor.u32 %v4982_v51, %v4158_v52 }
 0x50e   : > { %v5017_v51 = vld [vmem:[#allocation8 + $0x40] sm:$0xff] }
 0x50f   : > { %1677 = vmatpush.bf16.msra.mxu1 %v4241_v55  ;;  %v4979_v55 = vld [vmem:[#allocation6 + $0xc] sm:$0xf0] }
 0x514   : > { %v1053_v56 = vpop.f32.mrf.mxu0 }
 0x515   : > { %v4212_v56 = vld [vmem:[#allocation6 + $0xa0] sm:$0xf] }
 0x519   : > { %v1120_v0 = vpop.permute.xlu0 %1119 }
 0x51c   : > { %v1177_v57 = vpop.f32.mrf.mxu0 }
 0x51d   : > { %1182 = vrot.lane.b32.xlu1 %v1177_v57, %s5611_s17  ;;  %v4999_v57 = vld [vmem:[#allocation6 + $0xac] sm:$0xf0] }
 0x524   : > { %v1179_v58 = vpop.f32.mrf.mxu0 }
 0x525   : > { %v4997_v58 = vld [vmem:[#allocation6 + $0xa4] sm:$0xf] }
 0x52c   : > { %v1303_v59 = vpop.f32.mrf.mxu0 }
 0x52d   : > { %1308 = vrot.lane.b32.xlu1 %v1303_v59, %s5610_s0  ;;  %v4213_v59 = vor.u32 %v4999_v57, %v4212_v56  ;;  %v4977_v56 = vld [vmem:[#allocation6 + $0x4] sm:$0xf]  ;;  %v4134_v57 = vld [vmem:[#allocation6 + $0x10] sm:$0xf0] }
 0x52f   : > { %1639 = vmatpush.bf16.msrb.mxu2 %v4213_v59  ;;  %v4137_v59 = vor.u32 %v4977_v56, %v4134_v57 }
 0x533   : > { %1640 = vmatpush.bf16.msrb.mxu2 %v4197_v8  ;;  %v5039_v8 = vld [vmem:[#allocation8 + $0xf0] sm:$0xff] }
 0x534   : > { %v1305_v60 = vpop.f32.mrf.mxu0 }
 0x535   : > { %v4214_v60 = vld [vmem:[#allocation6 + $0xb0] sm:$0xf0] }
 0x54b   : > { %v1240_v61 = vpop.f32.mrf.mxu2 }
 0x54c   : > { %1245 = vrot.lane.b32.xlu0 %v1240_v61, %s5609_s30  ;;  %v4220_v61 = vld [vmem:[#allocation6 + $0xa8] sm:$0xf] }
 0x553   : > { %v1242_v63 = vpop.f32.mrf.mxu2 }
 0x554   : > { %v5000_v63 = vld [vmem:[#allocation6 + $0xb4] sm:$0xf0] }
 0x56f   : > { %v931_v1 = vpop.permute.xlu0 %930 }
 0x570   : > { %934 = vst.msk [vmem:[#allocation2] sm:$0xff] %vm933_vm3, %v931_v1  ;;  %v4221_v1 = vor.u32 %v5000_v63, %v4220_v61  ;;  %v4980_v61 = vld [vmem:[#allocation6 + $0x14] sm:$0xf0]  ;;  %v4978_v63 = vld [vmem:[#allocation6 + $0xc] sm:$0xf] }
 0x571   : > { %997 = vst.msk [vmem:[#allocation2] sm:$0xff] %vm996_vm4, %v994_v2  ;;  %v4998_v2 = vld [vmem:[#allocation6 + $0xac] sm:$0xf] }
 0x572   : > { %1665 = vmatpush.bf16.msrb.mxu0 %v4221_v1  ;;  %v4142_v1 = vld [vmem:[#allocation6 + $0x18] sm:$0xf0] }
 0x57f   : > { %v1057_v3 = vpop.permute.xlu1 %1056 }
 0x580   : > { %1060 = vst.msk [vmem:[#allocation2] sm:$0xff] %vm1059_vm5, %v1057_v3  ;;  %v4222_v3 = vld [vmem:[#allocation6 + $0xb8] sm:$0xf0] }
 0x581   : > { %1123 = vst.msk [vmem:[#allocation2] sm:$0xff] %vm1122_vm6, %v1120_v0  ;;  %v4217_v0 = vor.u32 %v4997_v58, %v4214_v60  ;;  %v4225_v4 = vor.u32 %v4998_v2, %v4222_v3  ;;  %v4133_v58 = vor.u32 %v4979_v55, %v4132_v53  ;;  %v4140_v60 = vld [vmem:[#allocation6 + $0x8] sm:$0xf]  ;;  %v4145_v2 = vor.u32 %v4978_v63, %v4142_v1 }
 0x583   : > { %1652 = vmatpush.bf16.msra.mxu3 %v4217_v0  ;;  %1678 = vmatpush.bf16.msra.mxu1 %v4225_v4  ;;  %v4141_v0 = vor.u32 %v4980_v61, %v4140_v60  ;;  %v5032_v4 = vld [vmem:[#allocation8 + $0xb8] sm:$0xff] }
 0x58f   : > { %v1183_v9 = vpop.permute.xlu1 %1182 }
 0x590   : > { %1186 = vst.msk [vmem:[#allocation2] sm:$0xff] %vm1185_vm7, %v1183_v9  ;;  %v4198_v9 = vld [vmem:[#allocation6 + $0x90] sm:$0xf0] }
 0x591   : > { %v4201_v12 = vor.u32 %v4993_v7, %v4198_v9  ;;  %v5031_v7 = vld [vmem:[#allocation8 + $0xb0] sm:$0xff] }
 0x593   : > { %1653 = vmatpush.bf16.msra.mxu3 %v4201_v12 }
 0x59f   : > { %v1309_v15 = vpop.permute.xlu1 %1308 }
 0x5be   : > { %v1246_v13 = vpop.permute.xlu0 %1245 }
 0x5bf   : > { %1249 = vst.msk [vmem:[#allocation2] sm:$0xff] %vm1248_vm8, %v1246_v13  ;;  %v4205_v13 = vor.u32 %v4996_v11, %v4204_v10 }
 0x5c0   : > { %1312 = vst.msk [vmem:[#allocation2] sm:$0xff] %vm1311_vm9, %v1309_v15  ;;  %v4994_v15 = vld [vmem:[#allocation6 + $0x8c] sm:$0xf] }
 0x5c1   : > { %1666 = vmatpush.bf16.msrb.mxu0 %v4205_v13 }
 0x5c5   : > { %1667 = vmatpush.bf16.msrb.mxu0 %v4189_v27  ;;  %v5030_v27 = vld [vmem:[#allocation8 + $0xa8] sm:$0xff] }
 0x5c7   : > { %v1313_v16 = vld [vmem:[#allocation2] sm:$0xff] }
 0x5c8   : > { %v1330_v17 = vpack.c.bf16 %v1313_v16, %v1313_v16  ;;  %v4206_v16 = vld [vmem:[#allocation6 + $0x98] sm:$0xf0] }
 0x5ca   : > { %1391 = vmatmul.bf16.vlgmr.msrb.gmra.mxu1 %v1330_v17  ;;  %v4209_v17 = vor.u32 %v4994_v15, %v4206_v16 }
 0x5cc   : > { %1679 = vmatpush.bf16.msra.mxu1 %v4209_v17  ;;  %v5270_v17 = vld [vmem:[%s6244_s5] ss:$0 sm:$0xff] }
 0x5d0   : > { %1680 = vmatpush.bf16.msra.mxu1 %v4193_v31  ;;  %v5029_v31 = vld [vmem:[#allocation8 + $0xa0] sm:$0xff] }
 0x647   : > { %v1392_v19 = vpop.f32.mrf.mxu1 }
 0x648   : > { %v1393_v20 = vadd.f32 %v5269_v18, %v1392_v19  ;;  %v4180_v18 = vld [vmem:[#allocation6 + $0x60] sm:$0xf]  ;;  %v4991_v19 = vld [vmem:[#allocation6 + $0x6c] sm:$0xf0] }
 0x64a   : > { %v1396_v21 = vadd.f32 %v1393_v20, %v5807_v62  ;;  %v1402_v62 = vmul.f32 128.0, %v5314_v35  ;;  %v4989_v20 = vld [vmem:[#allocation6 + $0x64] sm:$0xf] }
 0x64c   : > { %1399 = vadd.xlane.f32.xlu0 %v1396_v21  ;;  %v1403_v36 = vsub.f32 1.0, %v1402_v62  ;;  %v4169_v62 = vor.u32 %v4985_v14, %v4166_v34  ;;  %v5022_v14 = vld [vmem:[#allocation8 + $0x68] sm:$0xff]  ;;  %v5036_v34 = vld [vmem:[#allocation8 + $0xd8] sm:$0xff] }
 0x64e   : > { %v1404_v37 = vmul.f32 %v5314_v35, %v1403_v36 }
 0x64f   : > { %v1394_v22 = vpop.f32.mrf.mxu1 }
 0x650   : > { %v1405_v38 = vadd.f32 %v5314_v35, %v1404_v37  ;;  %v4182_v22 = vld [vmem:[#allocation6 + $0x70] sm:$0xf0]  ;;  %v4986_v37 = vld [vmem:[#allocation6 + $0x4c] sm:$0xf] }
 0x651   : > { %v4185_v26 = vor.u32 %v4989_v20, %v4182_v22  ;;  %v5271_v20 = vld [vmem:[%s6245_s6] ss:$0 sm:$0xff] }
 0x652   : > { %v5964_v39 = vsel %vm1406_vm10, %v5314_v35, %v1405_v38  ;;  %v4988_v35 = vld [vmem:[#allocation6 + $0x54] sm:$0xf0]  ;;  %v4174_v38 = vld [vmem:[#allocation6 + $0x58] sm:$0xf0] }
 0x653   : > { %1654 = vmatpush.bf16.msra.mxu3 %v4185_v26  ;;  %v4173_v36 = vor.u32 %v4988_v35, %v4172_v29  ;;  %v5024_v26 = vld [vmem:[#allocation8 + $0x78] sm:$0xff]  ;;  %v5013_v29 = vld [vmem:[#allocation8 + $0x20] sm:$0xff] }
 0x654   : > { %v5021_v35 = vld [vmem:[#allocation8 + $0x60] sm:$0xff] }
 0x655   : > { %1668 = vmatpush.bf16.msrb.mxu0 %v4173_v36  ;;  %v5035_v36 = vld [vmem:[#allocation8 + $0xd0] sm:$0xff] }
 0x657   : > { %1655 = vmatpush.bf16.msra.mxu3 %v4169_v62  ;;  %v5027_v62 = vld [vmem:[#allocation8 + $0x90] sm:$0xff] }
 0x659   : > { %1669 = vmatpush.bf16.msrb.mxu0 %v4157_v50  ;;  %v5009_v50 = vld [vmem:[#allocation8] sm:$0xff] }
 0x65b   : > { %1656 = vmatpush.bf16.msra.mxu3 %v4153_v49  ;;  %v1467_v49 = vld [vmem:[%s6247_s8] sm:$0xf] }
 0x65c   : > { %v1471_v52 = vperm.slane %v1467_v49, 2  ;;  %v1472_v53 = vperm.slane %v1467_v49, 3 }
 0x65d   : > { %1670 = vmatpush.bf16.msrb.mxu0 %v4141_v0 }
 0x65f   : > { %1657 = vmatpush.bf16.msra.mxu3 %v4137_v59  ;;  %v1470_v59 = vperm.slane %v1467_v49, 1 }
 0x661   : > { %2015 = vmatpush.bf16.msra.mxu0 %v5032_v4 }
 0x663   : > { %2002 = vmatpush.bf16.msrb.mxu3 %v5024_v26 }
 0x665   : > { %2016 = vmatpush.bf16.msra.mxu0 %v5031_v7 }
 0x667   : > { %2003 = vmatpush.bf16.msrb.mxu3 %v5023_v30 }
 0x669   : > { %2017 = vmatpush.bf16.msra.mxu0 %v5030_v27 }
 0x66b   : > { %2004 = vmatpush.bf16.msrb.mxu3 %v5022_v14 }
 0x66d   : > { %2018 = vmatpush.bf16.msra.mxu0 %v5029_v31 }
 0x66f   : > { %2005 = vmatpush.bf16.msrb.mxu3 %v5021_v35 }
 0x6bf   : > { %v1400_v40 = vpop.xlane.xlu0 %1399 }
 0x6c0   : > { %v1408_v41 = vmul.f32 %v5964_v39, %v1400_v40  ;;  %v4177_v40 = vor.u32 %v4986_v37, %v4174_v38  ;;  %v5012_v37 = vld [vmem:[#allocation8 + $0x18] sm:$0xff] }
 0x6c1   : > { %v5020_v38 = vld [vmem:[#allocation8 + $0x58] sm:$0xff] }
 0x6c2   : > { %v5967_v42 = vsub.f32 %v1396_v21, %v1408_v41  ;;  %v4181_v21 = vor.u32 %v4991_v19, %v4180_v18  ;;  %v4148_v41 = vld [vmem:[#allocation6 + $0x20] sm:$0xf]  ;;  %1681 = vmatpush.bf16.msra.mxu1 %v4177_v40  ;;  %v5026_v40 = vld [vmem:[#allocation8 + $0x88] sm:$0xff]  ;;  %2006 = vmatpush.bf16.msrb.mxu3 %v5020_v38 }
 0x6c4   : > { %v1410_v43 = vmul.f32 %v5967_v42, %v5967_v42  ;;  %1641 = vmatpush.bf16.msrb.mxu2 %v4181_v21 }
 0x6c6   : > { %1411 = vadd.xlane.f32.xlu2 %v1410_v43  ;;  %v4983_v43 = vld [vmem:[#allocation6 + $0x2c] sm:$0xf0]  ;;  %1682 = vmatpush.bf16.msra.mxu1 %v4161_v54 }
 0x6c7   : > { %v4149_v45 = vor.u32 %v4983_v43, %v4148_v41  ;;  %v5034_v41 = vld [vmem:[#allocation8 + $0xc8] sm:$0xff]  ;;  %v5011_v43 = vld [vmem:[#allocation8 + $0x10] sm:$0xff]  ;;  %2007 = vmatpush.bf16.msrb.mxu3 %v5019_v44 }
 0x6c8   : > { %1642 = vmatpush.bf16.msrb.mxu2 %v4165_v33  ;;  %v5028_v33 = vld [vmem:[#allocation8 + $0x98] sm:$0xff] }
 0x6c9   : > { %2019 = vmatpush.bf16.msra.mxu0 %v5028_v33 }
 0x6ca   : > { %1683 = vmatpush.bf16.msra.mxu1 %v4145_v2 }
 0x6cb   : > { %2008 = vmatpush.bf16.msrb.mxu3 %v5018_v48 }
 0x6cc   : > { %1643 = vmatpush.bf16.msrb.mxu2 %v4149_v45  ;;  %v5025_v45 = vld [vmem:[#allocation8 + $0x80] sm:$0xff] }
 0x6cd   : > { %2020 = vmatpush.bf16.msra.mxu0 %v5027_v62 }
 0x6ce   : > { %2028 = vmatpush.bf16.msrb.mxu1 %v5040_v5 }
 0x6cf   : > { %2009 = vmatpush.bf16.msrb.mxu3 %v5017_v51 }
 0x6d0   : > { %1644 = vmatpush.bf16.msrb.mxu2 %v4133_v58  ;;  %v1469_v58 = vperm.slane %v1467_v49, 0  ;;  %v5272_v49 = vld [vmem:[%s6249_s10] ss:$0 sm:$0xff] }
 0x6d1   : > { %2021 = vmatpush.bf16.msra.mxu0 %v5026_v40 }
 0x6d2   : > { %2029 = vmatpush.bf16.msrb.mxu1 %v5039_v8 }
 0x6d4   : > { %1989 = vmatpush.bf16.msra.mxu2 %v5016_v25 }
 0x6d5   : > { %2022 = vmatpush.bf16.msra.mxu0 %v5025_v45 }
 0x6d8   : > { %1990 = vmatpush.bf16.msra.mxu2 %v5015_v28 }
 0x6dc   : > { %1991 = vmatpush.bf16.msra.mxu2 %v5014_v32 }
 0x6e0   : > { %1992 = vmatpush.bf16.msra.mxu2 %v5013_v29 }
 0x6e4   : > { %1993 = vmatpush.bf16.msra.mxu2 %v5012_v37 }
 0x6e8   : > { %1994 = vmatpush.bf16.msra.mxu2 %v5011_v43 }
 0x6ec   : > { %1995 = vmatpush.bf16.msra.mxu2 %v5010_v47 }
 0x6f0   : > { %1996 = vmatpush.bf16.msra.mxu2 %v5009_v50 }
 0x739   : > { %v1412_v3 = vpop.xlane.xlu2 %1411 }
 0x73a   : > { %v1413_v6 = vmul.f32 %v1412_v3, %v5964_v39 }
 0x73c   : > { %v1414_v9 = vadd.f32 1e-05, %v1413_v6 }
 0x73e   : > { %5315 = vrsqrt.f32 %v1414_v9  ;;  %vm1421_vm12 = vweird.f32 %v1414_v9 }
 0x744   : > { %v5316_v10 = vpop.eup %5315 }
 0x745   : > { %v1416_v11 = vmul.f32 %v5316_v10, %v1414_v9  ;;  %vm1422_vm11 = vweird.f32 %v5316_v10 }
 0x746   : > { %vm1423_vm13 = vmor %vm1421_vm12, %vm1422_vm11 }
 0x747   : > { %v1417_v12 = vmul.f32 %v5316_v10, %v1416_v11 }
 0x749   : > { %v1418_v13 = vmul.f32 0.5, %v1417_v12 }
 0x74b   : > { %v1419_v15 = vsub.f32 1.5, %v1418_v13 }
 0x74d   : > { %v1420_v16 = vmul.f32 %v5316_v10, %v1419_v15 }
 0x74f   : > { %v1424_v18 = vsel %vm1423_vm13, %v5316_v10, %v1420_v16 }
 0x750   : > { %v1425_v19 = vmul.f32 %v1424_v18, %v5967_v42  ;;  %v5038_v42 = vld [vmem:[#allocation8 + $0xe8] sm:$0xff] }
 0x751   : > { %2030 = vmatpush.bf16.msrb.mxu1 %v5038_v42 }
 0x752   : > { %v1429_v21 = vmul.f32 %v5270_v17, %v1425_v19 }
 0x754   : > { %v5979_v22 = vadd.f32 %v5271_v20, %v1429_v21 }
 0x755   : > { %2031 = vmatpush.bf16.msrb.mxu1 %v5037_v24 }
 0x756   : > { %v1466_v23 = vpack.c.bf16 %v5979_v22, %v5979_v22 }
 0x758   : > { %1645 = vmatmul.bf16.vlgmr.msrb.gmra.mxu2 %v1466_v23  ;;  %1658 = vmatmul.bf16.vlgmr.msra.gmra.mxu3 %v1466_v23 }
 0x759   : > { %1671 = vmatmul.bf16.vlgmr.msrb.gmra.mxu0 %v1466_v23  ;;  %1684 = vmatmul.bf16.vlgmr.msra.gmra.mxu1 %v1466_v23 }
 0x75a   : > { %2032 = vmatpush.bf16.msrb.mxu1 %v5036_v34 }
 0x75e   : > { %2033 = vmatpush.bf16.msrb.mxu1 %v5035_v36 }
 0x762   : > { %2034 = vmatpush.bf16.msrb.mxu1 %v5034_v41 }
 0x766   : > { %2035 = vmatpush.bf16.msrb.mxu1 %v5033_v46 }
 0x7d6   : > { %v1672_v54 = vpop.f32.mrf.mxu0  ;;  %v1685_v55 = vpop.f32.mrf.mxu1 }
 0x7d7   : > { %v1673_v56 = vadd.f32 %v1672_v54, %v1471_v52  ;;  %v1686_v57 = vadd.f32 %v1685_v55, %v1472_v53 }
 0x7d9   : > { %v1695_v60 = vmul.f32 0.044715, %v1673_v56  ;;  %v1696_v61 = vmul.f32 0.044715, %v1686_v57  ;;  %v1691_v30 = vmul.f32 0.5, %v1673_v56  ;;  %v1692_v24 = vmul.f32 0.5, %v1686_v57 }
 0x7db   : > { %v1699_v63 = vmul.f32 %v1695_v60, %v1673_v56  ;;  %v1700_v0 = vmul.f32 %v1696_v61, %v1686_v57  ;;  %v1646_v1 = vpop.f32.mrf.mxu2  ;;  %v1659_v2 = vpop.f32.mrf.mxu3  ;;  %v4473_v60 = vld [vmem:[#allocation3 + $0x168] sm:$0xf]  ;;  %v5063_v61 = vld [vmem:[#allocation3 + $0x170] sm:$0xf0] }
 0x7dc   : > { %v1647_v3 = vadd.f32 %v1646_v1, %v1469_v58  ;;  %v1660_v4 = vadd.f32 %v1659_v2, %v1470_v59  ;;  %v4475_v1 = vld [vmem:[#allocation3 + $0x174] sm:$0xf0]  ;;  %v4481_v2 = vld [vmem:[#allocation3 + $0x170] sm:$0xf] }
 0x7dd   : > { %v1703_v5 = vmul.f32 %v1699_v63, %v1673_v56  ;;  %v1704_v6 = vmul.f32 %v1700_v0, %v1686_v57  ;;  %v5062_v63 = vld [vmem:[#allocation3 + $0x16c] sm:$0xf]  ;;  %v4474_v0 = vor.u32 %v5063_v61, %v4473_v60  ;;  %v4409_v60 = vld [vmem:[#allocation3 + $0xe0] sm:$0xf] }
 0x7de   : > { %v1693_v7 = vmul.f32 0.044715, %v1647_v3  ;;  %v1694_v8 = vmul.f32 0.044715, %v1660_v4  ;;  %v1674_v9 = vpop.f32.mrf.mxu0  ;;  %v1687_v10 = vpop.f32.mrf.mxu1  ;;  %v1689_v36 = vmul.f32 0.5, %v1647_v3  ;;  %v1690_v38 = vmul.f32 0.5, %v1660_v4 }
 0x7df   : > { %v1707_v11 = vadd.f32 %v1703_v5, %v1673_v56  ;;  %v1708_v12 = vadd.f32 %v1704_v6, %v1686_v57  ;;  %2243 = vmatpush.bf16.msrb.mxu2 %v4474_v0  ;;  %v4461_v9 = vld [vmem:[#allocation3 + $0x150] sm:$0xf]  ;;  %v5060_v10 = vld [vmem:[#allocation3 + $0x158] sm:$0xf0]  ;;  %v5046_v61 = vld [vmem:[#allocation3 + $0xe8] sm:$0xf0] }
 0x7e0   : > { %v1697_v13 = vmul.f32 %v1693_v7, %v1647_v3  ;;  %v1698_v15 = vmul.f32 %v1694_v8, %v1660_v4  ;;  %v4410_v0 = vor.u32 %v5046_v61, %v4409_v60 }
 0x7e1   : > { %v1711_v16 = vmul.f32 0.7978846, %v1707_v11  ;;  %v1712_v17 = vmul.f32 0.7978846, %v1708_v12  ;;  %v5059_v11 = vld [vmem:[#allocation3 + $0x154] sm:$0xf]  ;;  %v4462_v12 = vor.u32 %v5060_v10, %v4461_v9 }
 0x7e2   : > { %v1701_v18 = vmul.f32 %v1697_v13, %v1647_v3  ;;  %v1702_v19 = vmul.f32 %v1698_v15, %v1660_v4  ;;  %v4463_v13 = vld [vmem:[#allocation3 + $0x15c] sm:$0xf0]  ;;  %v4469_v15 = vld [vmem:[#allocation3 + $0x158] sm:$0xf] }
 0x7e3   : > { %v1648_v20 = vpop.f32.mrf.mxu2  ;;  %v1661_v21 = vpop.f32.mrf.mxu3  ;;  %5317 = vtanh.f32 %v1711_v16  ;;  %v5061_v16 = vld [vmem:[#allocation3 + $0x160] sm:$0xf0]  ;;  %2244 = vmatpush.bf16.msrb.mxu2 %v4462_v12 }
 0x7e4   : > { %5319 = vtanh.f32 %v1712_v17  ;;  %v1705_v23 = vadd.f32 %v1701_v18, %v1647_v3  ;;  %v1706_v25 = vadd.f32 %v1702_v19, %v1660_v4  ;;  %v5064_v3 = vld [vmem:[#allocation3 + $0x178] sm:$0xf0]  ;;  %v4478_v4 = vor.u32 %v5062_v63, %v4475_v1  ;;  %v4449_v19 = vld [vmem:[#allocation3 + $0x138] sm:$0xf]  ;;  %v5057_v20 = vld [vmem:[#allocation3 + $0x140] sm:$0xf0] }
 0x7e5   : > { %v4482_v5 = vor.u32 %v5064_v3, %v4481_v2  ;;  %v4466_v17 = vor.u32 %v5059_v11, %v4463_v13  ;;  %v4470_v18 = vor.u32 %v5061_v16, %v4469_v15  ;;  %v5056_v21 = vld [vmem:[#allocation3 + $0x13c] sm:$0xf]  ;;  %v4389_v1 = vld [vmem:[#allocation3 + $0xc0] sm:$0xf]  ;;  %v5042_v2 = vld [vmem:[#allocation3 + $0xc8] sm:$0xf0] }
 0x7e6   : > { %v1709_v26 = vmul.f32 0.7978846, %v1705_v23  ;;  %v1710_v27 = vmul.f32 0.7978846, %v1706_v25  ;;  %2256 = vmatpush.bf16.msra.mxu3 %v4478_v4  ;;  %v4450_v23 = vor.u32 %v5057_v20, %v4449_v19  ;;  %v4451_v25 = vld [vmem:[#allocation3 + $0x144] sm:$0xf0]  ;;  %v4390_v4 = vor.u32 %v5042_v2, %v4389_v1 }
 0x7e7   : > { %2269 = vmatpush.bf16.msrb.mxu0 %v4482_v5  ;;  %v5041_v3 = vld [vmem:[#allocation3 + $0xc4] sm:$0xf]  ;;  %v4391_v5 = vld [vmem:[#allocation3 + $0xcc] sm:$0xf0]  ;;  %v5273_v20 = vld [vmem:[%s6250_s11] ss:$0 sm:$0xff] }
 0x7e8   : > { %5321 = vtanh.f32 %v1709_v26  ;;  %v4457_v26 = vld [vmem:[#allocation3 + $0x140] sm:$0xf]  ;;  %2245 = vmatpush.bf16.msrb.mxu2 %v4450_v23 }
 0x7e9   : > { %v5318_v42 = vpop.eup %5317  ;;  %5323 = vtanh.f32 %v1710_v27  ;;  %v5058_v27 = vld [vmem:[#allocation3 + $0x148] sm:$0xf0] }
 0x7ea   : > { %v5320_v28 = vpop.eup %5319  ;;  %v1719_v31 = vadd.f32 1.0, %v5318_v42  ;;  %2257 = vmatpush.bf16.msra.mxu3 %v4466_v17  ;;  %v4454_v42 = vor.u32 %v5056_v21, %v4451_v25  ;;  %v5274_v25 = vld [vmem:[%s6290_s7] ss:$0 sm:$0xff] }
 0x7eb   : > { %v1720_v32 = vadd.f32 1.0, %v5320_v28  ;;  %2270 = vmatpush.bf16.msrb.mxu0 %v4470_v18  ;;  %v4458_v28 = vor.u32 %v5058_v27, %v4457_v26 }
 0x7ec   : > { %v1723_v14 = vmul.f32 %v1719_v31, %v1691_v30  ;;  %v4437_v30 = vld [vmem:[#allocation3 + $0x120] sm:$0xf]  ;;  %v5054_v31 = vld [vmem:[#allocation3 + $0x128] sm:$0xf0] }
 0x7ed   : > { %v1724_v33 = vmul.f32 %v1720_v32, %v1692_v24  ;;  %v5053_v24 = vld [vmem:[#allocation3 + $0x124] sm:$0xf]  ;;  %v4438_v32 = vor.u32 %v5054_v31, %v4437_v30 }
 0x7ee   : > { %v5322_v34 = vpop.eup %5321  ;;  %v1791_v29 = vpack.c.bf16 %v1723_v14, %v1723_v14  ;;  %2258 = vmatpush.bf16.msra.mxu3 %v4454_v42  ;;  %v4439_v14 = vld [vmem:[#allocation3 + $0x12c] sm:$0xf0] }
 0x7ef   : > { %v5324_v35 = vpop.eup %5323  ;;  %v1792_v62 = vpack.c.bf16 %v1724_v33, %v1724_v33  ;;  %v1717_v37 = vadd.f32 1.0, %v5322_v34  ;;  %2271 = vmatpush.bf16.msrb.mxu0 %v4458_v28  ;;  %v4445_v33 = vld [vmem:[#allocation3 + $0x128] sm:$0xf]  ;;  %v5055_v34 = vld [vmem:[#allocation3 + $0x130] sm:$0xf0]  ;;  %2246 = vmatpush.bf16.msrb.mxu2 %v4438_v32 }
 0x7f0   : > { %2023 = vmatmul.bf16.vlgmr.msra.gmra.mxu0 %v1791_v29  ;;  %v1718_v40 = vadd.f32 1.0, %v5324_v35  ;;  %v4442_v29 = vor.u32 %v5053_v24, %v4439_v14  ;;  %v4446_v35 = vor.u32 %v5055_v34, %v4445_v33  ;;  %v4386_v28 = vld [vmem:[%s6241_s2 + $0x3] sm:$0x7] }
 0x7f1   : > { %2036 = vmatmul.bf16.vlgmr.msrb.gmra.mxu1 %v1792_v62  ;;  %v1721_v41 = vmul.f32 %v1717_v37, %v1689_v36  ;;  %v4425_v62 = vld [vmem:[#allocation3 + $0x108] sm:$0xf]  ;;  %v5051_v36 = vld [vmem:[#allocation3 + $0x110] sm:$0xf0]  ;;  %v5050_v37 = vld [vmem:[#allocation3 + $0x10c] sm:$0xf] }
 0x7f2   : > { %v1722_v43 = vmul.f32 %v1718_v40, %v1690_v38  ;;  %2259 = vmatpush.bf16.msra.mxu3 %v4442_v29  ;;  %v4426_v38 = vor.u32 %v5051_v36, %v4425_v62  ;;  %v4427_v40 = vld [vmem:[#allocation3 + $0x114] sm:$0xf0]  ;;  %v2111_v30 = vperm.slane %v4386_v28, 2  ;;  %v2109_v24 = vperm.slane %v4386_v28, 0 }
 0x7f3   : > { %v1789_v44 = vpack.c.bf16 %v1721_v41, %v1721_v41  ;;  %2272 = vmatpush.bf16.msrb.mxu0 %v4446_v35  ;;  %v4433_v41 = vld [vmem:[#allocation3 + $0x110] sm:$0xf]  ;;  %v2110_v32 = vperm.slane %v4386_v28, 1 }
 0x7f4   : > { %v1790_v45 = vpack.c.bf16 %v1722_v43, %v1722_v43  ;;  %v5052_v43 = vld [vmem:[#allocation3 + $0x118] sm:$0xf0]  ;;  %2247 = vmatpush.bf16.msrb.mxu2 %v4426_v38 }
 0x7f5   : > { %1997 = vmatmul.bf16.vlgmr.msra.gmra.mxu2 %v1789_v44  ;;  %v4430_v44 = vor.u32 %v5050_v37, %v4427_v40 }
 0x7f6   : > { %2010 = vmatmul.bf16.vlgmr.msrb.gmra.mxu3 %v1790_v45  ;;  %v4434_v45 = vor.u32 %v5052_v43, %v4433_v41 }
 0x7f7   : > { %2260 = vmatpush.bf16.msra.mxu3 %v4430_v44 }
 0x7f8   : > { %2273 = vmatpush.bf16.msrb.mxu0 %v4434_v45 }
 0x86d   : > { %v2024_v46 = vpop.f32.mrf.mxu0 }
 0x86e   : > { %v2037_v47 = vpop.f32.mrf.mxu1 }
 0x875   : > { %v2026_v48 = vpop.f32.mrf.mxu0 }
 0x876   : > { %v2039_v50 = vpop.f32.mrf.mxu1  ;;  %v5047_v48 = vld [vmem:[#allocation3 + $0xf4] sm:$0xf] }
 0x877   : > { %v4415_v50 = vld [vmem:[#allocation3 + $0xfc] sm:$0xf0] }
 0x878   : > { %v1998_v51 = vpop.f32.mrf.mxu2 }
 0x879   : > { %v1999_v52 = vadd.f32 %v5272_v49, %v1998_v51  ;;  %v2011_v53 = vpop.f32.mrf.mxu3  ;;  %v4421_v51 = vld [vmem:[#allocation3 + $0xf8] sm:$0xf] }
 0x87b   : > { %v2012_v54 = vadd.f32 %v2011_v53, %v1999_v52  ;;  %v5049_v52 = vld [vmem:[#allocation3 + $0x100] sm:$0xf0]  ;;  %v4418_v53 = vor.u32 %v5047_v48, %v4415_v50 }
 0x87d   : > { %v2025_v55 = vadd.f32 %v2024_v46, %v2012_v54  ;;  %v4413_v46 = vld [vmem:[#allocation3 + $0xf0] sm:$0xf]  ;;  %v4422_v54 = vor.u32 %v5049_v52, %v4421_v51  ;;  %2261 = vmatpush.bf16.msra.mxu3 %v4418_v53 }
 0x87f   : > { %v2038_v56 = vadd.f32 %v2037_v47, %v2025_v55  ;;  %v5048_v47 = vld [vmem:[#allocation3 + $0xf8] sm:$0xf0]  ;;  %2274 = vmatpush.bf16.msrb.mxu0 %v4422_v54  ;;  %v4401_v55 = vld [vmem:[#allocation3 + $0xd8] sm:$0xf] }
 0x880   : > { %v2000_v57 = vpop.f32.mrf.mxu2  ;;  %v4414_v49 = vor.u32 %v5048_v47, %v4413_v46 }
 0x881   : > { %v2013_v58 = vpop.f32.mrf.mxu3  ;;  %v2041_v59 = vadd.f32 %v2038_v56, %v5979_v22  ;;  %v5045_v56 = vld [vmem:[#allocation3 + $0xe0] sm:$0xf0]  ;;  %v5044_v57 = vld [vmem:[#allocation3 + $0xdc] sm:$0xf] }
 0x882   : > { %2248 = vmatpush.bf16.msrb.mxu2 %v4414_v49  ;;  %v4402_v58 = vor.u32 %v5045_v56, %v4401_v55 }
 0x883   : > { %2044 = vadd.xlane.f32.xlu1 %v2041_v59  ;;  %2275 = vmatpush.bf16.msrb.mxu0 %v4410_v0 }
 0x886   : > { %2249 = vmatpush.bf16.msrb.mxu2 %v4402_v58 }
 0x88a   : > { %2250 = vmatpush.bf16.msrb.mxu2 %v4390_v4 }
 0x8f6   : > { %v2045_v6 = vpop.xlane.xlu1 %2044 }
 0x8f7   : > { %v2046_v7 = vmul.f32 %v2045_v6, %v5964_v39  ;;  %v4397_v6 = vld [vmem:[#allocation3 + $0xc8] sm:$0xf] }
 0x8f9   : > { %v5991_v8 = vsub.f32 %v2041_v59, %v2046_v7  ;;  %v4403_v59 = vld [vmem:[#allocation3 + $0xe4] sm:$0xf0]  ;;  %v5043_v7 = vld [vmem:[#allocation3 + $0xd0] sm:$0xf0] }
 0x8fa   : > { %v4406_v63 = vor.u32 %v5044_v57, %v4403_v59  ;;  %v4398_v9 = vor.u32 %v5043_v7, %v4397_v6 }
 0x8fb   : > { %v2048_v22 = vmul.f32 %v5991_v8, %v5991_v8 }
 0x8fc   : > { %2262 = vmatpush.bf16.msra.mxu3 %v4406_v63  ;;  %2276 = vmatpush.bf16.msrb.mxu0 %v4398_v9 }
 0x8fd   : > { %2049 = vadd.xlane.f32.xlu0 %v2048_v22  ;;  %v4394_v22 = vor.u32 %v5041_v3, %v4391_v5 }
 0x900   : > { %2263 = vmatpush.bf16.msra.mxu3 %v4394_v22 }
 0x970   : > { %v2050_v10 = vpop.xlane.xlu0 %2049 }
 0x971   : > { %v2051_v11 = vmul.f32 %v2050_v10, %v5964_v39 }
 0x973   : > { %v2052_v12 = vadd.f32 1e-05, %v2051_v11 }
 0x975   : > { %5325 = vrsqrt.f32 %v2052_v12  ;;  %vm2059_vm15 = vweird.f32 %v2052_v12 }
 0x97b   : > { %v5326_v13 = vpop.eup %5325 }
 0x97c   : > { %v2054_v15 = vmul.f32 %v5326_v13, %v2052_v12  ;;  %vm2060_vm14 = vweird.f32 %v5326_v13 }
 0x97d   : > { %vm2061_vm10 = vmor %vm2059_vm15, %vm2060_vm14 }
 0x97e   : > { %v2055_v16 = vmul.f32 %v5326_v13, %v2054_v15 }
 0x980   : > { %v2056_v17 = vmul.f32 0.5, %v2055_v16 }
 0x982   : > { %v2057_v18 = vsub.f32 1.5, %v2056_v17 }
 0x984   : > { %v2058_v19 = vmul.f32 %v5326_v13, %v2057_v18 }
 0x986   : > { %v2062_v21 = vsel %vm2061_vm10, %v5326_v13, %v2058_v19 }
 0x987   : > { %v2063_v23 = vmul.f32 %v2062_v21, %v5991_v8 }
 0x989   : > { %v2067_v26 = vmul.f32 %v5273_v20, %v2063_v23 }
 0x98b   : > { %v6003_v27 = vadd.f32 %v5274_v25, %v2067_v26 }
 0x98d   : > { %v2105_v42 = vpack.c.bf16 %v6003_v27, %v6003_v27 }
 0x98f   : > { %2251 = vmatmul.bf16.vlgmr.msrb.gmra.mxu2 %v2105_v42  ;;  %2264 = vmatmul.bf16.vlgmr.msra.gmra.mxu3 %v2105_v42 }
 0x990   : > { %2277 = vmatmul.bf16.vlgmr.msrb.gmra.mxu0 %v2105_v42 }
 0xa0d   : > { %v2278_v31 = vpop.f32.mrf.mxu0 }
 0xa0e   : > { %v2279_v8 = vadd.f32 %v2278_v31, %v2111_v30 }
 0xa10   : > { %v6010_v14 = vpack.c.bf16 %v2279_v8, %v2279_v8 }
 0xa12   : > { %v2321_v33 = vsel %vm845_vm1, %v6010_v14, 0  ;;  %v2252_v34 = vpop.f32.mrf.mxu2  ;;  %v2265_v29 = vpop.f32.mrf.mxu3 }
 0xa13   : > { %v2253_v35 = vadd.f32 %v2252_v34, %v2109_v24  ;;  %v2266_v62 = vadd.f32 %v2265_v29, %v2110_v32  ;;  %2330 = vmatpush.bf16.msra.mxu2 %v2321_v33 }
 0xa15   : > { %v2282_v36 = vpack.c.bf16 %v2253_v35, %v2253_v35  ;;  %v2283_v37 = vpack.c.bf16 %v2266_v62, %v2266_v62  ;;  %v2280_v38 = vpop.f32.mrf.mxu0 }
 0xa17   : > { %v2338_v40 = vunpack.c.l.b16 %v2282_v36  ;;  %v2289_v41 = vsel %vm808_vm0, %v2283_v37, 0  ;;  %v2343_v43 = vunpack.c.l.b16 %v2283_v37  ;;  %v2380_v37 = vunpack.c.l.b16 %v6010_v14 }
 0xa18   : > { %2298 = vmatpush.bf16.xpose.msra.mxu1 %v2289_v41 }
 0xa19   : > { %v2339_v44 = vpack.c.b16 %v2338_v40, %v2338_v40  ;;  %v2344_v45 = vpack.c.b16 %v2343_v43, %v2343_v43  ;;  %v6056_v41 = vpack.c.b16 %v2380_v37, %v2380_v37 }
 0xa1a   : > { %v2254_v46 = vpop.f32.mrf.mxu2  ;;  %v2267_v47 = vpop.f32.mrf.mxu3 }
 0xa1b   : > { %2410 = vrot.lane.b32.xlu0 %v2344_v45, %s5609_s30  ;;  %2345 = vrot.lane.b32.xlu2 %v2344_v45, %s5610_s0 }
 0xa1c   : > { %2340 = vrot.lane.b32.xlu1 %v2339_v44, %s5610_s0 }
 0xa1f   : > { %4483 = vmatmul.msk.bf16.vlgmr.msra.gmra.mxu1 %vm808_vm0, %v2282_v36 }
 0xa23   : > { %2472 = vrot.lane.b32.xlu2 %v2344_v45, %s5611_s17  ;;  %2408 = vrot.lane.b32.xlu0 %v2339_v44, %s5609_s30 }
 0xa24   : > { %2470 = vrot.lane.b32.xlu1 %v2339_v44, %s5611_s17 }
 0xa2b   : > { %2534 = vrot.lane.b32.xlu2 %v2344_v45, %s5612_s18  ;;  %2596 = vrot.lane.b32.xlu0 %v2344_v45, %s5613_s19 }
 0xa2c   : > { %2532 = vrot.lane.b32.xlu1 %v2339_v44, %s5612_s18 }
 0xa33   : > { %2594 = vrot.lane.b32.xlu2 %v2339_v44, %s5613_s19  ;;  %2658 = vrot.lane.b32.xlu0 %v2344_v45, %s5614_s20 }
 0xa34   : > { %2720 = vrot.lane.b32.xlu1 %v2344_v45, %s5615_s28 }
 0xa3b   : > { %2656 = vrot.lane.b32.xlu2 %v2339_v44, %s5614_s20  ;;  %2718 = vrot.lane.b32.xlu0 %v2339_v44, %s5615_s28 }
 0xa75   : > { %v2346_v48 = vpop.permute.xlu2 %2345 }
 0xa76   : > { %v2351_v49 = vsel %vm808_vm0, %v2346_v48, 0 }
 0xa77   : > { %2360 = vmatpush.bf16.xpose.msrb.mxu3 %v2351_v49 }
 0xa7d   : > { %v2473_v50 = vpop.permute.xlu2 %2472 }
 0xa7e   : > { %v2478_v51 = vsel %vm808_vm0, %v2473_v50, 0 }
 0xa7f   : > { %2487 = vmatpush.bf16.xpose.msra.mxu3 %v2478_v51 }
 0xa85   : > { %v2535_v52 = vpop.permute.xlu2 %2534 }
 0xa86   : > { %v2540_v56 = vsel %vm808_vm0, %v2535_v52, 0 }
 0xa8d   : > { %v2411_v53 = vpop.permute.xlu0 %2410  ;;  %v2595_v7 = vpop.permute.xlu2 %2594 }
 0xa8e   : > { %v2416_v54 = vsel %vm808_vm0, %v2411_v53, 0  ;;  %v2341_v55 = vpop.permute.xlu1 %2340 }
 0xa8f   : > { %4485 = vmatmul.msk.bf16.vlgmr.msrb.gmra.mxu3 %vm808_vm0, %v2341_v55  ;;  %2425 = vmatpush.bf16.xpose.msrb.mxu1 %v2416_v54 }
 0xa95   : > { %v2409_v57 = vpop.permute.xlu0 %2408  ;;  %v2657_v22 = vpop.permute.xlu2 %2656 }
 0xa96   : > { %v2471_v58 = vpop.permute.xlu1 %2470  ;;  %4487 = vmatmul.msk.bf16.vlgmr.msrb.gmra.mxu1 %vm808_vm0, %v2409_v57 }
 0xa97   : > { %2549 = vmatpush.bf16.xpose.msra.mxu1 %v2540_v56 }
 0xa9c   : > { %v2300_v59 = vpop.f32.mrf.mxu1 }
 0xa9d   : > { %v2304_v60 = vmul.f32 0.25, %v2300_v59  ;;  %v2597_v61 = vpop.permute.xlu0 %2596 }
 0xa9e   : > { %v2602_v63 = vsel %vm808_vm0, %v2597_v61, 0  ;;  %v2533_v0 = vpop.permute.xlu1 %2532 }
 0xa9f   : > { %4489 = vmatmul.msk.bf16.vlgmr.msra.gmra.mxu3 %vm808_vm0, %v2471_v58  ;;  %v2305_v1 = vsel %vm829_vm2, %v2304_v60, -inf }
 0xaa0   : > { %2611 = vmatpush.bf16.xpose.msrb.mxu3 %v2602_v63  ;;  %2306 = vmax.xlane.f32.xlu1 %v2305_v1 }
 0xaa4   : > { %v2302_v2 = vpop.f32.mrf.mxu1 }
 0xaa5   : > { %v2659_v3 = vpop.permute.xlu0 %2658 }
 0xaa6   : > { %v2664_v4 = vsel %vm808_vm0, %v2659_v3, 0  ;;  %v2721_v5 = vpop.permute.xlu1 %2720  ;;  %4491 = vmatmul.msk.bf16.vlgmr.msra.gmra.mxu1 %vm808_vm0, %v2533_v0 }
 0xaa7   : > { %v2726_v6 = vsel %vm808_vm0, %v2721_v5, 0  ;;  %2673 = vmatpush.bf16.xpose.msrb.mxu1 %v2664_v4 }
 0xaa8   : > { %2735 = vmatpush.bf16.xpose.msra.mxu3 %v2726_v6 }
 0xaad   : > { %v2719_v9 = vpop.permute.xlu0 %2718 }
 0xaaf   : > { %4493 = vmatmul.msk.bf16.vlgmr.msrb.gmra.mxu3 %vm808_vm0, %v2595_v7 }
 0xab6   : > { %4495 = vmatmul.msk.bf16.vlgmr.msrb.gmra.mxu1 %vm808_vm0, %v2657_v22 }
 0xabf   : > { %4497 = vmatmul.msk.bf16.vlgmr.msra.gmra.mxu3 %vm808_vm0, %v2719_v9 }
 0xb12   : > { %v2362_v10 = vpop.f32.mrf.mxu3 }
 0xb13   : > { %v2366_v11 = vmul.f32 0.25, %v2362_v10  ;;  %v2307_v12 = vpop.xlane.xlu1 %2306  ;;  %v2427_v13 = vpop.f32.mrf.mxu1 }
 0xb14   : > { %v2308_v15 = vsub.f32 %v2304_v60, %v2307_v12  ;;  %v2431_v16 = vmul.f32 0.25, %v2427_v13 }
 0xb15   : > { %v2367_v17 = vsel %vm829_vm2, %v2366_v11, -inf }
 0xb16   : > { %v2309_v18 = vmul.f32 1.442695, %v2308_v15  ;;  %2368 = vmax.xlane.f32.xlu2 %v2367_v17  ;;  %v2432_v19 = vsel %vm829_vm2, %v2431_v16, -inf }
 0xb17   : > { %2433 = vmax.xlane.f32.xlu0 %v2432_v19 }
 0xb18   : > { %5327 = vpow2.f32 %v2309_v18 }
 0xb1a   : > { %v2364_v20 = vpop.f32.mrf.mxu3 }
 0xb1b   : > { %v2429_v21 = vpop.f32.mrf.mxu1 }
 0xb1e   : > { %v5328_v23 = vpop.eup %5327 }
 0xb1f   : > { %v2311_v25 = vsel %vm829_vm2, %v5328_v23, 0.0 }
 0xb20   : > { %2312 = vadd.xlane.f32.xlu2 %v2311_v25 }
 0xb22   : > { %v2489_v26 = vpop.f32.mrf.mxu3 }
 0xb23   : > { %v2493_v42 = vmul.f32 0.25, %v2489_v26  ;;  %v2551_v28 = vpop.f32.mrf.mxu1 }
 0xb24   : > { %v2555_v30 = vmul.f32 0.25, %v2551_v28 }
 0xb25   : > { %v2494_v31 = vsel %vm829_vm2, %v2493_v42, -inf }
 0xb26   : > { %2495 = vmax.xlane.f32.xlu1 %v2494_v31  ;;  %v2556_v8 = vsel %vm829_vm2, %v2555_v30, -inf }
 0xb28   : > { %2557 = vmax.xlane.f32.xlu2 %v2556_v8 }
 0xb2a   : > { %v2491_v24 = vpop.f32.mrf.mxu3 }
 0xb2b   : > { %v2553_v32 = vpop.f32.mrf.mxu1 }
 0xb32   : > { %v2613_v33 = vpop.f32.mrf.mxu3 }
 0xb33   : > { %v2617_v34 = vmul.f32 0.25, %v2613_v33  ;;  %v2675_v29 = vpop.f32.mrf.mxu1 }
 0xb34   : > { %v6050_v35 = vmul.f32 0.25, %v2675_v29 }
 0xb35   : > { %v2618_v62 = vsel %vm829_vm2, %v2617_v34, -inf }
 0xb36   : > { %2619 = vmax.xlane.f32.xlu0 %v2618_v62  ;;  %v2680_v36 = vsel %vm829_vm2, %v6050_v35, -inf }
 0xb37   : > { %2681 = vmax.xlane.f32.xlu1 %v2680_v36 }
 0xb3a   : > { %v2615_v38 = vpop.f32.mrf.mxu3 }
 0xb3b   : > { %v2677_v40 = vpop.f32.mrf.mxu1 }
 0xb40   : > { %2382 = vrot.lane.b32.xlu2 %v6056_v41, %s5610_s0 }
 0xb42   : > { %v2737_v43 = vpop.f32.mrf.mxu3 }
 0xb43   : > { %v2741_v44 = vmul.f32 0.25, %v2737_v43 }
 0xb45   : > { %v2742_v45 = vsel %vm829_vm2, %v2741_v44, -inf }
 0xb46   : > { %2743 = vmax.xlane.f32.xlu0 %v2742_v45 }
 0xb4a   : > { %v2739_v46 = vpop.f32.mrf.mxu3 }
 0xb50   : > { %2506 = vrot.lane.b32.xlu1 %v6056_v41, %s5611_s17 }
 0xb58   : > { %2568 = vrot.lane.b32.xlu1 %v6056_v41, %s5612_s18 }
 0xb5a   : > { %2444 = vrot.lane.b32.xlu0 %v6056_v41, %s5609_s30 }
 0xb89   : > { %v2369_v14 = vpop.xlane.xlu2 %2368 }
 0xb8a   : > { %v2370_v47 = vsub.f32 %v2366_v11, %v2369_v14  ;;  %v2434_v48 = vpop.xlane.xlu0 %2433 }
 0xb8b   : > { %v2435_v49 = vsub.f32 %v2431_v16, %v2434_v48 }
 0xb8c   : > { %v2371_v50 = vmul.f32 1.442695, %v2370_v47 }
 0xb8d   : > { %v2436_v51 = vmul.f32 1.442695, %v2435_v49 }
 0xb8e   : > { %5329 = vpow2.f32 %v2371_v50 }
 0xb8f   : > { %5331 = vpow2.f32 %v2436_v51 }
 0xb93   : > { %v2313_v52 = vpop.xlane.xlu2 %2312 }
 0xb94   : > { %v6067_v53 = vpop.eup %5329  ;;  %5333 = vrcp.f32 %v2313_v52 }
 0xb95   : > { %v6069_v54 = vpop.eup %5331  ;;  %v2373_v55 = vsel %vm829_vm2, %v6067_v53, 0.0 }
 0xb96   : > { %2374 = vadd.xlane.f32.xlu1 %v2373_v55  ;;  %v2438_v56 = vsel %vm829_vm2, %v6069_v54, 0.0 }
 0xb97   : > { %2439 = vadd.xlane.f32.xlu0 %v2438_v56 }
 0xb99   : > { %v2496_v57 = vpop.xlane.xlu1 %2495 }
 0xb9a   : > { %v5334_v58 = vpop.eup %5333  ;;  %v2497_v59 = vsub.f32 %v2493_v42, %v2496_v57 }
 0xb9b   : > { %v2315_v60 = vmul.f32 %v5334_v58, %v5328_v23  ;;  %v2558_v61 = vpop.xlane.xlu2 %2557 }
 0xb9c   : > { %v2498_v63 = vmul.f32 1.442695, %v2497_v59  ;;  %v2559_v0 = vsub.f32 %v2555_v30, %v2558_v61 }
 0xb9d   : > { %v2316_v1 = vpack.c.bf16 %v2315_v60, %v2315_v60 }
 0xb9e   : > { %5335 = vpow2.f32 %v2498_v63  ;;  %v2560_v2 = vmul.f32 1.442695, %v2559_v0 }
 0xb9f   : > { %4484 = vmatmul.msk.bf16.vlgmr.msra.gmra.mxu2 %vm829_vm2, %v2316_v1 }
 0xba0   : > { %5337 = vpow2.f32 %v2560_v2 }
 0xba3   : > { %v2383_v3 = vpop.permute.xlu2 %2382 }
 0xba4   : > { %v5336_v4 = vpop.eup %5335  ;;  %v2388_v5 = vsel %vm845_vm1, %v2383_v3, 0 }
 0xba5   : > { %2397 = vmatpush.bf16.msra.mxu0 %v2388_v5  ;;  %v2500_v6 = vsel %vm829_vm2, %v5336_v4, 0.0 }
 0xba6   : > { %v5338_v7 = vpop.eup %5337  ;;  %2501 = vadd.xlane.f32.xlu1 %v2500_v6 }
 0xba7   : > { %v2562_v22 = vsel %vm829_vm2, %v5338_v7, 0.0 }
 0xba8   : > { %2563 = vadd.xlane.f32.xlu2 %v2562_v22 }
 0xba9   : > { %v2620_v9 = vpop.xlane.xlu0 %2619 }
 0xbaa   : > { %v2621_v10 = vsub.f32 %v2617_v34, %v2620_v9  ;;  %v2682_v16 = vpop.xlane.xlu1 %2681 }
 0xbab   : > { %v2683_v30 = vsub.f32 %v6050_v35, %v2682_v16 }
 0xbac   : > { %v2622_v11 = vmul.f32 1.442695, %v2621_v10 }
 0xbad   : > { %v2684_v31 = vmul.f32 1.442695, %v2683_v30 }
 0xbae   : > { %5339 = vpow2.f32 %v2622_v11 }
 0xbb4   : > { %v5340_v12 = vpop.eup %5339 }
 0xbb5   : > { %v2624_v13 = vsel %vm829_vm2, %v5340_v12, 0.0 }
 0xbb6   : > { %2625 = vadd.xlane.f32.xlu0 %v2624_v13 }
 0xbb9   : > { %v2744_v15 = vpop.xlane.xlu0 %2743 }
 0xbba   : > { %v2745_v17 = vsub.f32 %v2741_v44, %v2744_v15 }
 0xbbc   : > { %v2746_v18 = vmul.f32 1.442695, %v2745_v17 }
 0xbbe   : > { %5341 = vpow2.f32 %v2746_v18 }
 0xbbf   : > { %2630 = vrot.lane.b32.xlu1 %v6056_v41, %s5613_s19  ;;  %5343 = vpow2.f32 %v2684_v31 }
 0xbc2   : > { %v2507_v19 = vpop.permute.xlu1 %2506 }
 0xbc3   : > { %v2512_v20 = vsel %vm845_vm1, %v2507_v19, 0  ;;  %v5072_v19 = vld [vmem:[%s6242_s3 + $0x78] sm:$0xff] }
 0xbc4   : > { %v5342_v21 = vpop.eup %5341  ;;  %2521 = vmatpush.bf16.msrb.mxu0 %v2512_v20  ;;  %2852 = vmatpush.bf16.msra.mxu1 %v5072_v19  ;;  %v5071_v20 = vld [vmem:[%s6242_s3 + $0x70] sm:$0xff]  ;;  %v5091_v19 = vld [vmem:[#allocation6 + $0x18c] sm:$0xf0] }
 0xbc5   : > { %v2748_v23 = vsel %vm829_vm2, %v5342_v21, 0.0  ;;  %v5344_v8 = vpop.eup %5343 }
 0xbc6   : > { %2749 = vadd.xlane.f32.xlu2 %v2748_v23  ;;  %v2686_v24 = vsel %vm829_vm2, %v5344_v8, 0.0  ;;  %v5070_v23 = vld [vmem:[%s6242_s3 + $0x68] sm:$0xff] }
 0xbc8   : > { %2853 = vmatpush.bf16.msra.mxu1 %v5071_v20  ;;  %v5089_v20 = vld [vmem:[#allocation6 + $0x184] sm:$0xf] }
 0xbca   : > { %2754 = vrot.lane.b32.xlu0 %v6056_v41, %s5615_s28  ;;  %v2569_v25 = vpop.permute.xlu1 %2568 }
 0xbcb   : > { %v2574_v28 = vsel %vm845_vm1, %v2569_v25, 0 }
 0xbcc   : > { %v2445_v26 = vpop.permute.xlu0 %2444  ;;  %2854 = vmatpush.bf16.msra.mxu1 %v5070_v23  ;;  %v4619_v23 = vld [vmem:[#allocation6 + $0x190] sm:$0xf0] }
 0xbcd   : > { %v2450_v42 = vsel %vm845_vm1, %v2445_v26, 0  ;;  %v5069_v26 = vld [vmem:[%s6242_s3 + $0x60] sm:$0xff] }
 0xbce   : > { %2459 = vmatpush.bf16.msrb.mxu2 %v2450_v42  ;;  %v5068_v42 = vld [vmem:[%s6242_s3 + $0x58] sm:$0xff] }
 0xbd0   : > { %2855 = vmatpush.bf16.msra.mxu1 %v5069_v26  ;;  %v5092_v26 = vld [vmem:[#allocation6 + $0x194] sm:$0xf0] }
 0xbd2   : > { %2583 = vmatpush.bf16.msra.mxu2 %v2574_v28 }
 0xbd4   : > { %2856 = vmatpush.bf16.msra.mxu1 %v5068_v42  ;;  %v4622_v42 = vor.u32 %v5089_v20, %v4619_v23  ;;  %v5127_v20 = vld [vmem:[#allocation8 + $0x1b0] sm:$0xff] }
 0xbde   : > { %2692 = vrot.lane.b32.xlu2 %v6056_v41, %s5614_s20 }
 0xbe9   : > { %2687 = vadd.xlane.f32.xlu1 %v2686_v24  ;;  %v5066_v24 = vld [vmem:[%s6242_s3 + $0x48] sm:$0xff] }
 0xc09   : > { %v2375_v32 = vpop.xlane.xlu1 %2374 }
 0xc0a   : > { %5345 = vrcp.f32 %v2375_v32  ;;  %v2440_v33 = vpop.xlane.xlu0 %2439  ;;  %v5065_v32 = vld [vmem:[%s6242_s3 + $0x40] sm:$0xff] }
 0xc0b   : > { %5347 = vrcp.f32 %v2440_v33 }
 0xc10   : > { %v5346_v34 = vpop.eup %5345 }
 0xc11   : > { %v5348_v29 = vpop.eup %5347  ;;  %v2377_v62 = vmul.f32 %v5346_v34, %v6067_v53 }
 0xc12   : > { %v2442_v36 = vmul.f32 %v5348_v29, %v6069_v54 }
 0xc13   : > { %v2378_v35 = vpack.c.bf16 %v2377_v62, %v2377_v62 }
 0xc14   : > { %v2443_v37 = vpack.c.bf16 %v2442_v36, %v2442_v36  ;;  %v5275_v36 = vld [vmem:[%s6243_s4 + $0x1] ss:$0 sm:$0xff] }
 0xc15   : > { %4486 = vmatmul.msk.bf16.vlgmr.msra.gmra.mxu0 %vm829_vm2, %v2378_v35 }
 0xc16   : > { %4488 = vmatmul.msk.bf16.vlgmr.msrb.gmra.mxu2 %vm829_vm2, %v2443_v37 }
 0xc19   : > { %v2502_v38 = vpop.xlane.xlu1 %2501 }
 0xc1a   : > { %5349 = vrcp.f32 %v2502_v38 }
 0xc1b   : > { %v2564_v40 = vpop.xlane.xlu2 %2563 }
 0xc1c   : > { %5351 = vrcp.f32 %v2564_v40 }
 0xc20   : > { %v5350_v41 = vpop.eup %5349 }
 0xc21   : > { %v2504_v43 = vmul.f32 %v5350_v41, %v5336_v4  ;;  %v4665_v41 = vld [vmem:[#allocation6 + $0x1e0] sm:$0xf] }
 0xc22   : > { %v5352_v44 = vpop.eup %5351  ;;  %v2332_v45 = vpop.f32.mrf.mxu2 }
 0xc23   : > { %v2505_v46 = vpack.c.bf16 %v2504_v43, %v2504_v43  ;;  %v2566_v14 = vmul.f32 %v5352_v44, %v5338_v7  ;;  %2336 = vst.msk [vmem:[#allocation2] sm:$0xff] %vm808_vm0, %v2332_v45  ;;  %v5103_v43 = vld [vmem:[#allocation6 + $0x1ec] sm:$0xf0]  ;;  %v5101_v44 = vld [vmem:[#allocation6 + $0x1e4] sm:$0xf] }
 0xc24   : > { %v4666_v45 = vor.u32 %v5103_v43, %v4665_v41  ;;  %v4585_v43 = vld [vmem:[#allocation6 + $0x140] sm:$0xf] }
 0xc25   : > { %v2567_v47 = vpack.c.bf16 %v2566_v14, %v2566_v14  ;;  %4490 = vmatmul.msk.bf16.vlgmr.msrb.gmra.mxu0 %vm829_vm2, %v2505_v46  ;;  %v4667_v46 = vld [vmem:[#allocation6 + $0x1f0] sm:$0xf0]  ;;  %v4673_v14 = vld [vmem:[#allocation6 + $0x1e8] sm:$0xf] }
 0xc27   : > { %4492 = vmatmul.msk.bf16.vlgmr.msra.gmra.mxu2 %vm829_vm2, %v2567_v47  ;;  %v5104_v47 = vld [vmem:[#allocation6 + $0x1f4] sm:$0xf0] }
 0xc29   : > { %v2626_v48 = vpop.xlane.xlu0 %2625 }
 0xc2a   : > { %5353 = vrcp.f32 %v2626_v48  ;;  %v2334_v49 = vpop.f32.mrf.mxu2  ;;  %v4670_v48 = vor.u32 %v5101_v44, %v4667_v46  ;;  %v5083_v44 = vld [vmem:[#allocation6 + $0x14c] sm:$0xf0] }
 0xc2b   : > { %v4674_v49 = vor.u32 %v5104_v47, %v4673_v14  ;;  %v4586_v46 = vor.u32 %v5083_v44, %v4585_v43  ;;  %v4587_v14 = vld [vmem:[#allocation6 + $0x150] sm:$0xf0]  ;;  %v4593_v47 = vld [vmem:[#allocation6 + $0x148] sm:$0xf]  ;;  %v5133_v43 = vld [vmem:[#allocation8 + $0x1e0] sm:$0xff] }
 0xc2c   : > { %3116 = vmatpush.bf16.msrb.mxu3 %v4670_v48  ;;  %v5084_v48 = vld [vmem:[#allocation6 + $0x154] sm:$0xf0]  ;;  %v5110_v44 = vld [vmem:[#allocation8 + $0x128] sm:$0xff] }
 0xc30   : > { %v5354_v50 = vpop.eup %5353 }
 0xc31   : > { %v2628_v51 = vmul.f32 %v5354_v50, %v5340_v12  ;;  %v2631_v52 = vpop.permute.xlu1 %2630  ;;  %v5102_v50 = vld [vmem:[#allocation6 + $0x1ec] sm:$0xf] }
 0xc32   : > { %v2636_v53 = vsel %vm845_vm1, %v2631_v52, 0 }
 0xc33   : > { %v2629_v54 = vpack.c.bf16 %v2628_v51, %v2628_v51  ;;  %2645 = vmatpush.bf16.msra.mxu0 %v2636_v53  ;;  %v4675_v51 = vld [vmem:[#allocation6 + $0x1f8] sm:$0xf0] }
 0xc34   : > { %v4678_v52 = vor.u32 %v5102_v50, %v4675_v51  ;;  %v4594_v50 = vor.u32 %v5084_v48, %v4593_v47  ;;  %v5082_v51 = vld [vmem:[#allocation6 + $0x14c] sm:$0xf]  ;;  %v5109_v47 = vld [vmem:[#allocation8 + $0x120] sm:$0xff] }
 0xc35   : > { %v5117_v48 = vld [vmem:[#allocation8 + $0x160] sm:$0xff] }
 0xc36   : > { %4494 = vmatmul.msk.bf16.vlgmr.msra.gmra.mxu0 %vm829_vm2, %v2629_v54 }
 0xc39   : > { %v2750_v55 = vpop.xlane.xlu2 %2749 }
 0xc3a   : > { %5355 = vrcp.f32 %v2750_v55 }
 0xc3c   : > { %v2755_v56 = vpop.permute.xlu0 %2754 }
 0xc3d   : > { %v2760_v57 = vsel %vm845_vm1, %v2755_v56, 0  ;;  %v4649_v56 = vld [vmem:[#allocation6 + $0x1c0] sm:$0xf] }
 0xc3e   : > { %2769 = vmatpush.bf16.msrb.mxu0 %v2760_v57  ;;  %v5099_v57 = vld [vmem:[#allocation6 + $0x1cc] sm:$0xf0] }
 0xc40   : > { %v5356_v58 = vpop.eup %5355 }
 0xc41   : > { %v2752_v59 = vmul.f32 %v5356_v58, %v5342_v21  ;;  %v2693_v60 = vpop.permute.xlu2 %2692  ;;  %v5097_v58 = vld [vmem:[#allocation6 + $0x1c4] sm:$0xf] }
 0xc42   : > { %v2698_v61 = vsel %vm845_vm1, %v2693_v60, 0  ;;  %3129 = vmatpush.bf16.msra.mxu0 %v4674_v49  ;;  %v4651_v60 = vld [vmem:[#allocation6 + $0x1d0] sm:$0xf0] }
 0xc43   : > { %v2753_v63 = vpack.c.bf16 %v2752_v59, %v2752_v59  ;;  %2707 = vmatpush.bf16.msrb.mxu2 %v2698_v61  ;;  %v4650_v59 = vor.u32 %v5099_v57, %v4649_v56  ;;  %v4657_v61 = vld [vmem:[#allocation6 + $0x1c8] sm:$0xf]  ;;  %v5077_v56 = vld [vmem:[#allocation6 + $0x124] sm:$0xf] }
 0xc46   : > { %4498 = vmatmul.msk.bf16.vlgmr.msrb.gmra.mxu0 %vm829_vm2, %v2753_v63  ;;  %v5100_v63 = vld [vmem:[#allocation6 + $0x1d4] sm:$0xf0] }
 0xc47   : > { %3103 = vmatpush.bf16.msra.mxu2 %v4666_v45  ;;  %v5081_v45 = vld [vmem:[#allocation6 + $0x144] sm:$0xf] }
 0xc48   : > { %v4590_v49 = vor.u32 %v5081_v45, %v4587_v14  ;;  %v5118_v45 = vld [vmem:[#allocation8 + $0x168] sm:$0xff]  ;;  %v5132_v14 = vld [vmem:[#allocation8 + $0x1d8] sm:$0xff] }
 0xc4b   : > { %3104 = vmatpush.bf16.msra.mxu2 %v4650_v59  ;;  %v4577_v59 = vld [vmem:[#allocation6 + $0x128] sm:$0xf] }
 0xc5c   : > { %v2688_v0 = vpop.xlane.xlu1 %2687 }
 0xc5d   : > { %5357 = vrcp.f32 %v2688_v0  ;;  %v4654_v0 = vor.u32 %v5097_v58, %v4651_v60  ;;  %v4571_v58 = vld [vmem:[#allocation6 + $0x130] sm:$0xf0]  ;;  %v5080_v60 = vld [vmem:[#allocation6 + $0x134] sm:$0xf0] }
 0xc5f   : > { %3117 = vmatpush.bf16.msrb.mxu3 %v4654_v0  ;;  %v5078_v0 = vld [vmem:[#allocation6 + $0x12c] sm:$0xf] }
 0xc63   : > { %v5358_v1 = vpop.eup %5357 }
 0xc64   : > { %v2690_v2 = vmul.f32 %v5358_v1, %v5344_v8  ;;  %v5067_v8 = vld [vmem:[%s6242_s3 + $0x50] sm:$0xff]  ;;  %v4658_v1 = vor.u32 %v5100_v63, %v4657_v61  ;;  %v4574_v61 = vor.u32 %v5077_v56, %v4571_v58  ;;  %v4578_v63 = vor.u32 %v5080_v60, %v4577_v59  ;;  %v5115_v56 = vld [vmem:[#allocation8 + $0x150] sm:$0xff]  ;;  %v5129_v58 = vld [vmem:[#allocation8 + $0x1c0] sm:$0xff] }
 0xc65   : > { %2857 = vmatpush.bf16.msra.mxu1 %v5067_v8  ;;  %v5106_v59 = vld [vmem:[#allocation8 + $0x108] sm:$0xff] }
 0xc66   : > { %v2691_v3 = vpack.c.bf16 %v2690_v2, %v2690_v2  ;;  %v5098_v2 = vld [vmem:[#allocation6 + $0x1cc] sm:$0xf]  ;;  %3130 = vmatpush.bf16.msra.mxu0 %v4658_v1  ;;  %v4579_v1 = vld [vmem:[#allocation6 + $0x138] sm:$0xf0] }
 0xc67   : > { %v5114_v60 = vld [vmem:[#allocation8 + $0x148] sm:$0xff] }
 0xc68   : > { %4496 = vmatmul.msk.bf16.vlgmr.msrb.gmra.mxu2 %vm829_vm2, %v2691_v3  ;;  %v4659_v3 = vld [vmem:[#allocation6 + $0x1d8] sm:$0xf0] }
 0xc69   : > { %2858 = vmatpush.bf16.msra.mxu1 %v5066_v24  ;;  %v4601_v24 = vld [vmem:[#allocation6 + $0x160] sm:$0xf] }
 0xc6d   : > { %2859 = vmatpush.bf16.msra.mxu1 %v5065_v32  ;;  %v5087_v32 = vld [vmem:[#allocation6 + $0x16c] sm:$0xf0] }
 0xc71   : > { %3142 = vmatpush.bf16.msrb.mxu1 %v4678_v52  ;;  %v4595_v52 = vld [vmem:[#allocation6 + $0x158] sm:$0xf0] }
 0xc92   : > { %v2399_v4 = vpop.f32.mrf.mxu0 }
 0xc93   : > { %2404 = vrot.lane.b32.xlu0 %v2399_v4, %s5615_s28  ;;  %v4662_v4 = vor.u32 %v5098_v2, %v4659_v3  ;;  %v4582_v2 = vor.u32 %v5078_v0, %v4579_v1  ;;  %v4553_v3 = vld [vmem:[#allocation6 + $0x100] sm:$0xf] }
 0xc94   : > { %v5113_v0 = vld [vmem:[#allocation8 + $0x140] sm:$0xff] }
 0xc95   : > { %3143 = vmatpush.bf16.msrb.mxu1 %v4662_v4  ;;  %v5075_v4 = vld [vmem:[#allocation6 + $0x10c] sm:$0xf0] }
 0xc99   : > { %v2461_v5 = vpop.f32.mrf.mxu2 }
 0xc9a   : > { %v2401_v6 = vpop.f32.mrf.mxu0  ;;  %2466 = vrot.lane.b32.xlu2 %v2461_v5, %s5614_s20  ;;  %v4633_v5 = vld [vmem:[#allocation6 + $0x1a0] sm:$0xf]  ;;  %s6293_s20 = sld [smem:[#allocation33_spill]] }
 0xc9b   : > { %v5095_v6 = vld [vmem:[#allocation6 + $0x1ac] sm:$0xf0] }
 0xca0   : > { %s3833_s28 = scalar_lea.hbm %s6293_s20, %s4942_s29  ;;  %s5511_s21 = scalar_lea.hbm %s6293_s20, 16 }
 0xca1   : > { %v2463_v7 = vpop.f32.mrf.mxu2 }
 0xca2   : > { %v2523_v22 = vpop.f32.mrf.mxu0  ;;  %v5093_v7 = vld [vmem:[#allocation6 + $0x1a4] sm:$0xf] }
 0xca3   : > { %2528 = vrot.lane.b32.xlu1 %v2523_v22, %s5613_s19  ;;  %v4634_v22 = vor.u32 %v5095_v6, %v4633_v5  ;;  %v5073_v5 = vld [vmem:[#allocation6 + $0x104] sm:$0xf]  ;;  %v4554_v6 = vor.u32 %v5075_v4, %v4553_v3 }
 0xca5   : > { %3105 = vmatpush.bf16.msra.mxu2 %v4634_v22  ;;  %v4561_v22 = vld [vmem:[#allocation6 + $0x108] sm:$0xf] }
 0xcaa   : > { %v2525_v9 = vpop.f32.mrf.mxu0  ;;  %v2585_v10 = vpop.f32.mrf.mxu2 }
 0xcab   : > { %2590 = vrot.lane.b32.xlu0 %v2585_v10, %s5612_s18  ;;  %v4635_v9 = vld [vmem:[#allocation6 + $0x1b0] sm:$0xf0]  ;;  %v4641_v10 = vld [vmem:[#allocation6 + $0x1a8] sm:$0xf]  ;;  %s3837_s18 = sshll.u32 %s3833_s28, 4  ;;  %s3838_s18 = int_to_ptr.hbm [resolvable:$true] %s3837_s18 }
 0xcac   : > { %s5505_s14 = sshra.s32 %s3838_s18, 4  ;;  %s5506_s14 = int_to_ptr.hbm [resolvable:$true] %s5505_s14 }
 0xcad   : > { %p5512_p3 = scmp.lt.s32.totalorder %s5506_s14, %s6293_s20 }
 0xcb2   : > { %v2587_v11 = vpop.f32.mrf.mxu2 }
 0xcb3   : > { %v2647_v12 = vpop.f32.mrf.mxu0  ;;  %v5096_v11 = vld [vmem:[#allocation6 + $0x1b4] sm:$0xf0] }
 0xcb4   : > { %2652 = vrot.lane.b32.xlu2 %v2647_v12, %s5611_s17  ;;  %v4638_v12 = vor.u32 %v5093_v7, %v4635_v9  ;;  %v4555_v7 = vld [vmem:[#allocation6 + $0x110] sm:$0xf0]  ;;  %v5076_v9 = vld [vmem:[#allocation6 + $0x114] sm:$0xf0] }
 0xcb6   : > { %3118 = vmatpush.bf16.msrb.mxu3 %v4638_v12  ;;  %v5074_v12 = vld [vmem:[#allocation6 + $0x10c] sm:$0xf] }
 0xcba   : > { %3119 = vmatpush.bf16.msrb.mxu3 %v4622_v42 }
 0xcbb   : > { %v2649_v13 = vpop.f32.mrf.mxu0 }
 0xcbc   : > { %v4642_v13 = vor.u32 %v5096_v11, %v4641_v10  ;;  %v4558_v10 = vor.u32 %v5073_v5, %v4555_v7  ;;  %v4562_v11 = vor.u32 %v5076_v9, %v4561_v22 }
 0xcbe   : > { %3131 = vmatpush.bf16.msra.mxu0 %v4642_v13  ;;  %v4563_v13 = vld [vmem:[#allocation6 + $0x118] sm:$0xf0] }
 0xcc3   : > { %v2771_v15 = vpop.f32.mrf.mxu0 }
 0xcc4   : > { %2776 = vrot.lane.b32.xlu2 %v2771_v15, %s5610_s0  ;;  %v5094_v15 = vld [vmem:[#allocation6 + $0x1ac] sm:$0xf]  ;;  %s6291_s0 = sld [smem:[#allocation20_spill]] }
 0xcca   : > { %s6178_s15 = sand.u32 1, %s6291_s0  }
 0xccb   : > { %v2773_v16 = vpop.f32.mrf.mxu0  ;;  %s3984_s23 = sshll.u32 %s6178_s15, 3  ;;  %s3808_s17 = scalar_lea.sflag [#allocation13], %s6178_s15 }
 0xccc   : > { %v4643_v16 = vld [vmem:[#allocation6 + $0x1b8] sm:$0xf0]  ;;  %s590_s27 = scalar_lea.vmem [#allocation12], %s3984_s23 }
 0xccd   : > { %s3835_s19 = sshll.u32 %s590_s27, 4  ;;  %s3836_s19 = int_to_ptr.vmem [resolvable:$true] %s3835_s19 }
 0xceb   : > { %v2709_v17 = vpop.f32.mrf.mxu2 }
 0xcec   : > { %2714 = vrot.lane.b32.xlu0 %v2709_v17, %s5609_s30  ;;  %v4646_v17 = vor.u32 %v5094_v15, %v4643_v16  ;;  %v4566_v15 = vor.u32 %v5074_v12, %v4563_v13  ;;  %s5507_s30 = scalar_lea.hbm %s5506_s14, 8 }
 0xced   : > { %p5508_p0 = scmp.ne.s32.totalorder %s5506_s14, %s5507_s30  ;;  %p5513_p4 = scmp.lt.s32.totalorder %s5511_s21, %s5507_s30 }
 0xcee   : > { %3144 = vmatpush.bf16.msrb.mxu1 %v4646_v17  ;;  %v5128_v17 = vld [vmem:[#allocation8 + $0x1b8] sm:$0xff] }
 0xcef   : > { %p5509_p1 = pnand %p5508_p0, %p5740_p5  ;;  %p5514_p7 = por %p5513_p4, %p5512_p3 }
 0xcf1   : > { %p5510_p2 = pneg %p5509_p1 }
 0xcf3   : > { %v2711_v18 = vpop.f32.mrf.mxu2  ;;  %p5515_p8 = pnand %p5514_p7, %p5510_p2 }
 0xcf4   : > { %v2467_v25 = vpop.permute.xlu2 %2466  ;;  %v4617_v18 = vld [vmem:[#allocation6 + $0x180] sm:$0xf] }
 0xd05   : > { %v2405_v21 = vpop.permute.xlu0 %2404 }
 0xd06   : > { %2407 = vst.msk [vmem:[#allocation2] sm:$0xff] %vm933_vm3, %v2405_v21  ;;  %v4618_v21 = vor.u32 %v5091_v19, %v4617_v18  ;;  %v5136_v18 = vld [vmem:[#allocation8 + $0x1f8] sm:$0xff] }
 0xd07   : > { %2469 = vst.msk [vmem:[#allocation2] sm:$0xff] %vm996_vm4, %v2467_v25  ;;  %v4625_v25 = vld [vmem:[#allocation6 + $0x188] sm:$0xf] }
 0xd08   : > { %3106 = vmatpush.bf16.msra.mxu2 %v4618_v21  ;;  %v5135_v21 = vld [vmem:[#allocation8 + $0x1f0] sm:$0xff] }
 0xd0e   : > { %v2653_v31 = vpop.permute.xlu2 %2652 }
 0xd15   : > { %v2529_v28 = vpop.permute.xlu1 %2528 }
 0xd16   : > { %2531 = vst.msk [vmem:[#allocation2] sm:$0xff] %vm1059_vm5, %v2529_v28  ;;  %v4626_v28 = vor.u32 %v5092_v26, %v4625_v25 }
 0xd18   : > { %3132 = vmatpush.bf16.msra.mxu0 %v4626_v28 }
 0xd1d   : > { %v2591_v30 = vpop.permute.xlu0 %2590 }
 0xd1e   : > { %2593 = vst.msk [vmem:[#allocation2] sm:$0xff] %vm1122_vm6, %v2591_v30  ;;  %v2777_v34 = vpop.permute.xlu2 %2776  ;;  %v5090_v30 = vld [vmem:[#allocation6 + $0x18c] sm:$0xf] }
 0xd1f   : > { %2655 = vst.msk [vmem:[#allocation2] sm:$0xff] %vm1185_vm7, %v2653_v31  ;;  %v4627_v31 = vld [vmem:[#allocation6 + $0x198] sm:$0xf0] }
 0xd20   : > { %v4630_v8 = vor.u32 %v5090_v30, %v4627_v31 }
 0xd22   : > { %3145 = vmatpush.bf16.msrb.mxu1 %v4630_v8  ;;  %v5276_v8 = vld [vmem:[%s6244_s5 + $0x1] ss:$0 sm:$0xff] }
 0xd5e   : > { %v2715_v33 = vpop.permute.xlu0 %2714 }
 0xd5f   : > { %2717 = vst.msk [vmem:[#allocation2] sm:$0xff] %vm1248_vm8, %v2715_v33  ;;  %v5085_v33 = vld [vmem:[#allocation6 + $0x164] sm:$0xf] }
 0xd60   : > { %2779 = vst.msk [vmem:[#allocation2] sm:$0xff] %vm1311_vm9, %v2777_v34  ;;  %v4602_v34 = vor.u32 %v5087_v32, %v4601_v24  ;;  %v5277_v32 = vld [vmem:[%s6245_s6 + $0x1] ss:$0 sm:$0xff] }
 0xd62   : > { %3107 = vmatpush.bf16.msra.mxu2 %v4602_v34 }
 0xd66   : > { %3108 = vmatpush.bf16.msra.mxu2 %v4586_v46  ;;  %v5124_v46 = vld [vmem:[#allocation8 + $0x198] sm:$0xff] }
 0xd67   : > { %v2780_v29 = vld [vmem:[#allocation2] sm:$0xff] }
 0xd68   : > { %v2798_v62 = vpack.c.bf16 %v2780_v29, %v2780_v29  ;;  %v4603_v29 = vld [vmem:[#allocation6 + $0x170] sm:$0xf0] }
 0xd6a   : > { %2860 = vmatmul.bf16.vlgmr.msra.gmra.mxu1 %v2798_v62  ;;  %v4609_v62 = vld [vmem:[#allocation6 + $0x168] sm:$0xf] }
 0xde7   : > { %v2861_v35 = vpop.f32.mrf.mxu1 }
 0xde8   : > { %v2862_v37 = vadd.f32 %v5275_v36, %v2861_v35  ;;  %v5088_v36 = vld [vmem:[#allocation6 + $0x174] sm:$0xf0]  ;;  %v4606_v35 = vor.u32 %v5085_v33, %v4603_v29 }
 0xdea   : > { %v2865_v38 = vadd.f32 %v2862_v37, %v6003_v27  ;;  %v4610_v37 = vor.u32 %v5088_v36, %v4609_v62  ;;  %3120 = vmatpush.bf16.msrb.mxu3 %v4606_v35  ;;  %v5112_v36 = vld [vmem:[#allocation8 + $0x138] sm:$0xff] }
 0xdeb   : > { %v5120_v35 = vld [vmem:[#allocation8 + $0x178] sm:$0xff] }
 0xdec   : > { %2870 = vadd.xlane.f32.xlu0 %v2865_v38  ;;  %3133 = vmatpush.bf16.msra.mxu0 %v4610_v37  ;;  %v5126_v37 = vld [vmem:[#allocation8 + $0x1a8] sm:$0xff] }
 0xdee   : > { %3121 = vmatpush.bf16.msrb.mxu3 %v4590_v49  ;;  %v5123_v49 = vld [vmem:[#allocation8 + $0x190] sm:$0xff] }
 0xdef   : > { %v2863_v40 = vpop.f32.mrf.mxu1 }
 0xdf0   : > { %v4611_v40 = vld [vmem:[#allocation6 + $0x178] sm:$0xf0]  ;;  %3134 = vmatpush.bf16.msra.mxu0 %v4594_v50  ;;  %v5131_v50 = vld [vmem:[#allocation8 + $0x1d0] sm:$0xff] }
 0xdf2   : > { %3122 = vmatpush.bf16.msrb.mxu3 %v4574_v61  ;;  %v4550_v61 = vld [vmem:[%s6247_s8 + $0x4] sm:$0xf] }
 0xdf3   : > { %v2937_v1 = vperm.slane %v4550_v61, 2  ;;  %v2935_v7 = vperm.slane %v4550_v61, 0  ;;  %v2936_v22 = vperm.slane %v4550_v61, 1 }
 0xdf4   : > { %3135 = vmatpush.bf16.msra.mxu0 %v4578_v63  ;;  %v5105_v63 = vld [vmem:[#allocation8 + $0x100] sm:$0xff] }
 0xdf6   : > { %3123 = vmatpush.bf16.msrb.mxu3 %v4558_v10 }
 0xdf8   : > { %3136 = vmatpush.bf16.msra.mxu0 %v4562_v11 }
 0xdfa   : > { %3470 = vmatpush.bf16.msra.mxu3 %v5120_v35 }
 0xdfc   : > { %3483 = vmatpush.bf16.msrb.mxu0 %v5128_v17 }
 0xe00   : > { %3484 = vmatpush.bf16.msrb.mxu0 %v5127_v20 }
 0xe04   : > { %3485 = vmatpush.bf16.msrb.mxu0 %v5126_v37 }
 0xe5f   : > { %v2871_v53 = vpop.xlane.xlu0 %2870 }
 0xe60   : > { %v2872_v27 = vmul.f32 %v2871_v53, %v5964_v39  ;;  %v4598_v53 = vor.u32 %v5082_v51, %v4595_v52  ;;  %v5108_v51 = vld [vmem:[#allocation8 + $0x118] sm:$0xff] }
 0xe61   : > { %v5116_v52 = vld [vmem:[#allocation8 + $0x158] sm:$0xff] }
 0xe62   : > { %v6148_v54 = vsub.f32 %v2865_v38, %v2872_v27  ;;  %v5086_v38 = vld [vmem:[#allocation6 + $0x16c] sm:$0xf]  ;;  %v4569_v27 = vld [vmem:[#allocation6 + $0x120] sm:$0xf] }
 0xe63   : > { %v4614_v41 = vor.u32 %v5086_v38, %v4611_v40  ;;  %v5134_v38 = vld [vmem:[#allocation8 + $0x1e8] sm:$0xff]  ;;  %v5111_v40 = vld [vmem:[#allocation8 + $0x130] sm:$0xff] }
 0xe64   : > { %v2874_v55 = vmul.f32 %v6148_v54, %v6148_v54 }
 0xe65   : > { %3146 = vmatpush.bf16.msrb.mxu1 %v4614_v41  ;;  %v5125_v41 = vld [vmem:[#allocation8 + $0x1a0] sm:$0xff] }
 0xe66   : > { %2875 = vadd.xlane.f32.xlu2 %v2874_v55  ;;  %v5079_v55 = vld [vmem:[#allocation6 + $0x12c] sm:$0xf0]  ;;  %3486 = vmatpush.bf16.msrb.mxu0 %v5125_v41 }
 0xe67   : > { %v4570_v57 = vor.u32 %v5079_v55, %v4569_v27  ;;  %v5130_v27 = vld [vmem:[#allocation8 + $0x1c8] sm:$0xff]  ;;  %v5107_v55 = vld [vmem:[#allocation8 + $0x110] sm:$0xff] }
 0xe69   : > { %3147 = vmatpush.bf16.msrb.mxu1 %v4598_v53  ;;  %3109 = vmatpush.bf16.msra.mxu2 %v4570_v57  ;;  %v5122_v53 = vld [vmem:[#allocation8 + $0x188] sm:$0xff]  ;;  %v5121_v57 = vld [vmem:[#allocation8 + $0x180] sm:$0xff] }
 0xe6a   : > { %3487 = vmatpush.bf16.msrb.mxu0 %v5124_v46 }
 0xe6d   : > { %3148 = vmatpush.bf16.msrb.mxu1 %v4582_v2  ;;  %3110 = vmatpush.bf16.msra.mxu2 %v4554_v6  ;;  %v2938_v2 = vperm.slane %v4550_v61, 3  ;;  %v5278_v61 = vld [vmem:[%s6249_s10 + $0x1] ss:$0 sm:$0xff] }
 0xe6e   : > { %3488 = vmatpush.bf16.msrb.mxu0 %v5123_v49 }
 0xe71   : > { %3149 = vmatpush.bf16.msrb.mxu1 %v4566_v15  ;;  %3457 = vmatpush.bf16.msrb.mxu2 %v5112_v36 }
 0xe72   : > { %3489 = vmatpush.bf16.msrb.mxu0 %v5122_v53 }
 0xe75   : > { %3496 = vmatpush.bf16.msra.mxu1 %v5136_v18  ;;  %3458 = vmatpush.bf16.msrb.mxu2 %v5111_v40 }
 0xe76   : > { %3490 = vmatpush.bf16.msrb.mxu0 %v5121_v57 }
 0xe79   : > { %3497 = vmatpush.bf16.msra.mxu1 %v5135_v21  ;;  %3459 = vmatpush.bf16.msrb.mxu2 %v5110_v44 }
 0xe7d   : > { %3498 = vmatpush.bf16.msra.mxu1 %v5134_v38  ;;  %3460 = vmatpush.bf16.msrb.mxu2 %v5109_v47 }
 0xe81   : > { %3499 = vmatpush.bf16.msra.mxu1 %v5133_v43  ;;  %3461 = vmatpush.bf16.msrb.mxu2 %v5108_v51 }
 0xe85   : > { %3500 = vmatpush.bf16.msra.mxu1 %v5132_v14  ;;  %3462 = vmatpush.bf16.msrb.mxu2 %v5107_v55 }
 0xe89   : > { %3501 = vmatpush.bf16.msra.mxu1 %v5131_v50  ;;  %3463 = vmatpush.bf16.msrb.mxu2 %v5106_v59 }
 0xe8d   : > { %3502 = vmatpush.bf16.msra.mxu1 %v5130_v27  ;;  %3464 = vmatpush.bf16.msrb.mxu2 %v5105_v63 }
 0xe91   : > { %3503 = vmatpush.bf16.msra.mxu1 %v5129_v58 }
 0xed9   : > { %v2876_v16 = vpop.xlane.xlu2 %2875 }
 0xeda   : > { %v2877_v19 = vmul.f32 %v2876_v16, %v5964_v39 }
 0xedc   : > { %v2878_v23 = vadd.f32 1e-05, %v2877_v19 }
 0xede   : > { %5359 = vrsqrt.f32 %v2878_v23  ;;  %vm2885_vm1 = vweird.f32 %v2878_v23 }
 0xee4   : > { %v5360_v25 = vpop.eup %5359 }
 0xee5   : > { %v2880_v26 = vmul.f32 %v5360_v25, %v2878_v23  ;;  %vm2886_vm0 = vweird.f32 %v5360_v25 }
 0xee6   : > { %vm2887_vm2 = vmor %vm2885_vm1, %vm2886_vm0 }
 0xee7   : > { %v2881_v42 = vmul.f32 %v5360_v25, %v2880_v26 }
 0xee9   : > { %v2882_v28 = vmul.f32 0.5, %v2881_v42 }
 0xeeb   : > { %v2883_v30 = vsub.f32 1.5, %v2882_v28 }
 0xeed   : > { %v2884_v31 = vmul.f32 %v5360_v25, %v2883_v30 }
 0xeef   : > { %v2888_v24 = vsel %vm2887_vm2, %v5360_v25, %v2884_v31 }
 0xef0   : > { %v2889_v33 = vmul.f32 %v2888_v24, %v6148_v54  ;;  %v5119_v54 = vld [vmem:[#allocation8 + $0x170] sm:$0xff] }
 0xef1   : > { %3471 = vmatpush.bf16.msra.mxu3 %v5119_v54 }
 0xef2   : > { %v2893_v34 = vmul.f32 %v5276_v8, %v2889_v33 }
 0xef4   : > { %v6160_v29 = vadd.f32 %v5277_v32, %v2893_v34 }
 0xef5   : > { %3472 = vmatpush.bf16.msra.mxu3 %v5118_v45 }
 0xef6   : > { %v2931_v62 = vpack.c.bf16 %v6160_v29, %v6160_v29 }
 0xef8   : > { %3111 = vmatmul.bf16.vlgmr.msra.gmra.mxu2 %v2931_v62  ;;  %3124 = vmatmul.bf16.vlgmr.msrb.gmra.mxu3 %v2931_v62 }
 0xef9   : > { %3137 = vmatmul.bf16.vlgmr.msra.gmra.mxu0 %v2931_v62  ;;  %3150 = vmatmul.bf16.vlgmr.msrb.gmra.mxu1 %v2931_v62 }
 0xefa   : > { %3473 = vmatpush.bf16.msra.mxu3 %v5117_v48 }
 0xefe   : > { %3474 = vmatpush.bf16.msra.mxu3 %v5116_v52 }
 0xf02   : > { %3475 = vmatpush.bf16.msra.mxu3 %v5115_v56 }
 0xf06   : > { %3476 = vmatpush.bf16.msra.mxu3 %v5114_v60 }
 0xf0a   : > { %3477 = vmatpush.bf16.msra.mxu3 %v5113_v0 }
 0xf76   : > { %v3138_v3 = vpop.f32.mrf.mxu0  ;;  %v3151_v4 = vpop.f32.mrf.mxu1 }
 0xf77   : > { %v3139_v5 = vadd.f32 %v3138_v3, %v2937_v1  ;;  %v3152_v6 = vadd.f32 %v3151_v4, %v2938_v2 }
 0xf79   : > { %v3161_v9 = vmul.f32 0.044715, %v3139_v5  ;;  %v3162_v10 = vmul.f32 0.044715, %v3152_v6  ;;  %v3157_v54 = vmul.f32 0.5, %v3139_v5  ;;  %v3158_v43 = vmul.f32 0.5, %v3152_v6 }
 0xf7b   : > { %v3165_v11 = vmul.f32 %v3161_v9, %v3139_v5  ;;  %v3166_v12 = vmul.f32 %v3162_v10, %v3152_v6  ;;  %v3112_v13 = vpop.f32.mrf.mxu2  ;;  %v3125_v15 = vpop.f32.mrf.mxu3  ;;  %v4924_v9 = vld [vmem:[#allocation9 + $0xe0] sm:$0xf]  ;;  %v5167_v10 = vld [vmem:[#allocation9 + $0xec] sm:$0xf0] }
 0xf7c   : > { %v3113_v16 = vadd.f32 %v3112_v13, %v2935_v7  ;;  %v3126_v17 = vadd.f32 %v3125_v15, %v2936_v22  ;;  %v4926_v13 = vld [vmem:[#allocation9 + $0xf0] sm:$0xf0]  ;;  %v4932_v15 = vld [vmem:[#allocation9 + $0xe8] sm:$0xf] }
 0xf7d   : > { %v3169_v18 = vmul.f32 %v3165_v11, %v3139_v5  ;;  %v3170_v19 = vmul.f32 %v3166_v12, %v3152_v6  ;;  %v5165_v11 = vld [vmem:[#allocation9 + $0xe4] sm:$0xf]  ;;  %v4925_v12 = vor.u32 %v5167_v10, %v4924_v9  ;;  %v4844_v10 = vld [vmem:[#allocation9 + $0x40] sm:$0xf] }
 0xf7e   : > { %v3159_v20 = vmul.f32 0.044715, %v3113_v16  ;;  %v3160_v21 = vmul.f32 0.044715, %v3126_v17  ;;  %v3140_v23 = vpop.f32.mrf.mxu0  ;;  %v3153_v25 = vpop.f32.mrf.mxu1  ;;  %v3155_v49 = vmul.f32 0.5, %v3113_v16  ;;  %v3156_v52 = vmul.f32 0.5, %v3126_v17 }
 0xf7f   : > { %v3173_v26 = vadd.f32 %v3169_v18, %v3139_v5  ;;  %v3174_v42 = vadd.f32 %v3170_v19, %v3152_v6  ;;  %v5166_v19 = vld [vmem:[#allocation9 + $0xec] sm:$0xf]  ;;  %3746 = vmatpush.bf16.msra.mxu2 %v4925_v12  ;;  %v5145_v12 = vld [vmem:[#allocation9 + $0x44] sm:$0xf] }
 0xf80   : > { %v3163_v28 = vmul.f32 %v3159_v20, %v3113_v16  ;;  %v3164_v30 = vmul.f32 %v3160_v21, %v3126_v17  ;;  %v4934_v20 = vld [vmem:[#allocation9 + $0xf8] sm:$0xf0] }
 0xf81   : > { %v3177_v31 = vmul.f32 0.7978846, %v3173_v26  ;;  %v3178_v8 = vmul.f32 0.7978846, %v3174_v42  ;;  %v4937_v21 = vor.u32 %v5166_v19, %v4934_v20  ;;  %v4908_v42 = vld [vmem:[#allocation9 + $0xc0] sm:$0xf] }
 0xf82   : > { %v3167_v24 = vmul.f32 %v3163_v28, %v3113_v16  ;;  %v3168_v32 = vmul.f32 %v3164_v30, %v3126_v17  ;;  %v5163_v28 = vld [vmem:[#allocation9 + $0xcc] sm:$0xf0]  ;;  %v5161_v30 = vld [vmem:[#allocation9 + $0xc4] sm:$0xf]  ;;  %v5146_v20 = vld [vmem:[#allocation9 + $0x4c] sm:$0xf] }
 0xf83   : > { %5361 = vtanh.f32 %v3177_v31  ;;  %v3114_v33 = vpop.f32.mrf.mxu2  ;;  %v3127_v34 = vpop.f32.mrf.mxu3  ;;  %3785 = vmatpush.bf16.msrb.mxu1 %v4937_v21  ;;  %v4909_v31 = vor.u32 %v5163_v28, %v4908_v42  ;;  %v4854_v21 = vld [vmem:[#allocation9 + $0x58] sm:$0xf0]  ;;  %v5141_v42 = vld [vmem:[#allocation9 + $0x24] sm:$0xf] }
 0xf84   : > { %5363 = vtanh.f32 %v3178_v8  ;;  %v3171_v62 = vadd.f32 %v3167_v24, %v3113_v16  ;;  %v3172_v36 = vadd.f32 %v3168_v32, %v3126_v17  ;;  %v5168_v16 = vld [vmem:[#allocation9 + $0xf4] sm:$0xf0]  ;;  %v4929_v17 = vor.u32 %v5165_v11, %v4926_v13  ;;  %v4910_v8 = vld [vmem:[#allocation9 + $0xd0] sm:$0xf0]  ;;  %v4916_v24 = vld [vmem:[#allocation9 + $0xc8] sm:$0xf] }
 0xf85   : > { %v4933_v18 = vor.u32 %v5168_v16, %v4932_v15  ;;  %v5164_v32 = vld [vmem:[#allocation9 + $0xd4] sm:$0xf0]  ;;  %v4913_v33 = vor.u32 %v5161_v30, %v4910_v8  ;;  %3747 = vmatpush.bf16.msra.mxu2 %v4909_v31  ;;  %v5147_v11 = vld [vmem:[#allocation9 + $0x4c] sm:$0xf0]  ;;  %v4846_v15 = vld [vmem:[#allocation9 + $0x50] sm:$0xf0] }
 0xf86   : > { %v3175_v35 = vmul.f32 0.7978846, %v3171_v62  ;;  %v3176_v37 = vmul.f32 0.7978846, %v3172_v36  ;;  %3759 = vmatpush.bf16.msrb.mxu3 %v4929_v17  ;;  %v4917_v34 = vor.u32 %v5164_v32, %v4916_v24  ;;  %v5162_v62 = vld [vmem:[#allocation9 + $0xcc] sm:$0xf]  ;;  %v4845_v13 = vor.u32 %v5147_v11, %v4844_v10 }
 0xf87   : > { %3772 = vmatpush.bf16.msra.mxu0 %v4933_v18  ;;  %v4918_v36 = vld [vmem:[#allocation9 + $0xd8] sm:$0xf0]  ;;  %v4852_v16 = vld [vmem:[#allocation9 + $0x48] sm:$0xf]  ;;  %v5148_v17 = vld [vmem:[#allocation9 + $0x54] sm:$0xf0]  ;;  %v4849_v18 = vor.u32 %v5145_v12, %v4846_v15 }
 0xf88   : > { %5365 = vtanh.f32 %v3175_v35  ;;  %v4921_v35 = vor.u32 %v5162_v62, %v4918_v36  ;;  %v4853_v19 = vor.u32 %v5148_v17, %v4852_v16  ;;  %v4830_v30 = vld [vmem:[#allocation9 + $0x30] sm:$0xf0]  ;;  %v4836_v31 = vld [vmem:[#allocation9 + $0x28] sm:$0xf]  ;;  %v5144_v8 = vld [vmem:[#allocation9 + $0x34] sm:$0xf0] }
 0xf89   : > { %v5362_v38 = vpop.eup %5361  ;;  %5367 = vtanh.f32 %v3176_v37  ;;  %v4892_v37 = vld [vmem:[#allocation9 + $0xa0] sm:$0xf]  ;;  %v4833_v24 = vor.u32 %v5141_v42, %v4830_v30  ;;  %v4837_v32 = vor.u32 %v5144_v8, %v4836_v31 }
 0xf8a   : > { %v5364_v40 = vpop.eup %5363  ;;  %v3185_v41 = vadd.f32 1.0, %v5362_v38  ;;  %3760 = vmatpush.bf16.msrb.mxu3 %v4913_v33  ;;  %v5159_v38 = vld [vmem:[#allocation9 + $0xac] sm:$0xf0]  ;;  %3786 = vmatpush.bf16.msrb.mxu1 %v4921_v35  ;;  %v5142_v33 = vld [vmem:[#allocation9 + $0x2c] sm:$0xf] }
 0xf8b   : > { %v3186_v44 = vadd.f32 1.0, %v5364_v40  ;;  %3773 = vmatpush.bf16.msra.mxu0 %v4917_v34  ;;  %v5157_v40 = vld [vmem:[#allocation9 + $0xa4] sm:$0xf]  ;;  %v4838_v34 = vld [vmem:[#allocation9 + $0x38] sm:$0xf0] }
 0xf8c   : > { %v3189_v45 = vmul.f32 %v3185_v41, %v3157_v54  ;;  %v4893_v54 = vor.u32 %v5159_v38, %v4892_v37  ;;  %v4894_v41 = vld [vmem:[#allocation9 + $0xb0] sm:$0xf0]  ;;  %v4841_v62 = vor.u32 %v5142_v33, %v4838_v34  ;;  %v4812_v36 = vld [vmem:[#allocation9] sm:$0xf]  ;;  %v5139_v35 = vld [vmem:[#allocation9 + $0xc] sm:$0xf0] }
 0xf8d   : > { %v3190_v46 = vmul.f32 %v3186_v44, %v3158_v43  ;;  %v4900_v43 = vld [vmem:[#allocation9 + $0xa8] sm:$0xf]  ;;  %v5160_v44 = vld [vmem:[#allocation9 + $0xb4] sm:$0xf0]  ;;  %v5137_v37 = vld [vmem:[#allocation9 + $0x4] sm:$0xf]  ;;  %v4813_v38 = vor.u32 %v5139_v35, %v4812_v36 }
 0xf8e   : > { %v5366_v14 = vpop.eup %5365  ;;  %v3258_v47 = vpack.c.bf16 %v3189_v45, %v3189_v45  ;;  %v4897_v45 = vor.u32 %v5157_v40, %v4894_v41  ;;  %3748 = vmatpush.bf16.msra.mxu2 %v4893_v54  ;;  %v4814_v40 = vld [vmem:[#allocation9 + $0x10] sm:$0xf0]  ;;  %v4820_v54 = vld [vmem:[#allocation9 + $0x8] sm:$0xf]  ;;  %v5140_v41 = vld [vmem:[#allocation9 + $0x14] sm:$0xf0] }
 0xf8f   : > { %v5368_v48 = vpop.eup %5367  ;;  %v3259_v50 = vpack.c.bf16 %v3190_v46, %v3190_v46  ;;  %v3183_v51 = vadd.f32 1.0, %v5366_v14  ;;  %v4901_v46 = vor.u32 %v5160_v44, %v4900_v43  ;;  %v5158_v14 = vld [vmem:[#allocation9 + $0xac] sm:$0xf]  ;;  %v4817_v43 = vor.u32 %v5137_v37, %v4814_v40 }
 0xf90   : > { %3491 = vmatmul.bf16.vlgmr.msrb.gmra.mxu0 %v3258_v47  ;;  %v3184_v53 = vadd.f32 1.0, %v5368_v48  ;;  %v4902_v47 = vld [vmem:[#allocation9 + $0xb8] sm:$0xf0]  ;;  %3761 = vmatpush.bf16.msrb.mxu3 %v4897_v45  ;;  %v4821_v44 = vor.u32 %v5140_v41, %v4820_v54  ;;  %v5138_v45 = vld [vmem:[#allocation9 + $0xc] sm:$0xf] }
 0xf91   : > { %3504 = vmatmul.bf16.vlgmr.msra.gmra.mxu1 %v3259_v50  ;;  %v3187_v27 = vmul.f32 %v3183_v51, %v3155_v49  ;;  %v4905_v48 = vor.u32 %v5158_v14, %v4902_v47  ;;  %3774 = vmatpush.bf16.msra.mxu0 %v4901_v46  ;;  %v4876_v49 = vld [vmem:[#allocation9 + $0x80] sm:$0xf]  ;;  %v5155_v50 = vld [vmem:[#allocation9 + $0x8c] sm:$0xf0]  ;;  %v5153_v51 = vld [vmem:[#allocation9 + $0x84] sm:$0xf] }
 0xf92   : > { %v3188_v55 = vmul.f32 %v3184_v53, %v3156_v52  ;;  %v4877_v52 = vor.u32 %v5155_v50, %v4876_v49  ;;  %v4878_v53 = vld [vmem:[#allocation9 + $0x90] sm:$0xf0]  ;;  %v4822_v46 = vld [vmem:[#allocation9 + $0x18] sm:$0xf0] }
 0xf93   : > { %v3256_v56 = vpack.c.bf16 %v3187_v27, %v3187_v27  ;;  %3787 = vmatpush.bf16.msrb.mxu1 %v4905_v48  ;;  %v4884_v27 = vld [vmem:[#allocation9 + $0x88] sm:$0xf]  ;;  %v4825_v14 = vor.u32 %v5138_v45, %v4822_v46 }
 0xf94   : > { %v3257_v57 = vpack.c.bf16 %v3188_v55, %v3188_v55  ;;  %v5156_v55 = vld [vmem:[#allocation9 + $0x94] sm:$0xf0]  ;;  %3749 = vmatpush.bf16.msra.mxu2 %v4877_v52 }
 0xf95   : > { %3465 = vmatmul.bf16.vlgmr.msrb.gmra.mxu2 %v3256_v56  ;;  %v4881_v56 = vor.u32 %v5153_v51, %v4878_v53 }
 0xf96   : > { %3478 = vmatmul.bf16.vlgmr.msra.gmra.mxu3 %v3257_v57  ;;  %v4885_v57 = vor.u32 %v5156_v55, %v4884_v27 }
 0xf97   : > { %3762 = vmatpush.bf16.msrb.mxu3 %v4881_v56  ;;  %v5279_v56 = vld [vmem:[%s6250_s11 + $0x1] ss:$0 sm:$0xff] }
 0xf98   : > { %3775 = vmatpush.bf16.msra.mxu0 %v4885_v57  ;;  %v5280_v57 = vld [vmem:[%s6290_s7 + $0x1] ss:$0 sm:$0xff] }
0x100d   : > { %v3492_v58 = vpop.f32.mrf.mxu0 }
0x100e   : > { %v3505_v59 = vpop.f32.mrf.mxu1 }
0x1015   : > { %v3494_v60 = vpop.f32.mrf.mxu0 }
0x1016   : > { %v3507_v63 = vpop.f32.mrf.mxu1 }
0x1017   : > { %v5151_v63 = vld [vmem:[#allocation9 + $0x6c] sm:$0xf0] }
0x1018   : > { %v3466_v0 = vpop.f32.mrf.mxu2 }
0x1019   : > { %v3467_v1 = vadd.f32 %v5278_v61, %v3466_v0  ;;  %v3479_v2 = vpop.f32.mrf.mxu3  ;;  %v4860_v61 = vld [vmem:[#allocation9 + $0x60] sm:$0xf]  ;;  %v5149_v0 = vld [vmem:[#allocation9 + $0x64] sm:$0xf] }
0x101b   : > { %v3480_v3 = vadd.f32 %v3479_v2, %v3467_v1  ;;  %v4861_v1 = vor.u32 %v5151_v63, %v4860_v61  ;;  %v4862_v2 = vld [vmem:[#allocation9 + $0x70] sm:$0xf0] }
0x101d   : > { %v3493_v4 = vadd.f32 %v3492_v58, %v3480_v3  ;;  %v5154_v58 = vld [vmem:[#allocation9 + $0x8c] sm:$0xf]  ;;  %v4868_v3 = vld [vmem:[#allocation9 + $0x68] sm:$0xf]  ;;  %3750 = vmatpush.bf16.msra.mxu2 %v4861_v1 }
0x101f   : > { %v3506_v5 = vadd.f32 %v3505_v59, %v3493_v4  ;;  %v4886_v59 = vld [vmem:[#allocation9 + $0x98] sm:$0xf0]  ;;  %v5152_v4 = vld [vmem:[#allocation9 + $0x74] sm:$0xf0] }
0x1020   : > { %v3468_v6 = vpop.f32.mrf.mxu2  ;;  %v4889_v60 = vor.u32 %v5154_v58, %v4886_v59 }
0x1021   : > { %v3481_v7 = vpop.f32.mrf.mxu3  ;;  %v3509_v22 = vadd.f32 %v3506_v5, %v6160_v29  ;;  %v4865_v5 = vor.u32 %v5149_v0, %v4862_v2  ;;  %v4869_v6 = vor.u32 %v5152_v4, %v4868_v3  ;;  %3751 = vmatpush.bf16.msra.mxu2 %v4845_v13 }
0x1022   : > { %3788 = vmatpush.bf16.msrb.mxu1 %v4889_v60  ;;  %v5150_v7 = vld [vmem:[#allocation9 + $0x6c] sm:$0xf] }
0x1023   : > { %3514 = vadd.xlane.f32.xlu1 %v3509_v22  ;;  %3763 = vmatpush.bf16.msrb.mxu3 %v4865_v5 }
0x1024   : > { %3776 = vmatpush.bf16.msra.mxu0 %v4869_v6 }
0x1027   : > { %3764 = vmatpush.bf16.msrb.mxu3 %v4849_v18 }
0x1028   : > { %3777 = vmatpush.bf16.msra.mxu0 %v4853_v19 }
0x102b   : > { %3765 = vmatpush.bf16.msrb.mxu3 %v4833_v24 }
0x102c   : > { %3778 = vmatpush.bf16.msra.mxu0 %v4837_v32 }
0x102f   : > { %3766 = vmatpush.bf16.msrb.mxu3 %v4817_v43 }
0x1030   : > { %3779 = vmatpush.bf16.msra.mxu0 %v4821_v44 }
0x1096   : > { %v3515_v23 = vpop.xlane.xlu1 %3514 }
0x1097   : > { %v3516_v29 = vmul.f32 %v3515_v23, %v5964_v39  ;;  %v4857_v23 = vor.u32 %v5146_v20, %v4854_v21 }
0x1099   : > { %v6172_v25 = vsub.f32 %v3509_v22, %v3516_v29  ;;  %v4870_v22 = vld [vmem:[#allocation9 + $0x78] sm:$0xf0]  ;;  %v4828_v29 = vld [vmem:[#allocation9 + $0x20] sm:$0xf] }
0x109a   : > { %v4873_v9 = vor.u32 %v5150_v7, %v4870_v22 }
0x109b   : > { %v3518_v26 = vmul.f32 %v6172_v25, %v6172_v25 }
0x109c   : > { %3789 = vmatpush.bf16.msrb.mxu1 %v4873_v9 }
0x109d   : > { %3519 = vadd.xlane.f32.xlu0 %v3518_v26  ;;  %v5143_v26 = vld [vmem:[#allocation9 + $0x2c] sm:$0xf0] }
0x109e   : > { %v4829_v28 = vor.u32 %v5143_v26, %v4828_v29 }
0x10a0   : > { %3790 = vmatpush.bf16.msrb.mxu1 %v4857_v23  ;;  %3752 = vmatpush.bf16.msra.mxu2 %v4829_v28 }
0x10a4   : > { %3791 = vmatpush.bf16.msrb.mxu1 %v4841_v62  ;;  %3753 = vmatpush.bf16.msra.mxu2 %v4813_v38 }
0x10a8   : > { %3792 = vmatpush.bf16.msrb.mxu1 %v4825_v14 }
0x1110   : > { %v3520_v47 = vpop.xlane.xlu0 %3519 }
0x1111   : > { %v3521_v48 = vmul.f32 %v3520_v47, %v5964_v39 }
0x1113   : > { %v3522_v49 = vadd.f32 1e-05, %v3521_v48 }
0x1115   : > { %5369 = vrsqrt.f32 %v3522_v49  ;;  %vm3529_vm4 = vweird.f32 %v3522_v49 }
0x111b   : > { %v5370_v50 = vpop.eup %5369 }
0x111c   : > { %v3524_v51 = vmul.f32 %v5370_v50, %v3522_v49  ;;  %vm3530_vm3 = vweird.f32 %v5370_v50 }
0x111d   : > { %vm3531_vm5 = vmor %vm3529_vm4, %vm3530_vm3 }
0x111e   : > { %v3525_v52 = vmul.f32 %v5370_v50, %v3524_v51 }
0x1120   : > { %v3526_v53 = vmul.f32 0.5, %v3525_v52 }
0x1122   : > { %v3527_v27 = vsub.f32 1.5, %v3526_v53 }
0x1124   : > { %v3528_v55 = vmul.f32 %v5370_v50, %v3527_v27 }
0x1126   : > { %v3532_v39 = vsel %vm3531_vm5, %v5370_v50, %v3528_v55 }
0x1127   : > { %v3533_v58 = vmul.f32 %v3532_v39, %v6172_v25 }
0x1129   : > { %v3537_v59 = vmul.f32 %v5279_v56, %v3533_v58 }
0x112b   : > { %v3541_v60 = vadd.f32 %v5280_v57, %v3537_v59 }
0x112d   : > { %v3575_v61 = vpack.c.bf16 %v3541_v60, %v3541_v60  ;;  %3542 = vst [vmem:[%s590_s27] sm:$0xff] %v3541_v60 }
0x112f   : > { %3754 = vmatmul.bf16.vlgmr.msra.gmra.mxu2 %v3575_v61  ;;  %3767 = vmatmul.bf16.vlgmr.msrb.gmra.mxu3 %v3575_v61 }
0x1130   : > { %3780 = vmatmul.bf16.vlgmr.msra.gmra.mxu0 %v3575_v61  ;;  %3793 = vmatmul.bf16.vlgmr.msrb.gmra.mxu1 %v3575_v61 }
0x1131   : > { %5518 = shalt.err (!%p5515_p8)
}
0x1132   : > { %5187 = dma.vmem_to_hbm [thread:$0]  (%p5740_p5), %s3836_s19, 128, %s3838_s18, %s3808_s17  }
0x1133   : > { %s6294_s29 = sld [smem:[#allocation31_spill]]  ;;  %s3983_s1 = sshll.u32 %s6178_s15, 5 }
0x1134   : > { %s5169_s12 = sshll.u32 %s5723_s25, 5  ;;  %s6295_s30 = sld [smem:[#allocation32_spill]] }
0x1135   : > { %s583_s19 = scalar_lea.vmem [#allocation11], %s3983_s1  ;;  %s3803_s25 = scalar_lea.sflag [#allocation5], %s6178_s15 }
0x1136   : > { %s3821_s18 = sshll.u32 %s583_s19, 4  ;;  %s3822_s18 = int_to_ptr.vmem [resolvable:$true] %s3821_s18 }
0x1139   : > { %v3576_v25 = vld [vmem:[%s6294_s29] sm:$0xf] }
0x113a   : > { %v3580_v63 = vperm.slane %v3576_v25, 2  ;;  %v3581_v0 = vperm.slane %v3576_v25, 3  ;;  %s3819_s0 = scalar_lea.hbm %s6295_s30, %s5169_s12  ;;  %v3578_v5 = vperm.slane %v3576_v25, 0  ;;  %v3579_v6 = vperm.slane %v3576_v25, 1  ;;  %s5539_s23 = scalar_lea.hbm %s6295_s30, 64 }
0x113b   : > { %s3823_s17 = sshll.u32 %s3819_s0, 4  ;;  %s3824_s17 = int_to_ptr.hbm [resolvable:$true] %s3823_s17 }
0x113c   : > { %s5533_s16 = sshra.s32 %s3824_s17, 4  ;;  %s5534_s16 = int_to_ptr.hbm [resolvable:$true] %s5533_s16 }
0x113d   : > { %s5535_s21 = scalar_lea.hbm %s5534_s16, 32  ;;  %p5540_p12 = scmp.lt.s32.totalorder %s5534_s16, %s6295_s30 }
0x113e   : > { %p5536_p9 = scmp.ne.s32.totalorder %s5534_s16, %s5535_s21  ;;  %p5541_p13 = scmp.lt.s32.totalorder %s5539_s23, %s5535_s21 }
0x1140   : > { %p5537_p10 = pnand %p5536_p9, %p5740_p5  ;;  %p5542_p0 = por %p5541_p13, %p5540_p12 }
0x1142   : > { %p5538_p11 = pneg %p5537_p10 }
0x1144   : > { %p5543_p1 = pnand %p5542_p0, %p5538_p11 }
0x11ad   : > { %v3781_v1 = vpop.f32.mrf.mxu0  ;;  %v3794_v2 = vpop.f32.mrf.mxu1 }
0x11ae   : > { %v3782_v3 = vadd.f32 %v3781_v1, %v3580_v63  ;;  %v3795_v4 = vadd.f32 %v3794_v2, %v3581_v0 }
0x11b0   : > { %3800 = vst [vmem:[%s583_s19 + $0x10] sm:$0xff] %v3782_v3 }
0x11b1   : > { %3801 = vst [vmem:[%s583_s19 + $0x18] sm:$0xff] %v3795_v4 }
0x11b2   : > { %v3755_v7 = vpop.f32.mrf.mxu2  ;;  %v3768_v22 = vpop.f32.mrf.mxu3 }
0x11b3   : > { %v3756_v9 = vadd.f32 %v3755_v7, %v3578_v5  ;;  %v3769_v10 = vadd.f32 %v3768_v22, %v3579_v6 }
0x11b5   : > { %3798 = vst [vmem:[%s583_s19] sm:$0xff] %v3756_v9  ;;  %v3783_v11 = vpop.f32.mrf.mxu0  ;;  %v3796_v12 = vpop.f32.mrf.mxu1 }
0x11b6   : > { %3799 = vst [vmem:[%s583_s19 + $0x8] sm:$0xff] %v3769_v10 }
0x11b7   : > { %5546 = shalt.err (!%p5543_p1)
}
0x11b8   : > { %5186 = dma.vmem_to_hbm [thread:$0]  (%p5740_p5), %s3822_s18, 512, %s3824_s17, %s3803_s25  }
0x11ba   : > { %v3757_v13 = vpop.f32.mrf.mxu2  ;;  %v3770_v15 = vpop.f32.mrf.mxu3 }
0x11bb PF: > { %s6296_s15 = sld [smem:[#allocation22_spill]] }
0x11bc   : > { %s6297_s1 = sld [smem:[#allocation19_spill]] }
0x11c1   : > { %p5218_p2 = scmp.ge.s32.totalorder %s6296_s15, 2 }
0x11c2   : > { %s3849_s28 = sand.u32 1, %s6297_s1  }
0x11c3   : > { %p5204_p3 = pnand %p5218_p2, %p5744_p6  ;;  %s3850_s14 = scalar_lea.sflag [#allocation5], %s3849_s28 }
0x11c5   : > { %p5205_p4 = pneg %p5204_p3 }
0x11c7   : > { %5576 = dma.done.wait (%p5205_p4), %s3850_s14, 512  }
0x11c8   : > { %5578 = vsyncadd (%p5205_p4), %s3850_s14, 4294966784  ;;  %s3860_s0 = scalar_lea.sflag [#allocation13], %s3849_s28 }
0x11c9   : > { %5580 = dma.done.wait (%p5205_p4), %s3860_s0, 128  }
0x11ca   : > { %5582 = vsyncadd (%p5205_p4), %s3860_s0, 4294967168  ;;  %s6299_s24 = sld [smem:[#allocation23_spill]] }
0x11cb   : > { %s6300_s21 = sld [smem:[#allocation20_spill]] }
0x11cc   : > { %s6301_s22 = sld [smem:[#allocation21_spill]] }
0x11cd   : > { %s6302_s23 = sld [smem:[#allocation24_spill]] }
0x11d0   : > { %p33_p5 = scmp.ge.s32.totalorder %s6299_s24, 4  }
0x11d2   :  { %35 = sbr.rel (!%p33_p5) target bundleno = 16 (0x10), region = 161 }
0x11d7   :  { %3866 = vsyncpa [#allocation4], 1 }
0x11d8   :  { %3868 = vsyncpa [#allocation4 + $0x1], 1 }
0x11d9   :  { %3869 = vsyncpa [#allocation7], 1 }
0x11da   :  { %3870 = vsyncpa [#allocation10], 1 }
0x11db   :  { %3871 = vsyncpa [#allocation5], 1 }
0x11dc   :  { %3873 = vsyncpa [#allocation5 + $0x1], 1 }
0x11dd   :  { %3874 = vsyncpa [#allocation13], 1 }
0x11de   :  { %3876 = vsyncpa [#allocation13 + $0x1], 1 }

</bundles_post_ra>
